<compile_context>
chip_gen: v6e
topology: v6e:2x2x1
jax: 0.10.0
libtpu: 0.0.40
codegen_flags: <defaults>
</compile_context>

<pallas_src>
import jax
import jax.numpy as jnp
from jax.experimental import pallas as pl
from jax.experimental.pallas import tpu as pltpu


def _round_up(a, m):
    return ((a + m - 1) // m) * m


def _cdiv(a, b):
    return -(-a // b)


def _default_batch_tile():
    """Fixed per-generation batch tile (one Mosaic compile per shape family)."""
    try:
        kind = jax.devices()[0].device_kind.lower()
    except Exception:
        return 512
    if "v7" in kind:
        # 64 MiB VMEM, 2 TensorCores share the grid -> moderate tiles.
        # TODO(synk): also force an even grid on v7x for balanced cores.
        return 512
    # v5e / v6e: single TensorCore, 128 MiB VMEM -> bigger tiles amortize the
    # ~0.35us per-grid-step overhead with no lost parallelism.
    return 1024


def prepare_ncp_params(params):
    """One-time constant preprocessing (cache the result per parameter set).

    Folds SingularLayer sigma and the U/V second Linear layers into:
        M  = W2u diag(sigma) W2v^T   (h, h)   -> stored transposed, bf16
        u  = W2u (sigma * b2v)       (1, h)   f32
        v  = W2v (sigma * b2u)       (1, h)   f32
        c  = sum(sigma * b2u * b2v)  (1,)     f32 (SMEM scalar)
    All fusion math is done in f32; only the MXU operands are cast to bf16.
    """
    w1u, b1u, w2u, b2u, w1v, b1v, w2v, b2v, sw = [
        jnp.asarray(p, jnp.float32) for p in params]
    d = w2u.shape[1]
    sigma = jnp.sqrt(jnp.exp(-(sw.reshape(-1) ** 2)))        # (d,)
    b2u_f = b2u.reshape(-1)
    b2v_f = b2v.reshape(-1)

    w2u_s = w2u * sigma                                       # (h, d)
    m = w2u_s @ w2v.T                                         # (h, h)
    u_vec = w2u_s @ b2v_f                                     # (h,)
    v_vec = (w2v * sigma) @ b2u_f                             # (h,)
    c = jnp.sum(sigma * b2u_f * b2v_f).reshape(1)             # (1,)

    return dict(
        w1u=w1u.astype(jnp.bfloat16), b1u=b1u.reshape(1, -1),
        w1v=w1v.astype(jnp.bfloat16), b1v=b1v.reshape(1, -1),
        mt=m.T.astype(jnp.bfloat16),
        u_row=u_vec.reshape(1, -1), v_row=v_vec.reshape(1, -1),
        c=c,
    )


def ncp_forward_kernel(x_ref, y_ref, w1u_ref, b1u_ref, w1v_ref, b1v_ref,
                       mt_ref, u_ref, v_ref, c_ref, out_ref):
    """Fused NCP forward for one batch tile.

    x_ref  : (tb, dx)  f32   -- batch tile of x (cast to bf16 in-kernel)
    y_ref  : (tb, dy)  f32   -- batch tile of y
    w1u_ref: (dx, h)   bf16  | b1u_ref: (1, h) f32
    w1v_ref: (dy, h)   bf16  | b1v_ref: (1, h) f32
    mt_ref : (h, h)    bf16  -- (W2u diag(sigma) W2v^T)^T
    u_ref  : (1, h)    f32   -- W2u (sigma*b2v)
    v_ref  : (1, h)    f32   -- W2v (sigma*b2u)
    c_ref  : (1,)      f32   -- SMEM scalar sum(sigma*b2u*b2v)
    out_ref: (1, tb)   f32   -- lane-dense row of per-sample outputs
    """
    # Layer 1 for each branch; bf16 MXU operands, f32 accumulation, f32 ReLU.
    hu = jnp.dot(x_ref[...].astype(jnp.bfloat16), w1u_ref[...],
                 preferred_element_type=jnp.float32) + b1u_ref[...]
    hu = jnp.maximum(hu, 0.0)
    hv = jnp.dot(y_ref[...].astype(jnp.bfloat16), w1v_ref[...],
                 preferred_element_type=jnp.float32) + b1v_ref[...]
    hv = jnp.maximum(hv, 0.0)

    # Fused layer 2 + sigma + contraction: one (tb,h)@(h,h) dot + row reduces.
    t = jnp.dot(hv.astype(jnp.bfloat16), mt_ref[...],
                preferred_element_type=jnp.float32) + u_ref[...]
    row = (jnp.sum(hu * t, axis=-1)
           + jnp.sum(hv * v_ref[...], axis=-1)
           + c_ref[0])                                   # (tb,)
    out_ref[...] = row.reshape(1, -1)                    # lane-dense (1, tb) store


def ncp_forward(x, y, prepared, *, tb=None):
    """Pallas implementation of NCPOperator.forward(x, y) (postprocess=None).

    `prepared` must come from prepare_ncp_params (computed once, reused)."""
    B, dx = x.shape
    By, dy = y.shape
    assert B == By

    if tb is None:
        tb = _default_batch_tile()
    tb = _round_up(max(tb, 128), 128)
    if B <= tb:
        # One block covering the whole batch: block dims == array dims (legal
        # for any B), no padding, single grid step, exact lane-dense store.
        tb = B
    num_tiles = _cdiv(B, tb)
    out_w = num_tiles * tb   # == B when B <= tb; otherwise last block padded

    def const(arr):
        return pl.BlockSpec(arr.shape, lambda i: (0,) * arr.ndim)

    out = pl.pallas_call(
        ncp_forward_kernel,
        out_shape=jax.ShapeDtypeStruct((1, out_w), jnp.float32),
        grid_spec=pltpu.PrefetchScalarGridSpec(
            num_scalar_prefetch=0,
            grid=(num_tiles,),
            in_specs=[
                pl.BlockSpec((tb, dx), lambda i: (i, 0)),   # x batch tile
                pl.BlockSpec((tb, dy), lambda i: (i, 0)),   # y batch tile
                const(prepared["w1u"]),
                const(prepared["b1u"]),
                const(prepared["w1v"]),
                const(prepared["b1v"]),
                const(prepared["mt"]),
                const(prepared["u_row"]),
                const(prepared["v_row"]),
                pl.BlockSpec(memory_space=pltpu.MemorySpace.SMEM),  # scalar c
            ],
            out_specs=pl.BlockSpec((1, tb), lambda i: (0, i)),
        ),
        compiler_params=pltpu.CompilerParams(
            dimension_semantics=("parallel",)),
    )(x, y,
      prepared["w1u"], prepared["b1u"],
      prepared["w1v"], prepared["b1v"],
      prepared["mt"], prepared["u_row"], prepared["v_row"], prepared["c"])

    row = out[0]
    return row if out_w == B else row[:B]


def ncp_forward_ref(x, y, params):
    """Pure-JAX (f32) reference matching the PyTorch module semantics."""
    w1u, b1u, w2u, b2u, w1v, b1v, w2v, b2v, sw = params
    ux = jnp.maximum(x @ w1u + b1u, 0.0) @ w2u + b2u
    vy = jnp.maximum(y @ w1v + b1v, 0.0) @ w2v + b2v
    sigma = jnp.sqrt(jnp.exp(-(sw ** 2)))
    return jnp.sum(sigma * ux * vy, axis=-1)


def init_params(key, dx, dy, hidden, d):
    ks = jax.random.split(key, 9)
    scale = 0.1
    w1u = scale * jax.random.normal(ks[0], (dx, hidden), jnp.float32)
    b1u = scale * jax.random.normal(ks[1], (1, hidden), jnp.float32)
    w2u = scale * jax.random.normal(ks[2], (hidden, d), jnp.float32)
    b2u = scale * jax.random.normal(ks[3], (1, d), jnp.float32)
    w1v = scale * jax.random.normal(ks[4], (dy, hidden), jnp.float32)
    b1v = scale * jax.random.normal(ks[5], (1, hidden), jnp.float32)
    w2v = scale * jax.random.normal(ks[6], (hidden, d), jnp.float32)
    b2v = scale * jax.random.normal(ks[7], (1, d), jnp.float32)
    sw = jax.random.normal(ks[8], (1, d), jnp.float32)   # SingularLayer(d) weights
    return (w1u, b1u, w2u, b2u, w1v, b1v, w2v, b2v, sw)


if __name__ == "__main__":
    # Small, deterministic problem; B=300 exercises the non-128-aligned batch.
    B, dx, dy, hidden, d = 300, 16, 16, 32, 8
    key = jax.random.PRNGKey(0)
    kx, ky, kp = jax.random.split(key, 3)
    x = jax.random.normal(kx, (B, dx), jnp.float32)
    y = jax.random.normal(ky, (B, dy), jnp.float32)
    params = init_params(kp, dx, dy, hidden, d)

    prepared = prepare_ncp_params(params)       # one-time constant prep (cache this)

    ref = ncp_forward_ref(x, y, params)

    # Single-block path (B <= tile): no padding, exact full-batch block.
    out = jax.block_until_ready(ncp_forward(x, y, prepared))
    assert out.shape == (B,)
    assert jnp.allclose(out, ref, atol=2e-2, rtol=2e-2), \
        "mismatch vs reference (single-tile path)"

    # Multi-tile path (tb=128 -> grid=3, padded last input block, sliced tail).
    out_mt = jax.block_until_ready(ncp_forward(x, y, prepared, tb=128))
    assert out_mt.shape == (B,)
    assert jnp.allclose(out_mt, ref, atol=2e-2, rtol=2e-2), \
        "mismatch vs reference (multi-tile path)"

    print("KERNEL_OK")
</pallas_src>

<mosaic_0001>
module attributes {stable_mosaic.version = 11 : i64} {
  func.func @ncp_forward_kernel(%arg0: i32, %arg1: memref<300x16xf32, #tpu.memory_space<vmem>>, %arg2: memref<300x16xf32, #tpu.memory_space<vmem>>, %arg3: memref<16x32xbf16, #tpu.memory_space<vmem>>, %arg4: memref<1x32xf32, #tpu.memory_space<vmem>>, %arg5: memref<16x32xbf16, #tpu.memory_space<vmem>>, %arg6: memref<1x32xf32, #tpu.memory_space<vmem>>, %arg7: memref<32x32xbf16, #tpu.memory_space<vmem>>, %arg8: memref<1x32xf32, #tpu.memory_space<vmem>>, %arg9: memref<1x32xf32, #tpu.memory_space<vmem>>, %arg10: memref<1xf32, #tpu.memory_space<smem>>, %arg11: memref<1x300xf32, #tpu.memory_space<vmem>>) attributes {dimension_semantics = [#tpu.dimension_semantics<parallel>], iteration_bounds = array<i64: 1>, scalar_prefetch = 0 : i64, scratch_operands = 0 : i64, tpu.core_type = #tpu.core_type<tc>, window_params = [{transform_indices = @transform_0, window_bounds = array<i64: 300, 16>}, {transform_indices = @transform_1, window_bounds = array<i64: 300, 16>}, {pipeline_mode = #tpu.pipeline_mode<synchronous>, transform_indices = @transform_2, window_bounds = array<i64: 16, 32>}, {pipeline_mode = #tpu.pipeline_mode<synchronous>, transform_indices = @transform_3, window_bounds = array<i64: 1, 32>}, {pipeline_mode = #tpu.pipeline_mode<synchronous>, transform_indices = @transform_4, window_bounds = array<i64: 16, 32>}, {pipeline_mode = #tpu.pipeline_mode<synchronous>, transform_indices = @transform_5, window_bounds = array<i64: 1, 32>}, {pipeline_mode = #tpu.pipeline_mode<synchronous>, transform_indices = @transform_6, window_bounds = array<i64: 32, 32>}, {pipeline_mode = #tpu.pipeline_mode<synchronous>, transform_indices = @transform_7, window_bounds = array<i64: 1, 32>}, {pipeline_mode = #tpu.pipeline_mode<synchronous>, transform_indices = @transform_8, window_bounds = array<i64: 1, 32>}, {transform_indices = @transform_9, window_bounds = array<i64: 1>}, {transform_indices = @transform_10, window_bounds = array<i64: 1, 300>}]} {
    %c0 = arith.constant 0 : index
    %c0_0 = arith.constant 0 : index
    %0 = vector.load %arg1[%c0, %c0_0] : memref<300x16xf32, #tpu.memory_space<vmem>>, vector<300x16xf32>
    %1 = arith.truncf %0 : vector<300x16xf32> to vector<300x16xbf16>
    %c0_1 = arith.constant 0 : index
    %c0_2 = arith.constant 0 : index
    %2 = vector.load %arg3[%c0_1, %c0_2] : memref<16x32xbf16, #tpu.memory_space<vmem>>, vector<16x32xbf16>
    %cst = arith.constant dense<0.000000e+00> : vector<300x32xf32>
    %3 = tpu.matmul %1, %2, %cst {dimension_numbers = #tpu.dot_dimension_numbers<[1], [0], [0], [1], [0, 0, 1, 1], [], []>} : vector<300x16xbf16>, vector<16x32xbf16>, vector<300x32xf32> -> vector<300x32xf32>
    %c0_3 = arith.constant 0 : index
    %c0_4 = arith.constant 0 : index
    %4 = vector.load %arg4[%c0_3, %c0_4] : memref<1x32xf32, #tpu.memory_space<vmem>>, vector<1x32xf32>
    %5 = vector.broadcast %4 : vector<1x32xf32> to vector<300x32xf32>
    %6 = arith.addf %3, %5 : vector<300x32xf32>
    %cst_5 = arith.constant 0.000000e+00 : f32
    %7 = vector.broadcast %cst_5 : f32 to vector<300x32xf32>
    %8 = arith.maximumf %6, %7 : vector<300x32xf32>
    %c0_6 = arith.constant 0 : index
    %c0_7 = arith.constant 0 : index
    %9 = vector.load %arg2[%c0_6, %c0_7] : memref<300x16xf32, #tpu.memory_space<vmem>>, vector<300x16xf32>
    %10 = arith.truncf %9 : vector<300x16xf32> to vector<300x16xbf16>
    %c0_8 = arith.constant 0 : index
    %c0_9 = arith.constant 0 : index
    %11 = vector.load %arg5[%c0_8, %c0_9] : memref<16x32xbf16, #tpu.memory_space<vmem>>, vector<16x32xbf16>
    %cst_10 = arith.constant dense<0.000000e+00> : vector<300x32xf32>
    %12 = tpu.matmul %10, %11, %cst_10 {dimension_numbers = #tpu.dot_dimension_numbers<[1], [0], [0], [1], [0, 0, 1, 1], [], []>} : vector<300x16xbf16>, vector<16x32xbf16>, vector<300x32xf32> -> vector<300x32xf32>
    %c0_11 = arith.constant 0 : index
    %c0_12 = arith.constant 0 : index
    %13 = vector.load %arg6[%c0_11, %c0_12] : memref<1x32xf32, #tpu.memory_space<vmem>>, vector<1x32xf32>
    %14 = vector.broadcast %13 : vector<1x32xf32> to vector<300x32xf32>
    %15 = arith.addf %12, %14 : vector<300x32xf32>
    %cst_13 = arith.constant 0.000000e+00 : f32
    %16 = vector.broadcast %cst_13 : f32 to vector<300x32xf32>
    %17 = arith.maximumf %15, %16 : vector<300x32xf32>
    %18 = arith.truncf %17 : vector<300x32xf32> to vector<300x32xbf16>
    %c0_14 = arith.constant 0 : index
    %c0_15 = arith.constant 0 : index
    %19 = vector.load %arg7[%c0_14, %c0_15] : memref<32x32xbf16, #tpu.memory_space<vmem>>, vector<32x32xbf16>
    %cst_16 = arith.constant dense<0.000000e+00> : vector<300x32xf32>
    %20 = tpu.matmul %18, %19, %cst_16 {dimension_numbers = #tpu.dot_dimension_numbers<[1], [0], [0], [1], [0, 0, 1, 1], [], []>} : vector<300x32xbf16>, vector<32x32xbf16>, vector<300x32xf32> -> vector<300x32xf32>
    %c0_17 = arith.constant 0 : index
    %c0_18 = arith.constant 0 : index
    %21 = vector.load %arg8[%c0_17, %c0_18] : memref<1x32xf32, #tpu.memory_space<vmem>>, vector<1x32xf32>
    %22 = vector.broadcast %21 : vector<1x32xf32> to vector<300x32xf32>
    %23 = arith.addf %20, %22 : vector<300x32xf32>
    %24 = arith.mulf %8, %23 : vector<300x32xf32>
    %cst_19 = arith.constant dense<0.000000e+00> : vector<300xf32>
    %25 = vector.multi_reduction <add>, %24, %cst_19 [1] : vector<300x32xf32> to vector<300xf32>
    %c0_20 = arith.constant 0 : index
    %c0_21 = arith.constant 0 : index
    %26 = vector.load %arg9[%c0_20, %c0_21] : memref<1x32xf32, #tpu.memory_space<vmem>>, vector<1x32xf32>
    %27 = vector.broadcast %26 : vector<1x32xf32> to vector<300x32xf32>
    %28 = arith.mulf %17, %27 : vector<300x32xf32>
    %cst_22 = arith.constant dense<0.000000e+00> : vector<300xf32>
    %29 = vector.multi_reduction <add>, %28, %cst_22 [1] : vector<300x32xf32> to vector<300xf32>
    %30 = arith.addf %25, %29 : vector<300xf32>
    %c0_23 = arith.constant 0 : index
    %31 = memref.load %arg10[%c0_23] : memref<1xf32, #tpu.memory_space<smem>>
    %32 = vector.broadcast %31 : f32 to vector<300xf32>
    %33 = arith.addf %30, %32 : vector<300xf32>
    %34 = vector.shape_cast %33 : vector<300xf32> to vector<1x300xf32>
    %c0_24 = arith.constant 0 : index
    %c0_25 = arith.constant 0 : index
    %35 = vector.load %arg11[%c0_24, %c0_25] : memref<1x300xf32, #tpu.memory_space<vmem>>, vector<1x300xf32>
    tpu.vector_store %arg11[%c0_24, %c0_25], %34 {strides = array<i32>} : memref<1x300xf32, #tpu.memory_space<vmem>>, vector<1x300xf32>,
    return
  }
  func.func @transform_0(%arg0: i32) -> (i32, i32) {
    %c0_i32 = arith.constant 0 : i32
    %c0_i32_0 = arith.constant 0 : i32
    return %arg0, %c0_i32 : i32, i32
  }
  func.func @transform_1(%arg0: i32) -> (i32, i32) {
    %c0_i32 = arith.constant 0 : i32
    %c0_i32_0 = arith.constant 0 : i32
    return %arg0, %c0_i32 : i32, i32
  }
  func.func @transform_2(%arg0: i32) -> (i32, i32) {
    %c0_i32 = arith.constant 0 : i32
    %c0_i32_0 = arith.constant 0 : i32
    %c0_i32_1 = arith.constant 0 : i32
    return %c0_i32, %c0_i32_0 : i32, i32
  }
  func.func @transform_3(%arg0: i32) -> (i32, i32) {
    %c0_i32 = arith.constant 0 : i32
    %c0_i32_0 = arith.constant 0 : i32
    %c0_i32_1 = arith.constant 0 : i32
    return %c0_i32, %c0_i32_0 : i32, i32
  }
  func.func @transform_4(%arg0: i32) -> (i32, i32) {
    %c0_i32 = arith.constant 0 : i32
    %c0_i32_0 = arith.constant 0 : i32
    %c0_i32_1 = arith.constant 0 : i32
    return %c0_i32, %c0_i32_0 : i32, i32
  }
  func.func @transform_5(%arg0: i32) -> (i32, i32) {
    %c0_i32 = arith.constant 0 : i32
    %c0_i32_0 = arith.constant 0 : i32
    %c0_i32_1 = arith.constant 0 : i32
    return %c0_i32, %c0_i32_0 : i32, i32
  }
  func.func @transform_6(%arg0: i32) -> (i32, i32) {
    %c0_i32 = arith.constant 0 : i32
    %c0_i32_0 = arith.constant 0 : i32
    %c0_i32_1 = arith.constant 0 : i32
    return %c0_i32, %c0_i32_0 : i32, i32
  }
  func.func @transform_7(%arg0: i32) -> (i32, i32) {
    %c0_i32 = arith.constant 0 : i32
    %c0_i32_0 = arith.constant 0 : i32
    %c0_i32_1 = arith.constant 0 : i32
    return %c0_i32, %c0_i32_0 : i32, i32
  }
  func.func @transform_8(%arg0: i32) -> (i32, i32) {
    %c0_i32 = arith.constant 0 : i32
    %c0_i32_0 = arith.constant 0 : i32
    %c0_i32_1 = arith.constant 0 : i32
    return %c0_i32, %c0_i32_0 : i32, i32
  }
  func.func @transform_9(%arg0: i32) -> i32 {
    %c0_i32 = arith.constant 0 : i32
    %c0_i32_0 = arith.constant 0 : i32
    return %c0_i32 : i32
  }
  func.func @transform_10(%arg0: i32) -> (i32, i32) {
    %c0_i32 = arith.constant 0 : i32
    %c0_i32_0 = arith.constant 0 : i32
    return %c0_i32, %arg0 : i32, i32
  }
}

</mosaic_0001>

<bundles_post_ra>
// kernel: tpu_custom_call.1
= control target key start
LH: loop header
LB: loop body
LE: loop exit
PB: predicated region body
PF: predicated region fallthrough
CT: control target
= control target key end

     0   :  { %v5266_v1 = vmov 0.0   ;;  %vm5267_vm0 = vmmov 0   ;;  %vm110_vm1 = vcmask 130048   ;;  %s7305_s0 = inlined_call_operand.vmem [shape: f32[300,16], index: 0, kind: input, shape index: {}]   ;;  %s7306_s1 = inlined_call_operand.vmem [shape: f32[300,16], index: 1, kind: input, shape index: {}]   ;;  %s7307_s2 = inlined_call_operand.vmem [shape: bf16[16,32], index: 2, kind: input, shape index: {}]   ;;  %s7308_s3 = inlined_call_operand.vmem [shape: f32[1,32], index: 3, kind: input, shape index: {}]   ;;  %s7309_s4 = inlined_call_operand.vmem [shape: bf16[16,32], index: 4, kind: input, shape index: {}]   ;;  %s7310_s5 = inlined_call_operand.vmem [shape: f32[1,32], index: 5, kind: input, shape index: {}]   ;;  %s7311_s6 = inlined_call_operand.vmem [shape: bf16[32,32], index: 6, kind: input, shape index: {}]   ;;  %s7312_s7 = inlined_call_operand.vmem [shape: f32[1,32], index: 7, kind: input, shape index: {}]   ;;  %s7313_s8 = inlined_call_operand.vmem [shape: f32[1,32], index: 8, kind: input, shape index: {}]   ;;  %s7314_s9 = inlined_call_operand.<no memory space> [shape: f32[1], index: 9, kind: input, shape index: {}]   ;;  %s7315_s10 = inlined_call_operand.hbm [shape: f32[1,300], index: 10, kind: output, shape index: {}]  }
   0x1   :  { %v5240_v0 = vld [vmem:[%s7307_s2] sm:$0xff]   ;;  %5231 = vmatprep.subr.bf16.mxu1 %v5266_v1  ;;  %v59_v3 = vld [vmem:[%s7305_s0 + $0xa8] sm:$0xff]  ;;  %4995 = vmatprep.subr.bf16.mxu0 %v5266_v1  ;;  %v60_v6 = vld [vmem:[%s7305_s0 + $0xb0] sm:$0xff] }
   0x2   :  { %v58_v2 = vld [vmem:[%s7305_s0 + $0xa0] sm:$0xff]  ;;  %5232 = vmatpush3.bf16.msra.mxu1 %v5240_v0  ;;  %5037 = vmatprep.mubr.msk.bf16.mxu1 %vm5267_vm0, %v5266_v1  ;;  %v61_v7 = vld [vmem:[%s7305_s0 + $0xb8] sm:$0xff]  ;;  %v63_v10 = vld [vmem:[%s7305_s0 + $0xc8] sm:$0xff] }
   0x3   :  { %v86_v4 = vpack.c.bf16 %v59_v3, %v58_v2  ;;  %v5241_v5 = vld [vmem:[%s7309_s4] sm:$0xff]   ;;  %5073 = vmatprep.subr.bf16.mxu1 %v5266_v1  ;;  %4996 = vmatpush3.bf16.msra.mxu0 %v5240_v0  ;;  %v87_v8 = vpack.c.bf16 %v61_v7, %v60_v6 }
   0x4   :  { %4997 = vmatprep.mubr.msk.bf16.mxu0 %vm5267_vm0, %v5266_v1  ;;  %5151 = vmatprep.subr.bf16.mxu0 %v5266_v1  ;;  %v62_v9 = vld [vmem:[%s7305_s0 + $0xc0] sm:$0xff] }
   0x5   :  { %5038 = vmatmul.mubr.msk.bf16.vlgmr.msra.gmra.mxu1 %vm110_vm1, %v86_v4 }
   0x6   :  { %5074 = vmatpush3.bf16.msra.mxu1 %v5241_v5  ;;  %5041 = vmatprep.mubr.msk.bf16.mxu1 %vm5267_vm0, %v5266_v1 }
   0xd   :  { %5042 = vmatmul.mubr.msk.bf16.gmra.mxu1 %vm110_vm1, %v87_v8 }
   0xe   :  { %5045 = vmatprep.mubr.msk.bf16.mxu1 %vm5267_vm0, %v5266_v1 }
   0xf   :  { %16 = vsyncpa [#allocation4], 0  ;;  %v88_v11 = vpack.c.bf16 %v63_v10, %v62_v9  ;;  %v64_v12 = vld [vmem:[%s7305_s0 + $0xd0] sm:$0xff]  ;;  %v65_v13 = vld [vmem:[%s7305_s0 + $0xd8] sm:$0xff]  ;;  %vm785_vm2 = vcmask 261120   ;;  %vm1177_vm3 = vcmask 257024  }
  0x10   :  { %v89_v14 = vpack.c.bf16 %v65_v13, %v64_v12  ;;  %v66_v15 = vld [vmem:[%s7305_s0 + $0xe0] sm:$0xff]  ;;  %v67_v16 = vld [vmem:[%s7305_s0 + $0xe8] sm:$0xff]  ;;  %v68_v18 = vld [vmem:[%s7305_s0 + $0xf0] sm:$0xff]  ;;  %vm4618_vm4 = vcmask 130112   ;;  %vm4625_vm5 = vcmask 195712   ;;  %vm4632_vm6 = vcmask 261312  }
  0x11   :  { %v90_v17 = vpack.c.bf16 %v67_v16, %v66_v15  ;;  %v69_v19 = vld [vmem:[%s7305_s0 + $0xf8] sm:$0xff]  ;;  %v70_v21 = vld [vmem:[%s7305_s0 + $0x100] sm:$0xff]  ;;  %v71_v22 = vld [vmem:[%s7305_s0 + $0x108] sm:$0xff]  ;;  %vm4639_vm7 = vcmask 326912   ;;  %vm4646_vm8 = vcmask 392512   ;;  %vm4653_vm9 = vcmask 458112  }
  0x12   :  { %v91_v20 = vpack.c.bf16 %v69_v19, %v68_v18  ;;  %v92_v23 = vpack.c.bf16 %v71_v22, %v70_v21  ;;  %v72_v24 = vld [vmem:[%s7305_s0 + $0x110] sm:$0xff]  ;;  %v73_v25 = vld [vmem:[%s7305_s0 + $0x118] sm:$0xff]  ;;  %v38_v27 = vld [vmem:[%s7305_s0] sm:$0xff]  ;;  %vm4660_vm10 = vcmask 523712   ;;  %vm4667_vm11 = vcmask 589312  }
  0x13   :  { %v93_v26 = vpack.c.bf16 %v73_v25, %v72_v24  ;;  %v39_v28 = vld [vmem:[%s7305_s0 + $0x8] sm:$0xff]  ;;  %v74_v29 = vld [vmem:[%s7305_s0 + $0x120] sm:$0xff]  ;;  %v40_v35 = vld [vmem:[%s7305_s0 + $0x10] sm:$0xff]  ;;  %vm4674_vm12 = vcmask 654912   ;;  %vm4681_vm13 = vcmask 720512   ;;  %vm4688_vm14 = vcmask 786112  }
  0x14   :  { %v75_v30 = vld [vmem:[%s7305_s0 + $0x128] sm:$0xf]  ;;  %v76_v31 = vpack.c.bf16 %v39_v28, %v38_v27  ;;  %v391_v33 = vld [vmem:[%s7306_s1] sm:$0xff]  ;;  %v41_v36 = vld [vmem:[%s7305_s0 + $0x18] sm:$0xff]  ;;  %vm4695_vm15 = vcmask 851712  }
  0x15   :  { %5046 = vmatmul.mubr.msk.bf16.gmra.mxu1 %vm110_vm1, %v88_v11  ;;  %v94_v32 = vpack.c.bf16 %v75_v30, %v74_v29  ;;  %v392_v34 = vld [vmem:[%s7306_s1 + $0x8] sm:$0xff]  ;;  %v77_v37 = vpack.c.bf16 %v41_v36, %v40_v35  ;;  %v393_v40 = vld [vmem:[%s7306_s1 + $0x10] sm:$0xff]  ;;  %v394_v41 = vld [vmem:[%s7306_s1 + $0x18] sm:$0xff] }
  0x16   :  { %5049 = vmatprep.mubr.msk.bf16.mxu1 %vm5267_vm0, %v5266_v1  ;;  %4998 = vmatmul.mubr.msk.bf16.vlgmr.msra.gmra.mxu0 %vm110_vm1, %v76_v31  ;;  %v429_v38 = vpack.c.bf16 %v392_v34, %v391_v33  ;;  %v5242_v39 = vld [vmem:[%s7311_s6 + $0x8] sm:$0xff]   ;;  %v42_v42 = vld [vmem:[%s7305_s0 + $0x20] sm:$0xff]  ;;  %v430_v45 = vpack.c.bf16 %v394_v41, %v393_v40  ;;  %v44_v48 = vld [vmem:[%s7305_s0 + $0x30] sm:$0xff] }
  0x17   :  { %5001 = vmatprep.mubr.msk.bf16.mxu0 %vm5267_vm0, %v5266_v1  ;;  %5152 = vmatpush3.bf16.msra.mxu0 %v5242_v39  ;;  %v43_v43 = vld [vmem:[%s7305_s0 + $0x28] sm:$0xff]  ;;  %v395_v46 = vld [vmem:[%s7306_s1 + $0x20] sm:$0xff]  ;;  %v45_v49 = vld [vmem:[%s7305_s0 + $0x38] sm:$0xff] }
  0x18   :  { %5153 = vmatprep.subr.bf16.mxu0 %v5266_v1  ;;  %v78_v44 = vpack.c.bf16 %v43_v43, %v42_v42  ;;  %v396_v47 = vld [vmem:[%s7306_s1 + $0x28] sm:$0xff]  ;;  %v79_v50 = vpack.c.bf16 %v45_v49, %v44_v48  ;;  %v397_v52 = vld [vmem:[%s7306_s1 + $0x30] sm:$0xff]  ;;  %v398_v53 = vld [vmem:[%s7306_s1 + $0x38] sm:$0xff] }
  0x19   :  { %v431_v51 = vpack.c.bf16 %v396_v47, %v395_v46  ;;  %v46_v54 = vld [vmem:[%s7305_s0 + $0x40] sm:$0xff]  ;;  %v47_v55 = vld [vmem:[%s7305_s0 + $0x48] sm:$0xff]  ;;  %v432_v57 = vpack.c.bf16 %v398_v53, %v397_v52  ;;  %v48_v60 = vld [vmem:[%s7305_s0 + $0x50] sm:$0xff] }
  0x1a   :  { %v80_v56 = vpack.c.bf16 %v47_v55, %v46_v54  ;;  %v399_v58 = vld [vmem:[%s7306_s1 + $0x40] sm:$0xff]  ;;  %v400_v59 = vld [vmem:[%s7306_s1 + $0x48] sm:$0xff]  ;;  %v49_v61 = vld [vmem:[%s7305_s0 + $0x58] sm:$0xff] }
  0x1b   :  { %v81_v62 = vpack.c.bf16 %v49_v61, %v48_v60  ;;  %v433_v63 = vpack.c.bf16 %v400_v59, %v399_v58  ;;  %v401_v0 = vld [vmem:[%s7306_s1 + $0x50] sm:$0xff]  ;;  %v402_v2 = vld [vmem:[%s7306_s1 + $0x58] sm:$0xff]  ;;  %v50_v3 = vld [vmem:[%s7305_s0 + $0x60] sm:$0xff] }
  0x1c   :  { %v51_v4 = vld [vmem:[%s7305_s0 + $0x68] sm:$0xff]  ;;  %v434_v6 = vpack.c.bf16 %v402_v2, %v401_v0  ;;  %v5243_v7 = vld [vmem:[%s7311_s6] sm:$0xff]   ;;  %v52_v10 = vld [vmem:[%s7305_s0 + $0x70] sm:$0xff] }
  0x1d   :  { %5050 = vmatmul.mubr.msk.bf16.gmra.mxu1 %vm110_vm1, %v89_v14  ;;  %v82_v5 = vpack.c.bf16 %v51_v4, %v50_v3  ;;  %v403_v8 = vld [vmem:[%s7306_s1 + $0x60] sm:$0xff]  ;;  %v404_v9 = vld [vmem:[%s7306_s1 + $0x68] sm:$0xff]  ;;  %5154 = vmatpush3.bf16.msra.mxu0 %v5243_v7  ;;  %v53_v11 = vld [vmem:[%s7305_s0 + $0x78] sm:$0xff] }
  0x1e   :  { %5053 = vmatprep.mubr.msk.bf16.mxu1 %vm5267_vm0, %v5266_v1  ;;  %5002 = vmatmul.mubr.msk.bf16.gmra.mxu0 %vm110_vm1, %v77_v37  ;;  %v83_v12 = vpack.c.bf16 %v53_v11, %v52_v10  ;;  %v435_v13 = vpack.c.bf16 %v404_v9, %v403_v8  ;;  %v405_v14 = vld [vmem:[%s7306_s1 + $0x70] sm:$0xff]  ;;  %v406_v15 = vld [vmem:[%s7306_s1 + $0x78] sm:$0xff]  ;;  %v54_v16 = vld [vmem:[%s7305_s0 + $0x80] sm:$0xff] }
  0x1f   :  { %5005 = vmatprep.mubr.msk.bf16.mxu0 %vm5267_vm0, %v5266_v1  ;;  %v436_v19 = vpack.c.bf16 %v406_v15, %v405_v14  ;;  %v408_v21 = vld [vmem:[%s7306_s1 + $0x88] sm:$0xff]  ;;  %v56_v22 = vld [vmem:[%s7305_s0 + $0x90] sm:$0xff]  ;;  %v410_v27 = vld [vmem:[%s7306_s1 + $0x98] sm:$0xff] }
  0x20   :  { %v411_v29 = vld [vmem:[%s7306_s1 + $0xa0] sm:$0xff]  ;;  %v412_v30 = vld [vmem:[%s7306_s1 + $0xa8] sm:$0xff]  ;;  %v414_v33 = vld [vmem:[%s7306_s1 + $0xb8] sm:$0xff] }
  0x21   :  { %v439_v31 = vpack.c.bf16 %v412_v30, %v411_v29  ;;  %v415_v35 = vld [vmem:[%s7306_s1 + $0xc0] sm:$0xff]  ;;  %v416_v36 = vld [vmem:[%s7306_s1 + $0xc8] sm:$0xff]  ;;  %v418_v39 = vld [vmem:[%s7306_s1 + $0xd8] sm:$0xff] }
  0x22   :  { %v441_v37 = vpack.c.bf16 %v416_v36, %v415_v35  ;;  %v419_v41 = vld [vmem:[%s7306_s1 + $0xe0] sm:$0xff]  ;;  %v420_v42 = vld [vmem:[%s7306_s1 + $0xe8] sm:$0xff]  ;;  %v425_v55 = vld [vmem:[%s7306_s1 + $0x110] sm:$0xff] }
  0x23   :  { %v443_v43 = vpack.c.bf16 %v420_v42, %v419_v41  ;;  %v423_v48 = vld [vmem:[%s7306_s1 + $0x100] sm:$0xff]  ;;  %v424_v49 = vld [vmem:[%s7306_s1 + $0x108] sm:$0xff] }
  0x24   :  { %v445_v52 = vpack.c.bf16 %v424_v49, %v423_v48 }
  0x25   :  { %5054 = vmatmul.mubr.msk.bf16.gmra.mxu1 %vm110_vm1, %v90_v17  ;;  %v55_v17 = vld [vmem:[%s7305_s0 + $0x88] sm:$0xff] }
  0x26   :  { %5057 = vmatprep.mubr.msk.bf16.mxu1 %vm5267_vm0, %v5266_v1  ;;  %5006 = vmatmul.mubr.msk.bf16.gmra.mxu0 %vm110_vm1, %v78_v44  ;;  %v84_v18 = vpack.c.bf16 %v55_v17, %v54_v16  ;;  %v421_v44 = vld [vmem:[%s7306_s1 + $0xf0] sm:$0xff] }
  0x27   :  { %5009 = vmatprep.mubr.msk.bf16.mxu0 %vm5267_vm0, %v5266_v1 }
  0x2d   :  { %5058 = vmatmul.mubr.msk.bf16.gmra.mxu1 %vm110_vm1, %v91_v20  ;;  %v407_v20 = vld [vmem:[%s7306_s1 + $0x80] sm:$0xff] }
  0x2e   :  { %5061 = vmatprep.mubr.msk.bf16.mxu1 %vm5267_vm0, %v5266_v1  ;;  %5010 = vmatmul.mubr.msk.bf16.gmra.mxu0 %vm110_vm1, %v79_v50  ;;  %v437_v25 = vpack.c.bf16 %v408_v21, %v407_v20 }
  0x2f   :  { %5013 = vmatprep.mubr.msk.bf16.mxu0 %vm5267_vm0, %v5266_v1 }
  0x35   :  { %5062 = vmatmul.mubr.msk.bf16.gmra.mxu1 %vm110_vm1, %v92_v23  ;;  %v57_v23 = vld [vmem:[%s7305_s0 + $0x98] sm:$0xff] }
  0x36   :  { %5065 = vmatprep.mubr.msk.bf16.mxu1 %vm5267_vm0, %v5266_v1  ;;  %5014 = vmatmul.mubr.msk.bf16.gmra.mxu0 %vm110_vm1, %v80_v56  ;;  %v85_v24 = vpack.c.bf16 %v57_v23, %v56_v22  ;;  %v426_v56 = vld [vmem:[%s7306_s1 + $0x118] sm:$0xff] }
  0x37   :  { %5017 = vmatprep.mubr.msk.bf16.mxu0 %vm5267_vm0, %v5266_v1  ;;  %v446_v59 = vpack.c.bf16 %v426_v56, %v425_v55 }
  0x3d   :  { %5066 = vmatmul.mubr.msk.bf16.gmra.mxu1 %vm110_vm1, %v93_v26  ;;  %v409_v26 = vld [vmem:[%s7306_s1 + $0x90] sm:$0xff] }
  0x3e   :  { %5069 = vmatprep.mubr.msk.bf16.mxu1 %vm5267_vm0, %v5266_v1  ;;  %5018 = vmatmul.mubr.msk.bf16.gmra.mxu0 %vm110_vm1, %v81_v62  ;;  %v438_v28 = vpack.c.bf16 %v410_v27, %v409_v26  ;;  %v427_v62 = vld [vmem:[%s7306_s1 + $0x120] sm:$0xff] }
  0x3f   :  { %5021 = vmatprep.mubr.msk.bf16.mxu0 %vm5267_vm0, %v5266_v1 }
  0x45   :  { %5070 = vmatmul.mubr.msk.bf16.gmra.mxu1 %vm110_vm1, %v94_v32  ;;  %v413_v32 = vld [vmem:[%s7306_s1 + $0xb0] sm:$0xff] }
  0x46   :  { %5075 = vmatprep.mubr.msk.bf16.mxu1 %vm5267_vm0, %v5266_v1  ;;  %5022 = vmatmul.mubr.msk.bf16.gmra.mxu0 %vm110_vm1, %v82_v5  ;;  %v440_v34 = vpack.c.bf16 %v414_v33, %v413_v32 }
  0x47   :  { %5025 = vmatprep.mubr.msk.bf16.mxu0 %vm5267_vm0, %v5266_v1 }
  0x4d   :  { %5076 = vmatmul.mubr.msk.bf16.vlgmr.msra.gmra.mxu1 %vm110_vm1, %v429_v38  ;;  %v417_v38 = vld [vmem:[%s7306_s1 + $0xd0] sm:$0xff] }
  0x4e   :  { %5079 = vmatprep.mubr.msk.bf16.mxu1 %vm5267_vm0, %v5266_v1  ;;  %5026 = vmatmul.mubr.msk.bf16.gmra.mxu0 %vm110_vm1, %v83_v12  ;;  %v442_v40 = vpack.c.bf16 %v418_v39, %v417_v38 }
  0x4f   :  { %5029 = vmatprep.mubr.msk.bf16.mxu0 %vm5267_vm0, %v5266_v1 }
  0x55   :  { %5080 = vmatmul.mubr.msk.bf16.gmra.mxu1 %vm110_vm1, %v430_v45  ;;  %v422_v45 = vld [vmem:[%s7306_s1 + $0xf8] sm:$0xff] }
  0x56   :  { %5083 = vmatprep.mubr.msk.bf16.mxu1 %vm5267_vm0, %v5266_v1  ;;  %5030 = vmatmul.mubr.msk.bf16.gmra.mxu0 %vm110_vm1, %v84_v18  ;;  %v444_v46 = vpack.c.bf16 %v422_v45, %v421_v44 }
  0x57   :  { %5033 = vmatprep.mubr.msk.bf16.mxu0 %vm5267_vm0, %v5266_v1 }
  0x5d   :  { %5084 = vmatmul.mubr.msk.bf16.gmra.mxu1 %vm110_vm1, %v431_v51 }
  0x5e   :  { %5087 = vmatprep.mubr.msk.bf16.mxu1 %vm5267_vm0, %v5266_v1  ;;  %5034 = vmatmul.mubr.msk.bf16.gmra.mxu0 %vm110_vm1, %v85_v24 }
  0x5f   :  { %5155 = vmatprep.mubr.msk.bf16.mxu0 %vm5267_vm0, %v5266_v1 }
  0x65   :  { %5088 = vmatmul.mubr.msk.bf16.gmra.mxu1 %vm110_vm1, %v432_v57 }
  0x66   :  { %5091 = vmatprep.mubr.msk.bf16.mxu1 %vm5267_vm0, %v5266_v1 }
  0x6d   :  { %5092 = vmatmul.mubr.msk.bf16.gmra.mxu1 %vm110_vm1, %v433_v63  ;;  %v428_v63 = vld [vmem:[%s7306_s1 + $0x128] sm:$0xf] }
  0x6e   :  { %5095 = vmatprep.mubr.msk.bf16.mxu1 %vm5267_vm0, %v5266_v1  ;;  %v447_v3 = vpack.c.bf16 %v428_v63, %v427_v62 }
  0x75   :  { %5096 = vmatmul.mubr.msk.bf16.gmra.mxu1 %vm110_vm1, %v434_v6 }
  0x76   :  { %5099 = vmatprep.mubr.msk.bf16.mxu1 %vm5267_vm0, %v5266_v1 }
  0x7d   :  { %5100 = vmatmul.mubr.msk.bf16.gmra.mxu1 %vm110_vm1, %v435_v13 }
  0x7e   :  { %5103 = vmatprep.mubr.msk.bf16.mxu1 %vm5267_vm0, %v5266_v1 }
  0x85   :  { %5104 = vmatmul.mubr.msk.bf16.gmra.mxu1 %vm110_vm1, %v436_v19 }
  0x86   :  { %5107 = vmatprep.mubr.msk.bf16.mxu1 %vm5267_vm0, %v5266_v1 }
  0x8d   :  { %5108 = vmatmul.mubr.msk.bf16.gmra.mxu1 %vm110_vm1, %v437_v25 }
  0x8e   :  { %5111 = vmatprep.mubr.msk.bf16.mxu1 %vm5267_vm0, %v5266_v1 }
  0x95   :  { %5112 = vmatmul.mubr.msk.bf16.gmra.mxu1 %vm110_vm1, %v438_v28 }
  0x96   :  { %5115 = vmatprep.mubr.msk.bf16.mxu1 %vm5267_vm0, %v5266_v1 }
  0x9d   :  { %5116 = vmatmul.mubr.msk.bf16.gmra.mxu1 %vm110_vm1, %v439_v31 }
  0x9e   :  { %5119 = vmatprep.mubr.msk.bf16.mxu1 %vm5267_vm0, %v5266_v1 }
  0xa5   :  { %5120 = vmatmul.mubr.msk.bf16.gmra.mxu1 %vm110_vm1, %v440_v34  ;;  %v5732_v34 = vld [vmem:[%s7310_s5] ss:$0 sm:$0xff] }
  0xa6   :  { %5123 = vmatprep.mubr.msk.bf16.mxu1 %vm5267_vm0, %v5266_v1 }
  0xad   :  { %5124 = vmatmul.mubr.msk.bf16.gmra.mxu1 %vm110_vm1, %v441_v37 }
  0xae   :  { %5127 = vmatprep.mubr.msk.bf16.mxu1 %vm5267_vm0, %v5266_v1 }
  0xb5   :  { %5128 = vmatmul.mubr.msk.bf16.gmra.mxu1 %vm110_vm1, %v442_v40  ;;  %v5740_v40 = vld [vmem:[%s7313_s8] ss:$0 sm:$0xff] }
  0xb6   :  { %5131 = vmatprep.mubr.msk.bf16.mxu1 %vm5267_vm0, %v5266_v1 }
  0xbd   :  { %5132 = vmatmul.mubr.msk.bf16.gmra.mxu1 %vm110_vm1, %v443_v43 }
  0xbe   :  { %5135 = vmatprep.mubr.msk.bf16.mxu1 %vm5267_vm0, %v5266_v1 }
  0xc5   :  { %v5659_v47 = vpop.f32.mrf.mxu1  ;;  %5136 = vmatmul.mubr.msk.bf16.gmra.mxu1 %vm110_vm1, %v444_v46 }
  0xc6   :  { %5139 = vmatprep.mubr.msk.bf16.mxu1 %vm5267_vm0, %v5266_v1 }
  0xc7   :  { %v5039_v50 = vpop.f32.mrf.mxu1 }
  0xc9   :  { %v5670_v51 = vpop.f32.mrf.mxu1 }
  0xcb   :  { %v5040_v53 = vpop.f32.mrf.mxu1 }
  0xcd   :  { %v5672_v54 = vpop.f32.mrf.mxu1  ;;  %5140 = vmatmul.mubr.msk.bf16.gmra.mxu1 %vm110_vm1, %v445_v52 }
  0xce   :  { %5143 = vmatprep.mubr.msk.bf16.mxu1 %vm5267_vm0, %v5266_v1 }
  0xcf   :  { %v5043_v57 = vpop.f32.mrf.mxu1 }
  0xd1   :  { %v5683_v58 = vpop.f32.mrf.mxu1 }
  0xd3   :  { %v5044_v60 = vpop.f32.mrf.mxu1 }
  0xd5   :  { %v5685_v61 = vpop.f32.mrf.mxu1  ;;  %5144 = vmatmul.mubr.msk.bf16.gmra.mxu1 %vm110_vm1, %v446_v59 }
  0xd6   :  { %5147 = vmatprep.mubr.msk.bf16.mxu1 %vm5267_vm0, %v5266_v1  ;;  %v5719_v24 = vpop.f32.mrf.mxu0 }
  0xd7   :  { %v5047_v0 = vpop.f32.mrf.mxu1 }
  0xd8   :  { %v4999_v26 = vpop.f32.mrf.mxu0 }
  0xd9   :  { %v5696_v2 = vpop.f32.mrf.mxu1 }
  0xda   :  { %v5723_v28 = vpop.f32.mrf.mxu0 }
  0xdb   :  { %v5048_v4 = vpop.f32.mrf.mxu1 }
  0xdc   :  { %v5000_v30 = vpop.f32.mrf.mxu0 }
  0xdd   :  { %v5698_v5 = vpop.f32.mrf.mxu1  ;;  %5148 = vmatmul.mubr.msk.bf16.gmra.mxu1 %vm110_vm1, %v447_v3  ;;  %vm4709_vm1 = vcmask 982912  }
  0xde   :  { %v5727_v32 = vpop.f32.mrf.mxu0 }
  0xdf   :  { %v5051_v6 = vpop.f32.mrf.mxu1 }
  0xe0   :  { %v5003_v35 = vpop.f32.mrf.mxu0 }
  0xe1   :  { %v5701_v7 = vpop.f32.mrf.mxu1 }
  0xe2   :  { %v5735_v38 = vpop.f32.mrf.mxu0 }
  0xe3   :  { %v5052_v8 = vpop.f32.mrf.mxu1 }
  0xe4   :  { %v5004_v42 = vpop.f32.mrf.mxu0 }
  0xe5   :  { %v5703_v9 = vpop.f32.mrf.mxu1 }
  0xe6   :  { %v5744_v46 = vpop.f32.mrf.mxu0 }
  0xe7   :  { %v5055_v10 = vpop.f32.mrf.mxu1 }
  0xe8   :  { %v5007_v52 = vpop.f32.mrf.mxu0 }
  0xe9   :  { %v5705_v11 = vpop.f32.mrf.mxu1 }
  0xea   :  { %v5749_v59 = vpop.f32.mrf.mxu0 }
  0xeb   :  { %v5056_v12 = vpop.f32.mrf.mxu1 }
  0xec   :  { %v5008_v0 = vpop.f32.mrf.mxu0 }
  0xed   :  { %v5707_v13 = vpop.f32.mrf.mxu1 }
  0xee   :  { %v5757_v8 = vpop.f32.mrf.mxu0 }
  0xef   :  { %v5059_v14 = vpop.f32.mrf.mxu1 }
  0xf1   :  { %v5709_v15 = vpop.f32.mrf.mxu1 }
  0xf3   :  { %v5060_v16 = vpop.f32.mrf.mxu1 }
  0xf4   :  { %v5011_v16 = vpop.f32.mrf.mxu0 }
  0xf5   :  { %v5711_v17 = vpop.f32.mrf.mxu1 }
  0xf6   :  { %v5762_v26 = vpop.f32.mrf.mxu0 }
  0xf7   :  { %v5063_v18 = vpop.f32.mrf.mxu1 }
  0xf8   :  { %v5012_v35 = vpop.f32.mrf.mxu0 }
  0xf9   :  { %v5713_v19 = vpop.f32.mrf.mxu1 }
  0xfb   :  { %v5064_v20 = vpop.f32.mrf.mxu1 }
  0xfd   :  { %v5715_v21 = vpop.f32.mrf.mxu1 }
  0xff   :  { %v5067_v22 = vpop.f32.mrf.mxu1 }
 0x101   :  { %v5717_v23 = vpop.f32.mrf.mxu1 }
 0x103   :  { %v5068_v25 = vpop.f32.mrf.mxu1 }
 0x105   :  { %v5721_v27 = vpop.f32.mrf.mxu1 }
 0x107   :  { %v5071_v29 = vpop.f32.mrf.mxu1 }
 0x109   :  { %v5725_v31 = vpop.f32.mrf.mxu1 }
 0x10b   :  { %v5072_v33 = vpop.f32.mrf.mxu1 }
 0x10d   :  { %v554_v36 = vpop.f32.mrf.mxu1 }
 0x10e   :  { %v555_v37 = vadd.f32 %v5732_v34, %v554_v36 }
 0x10f   :  { %v5077_v39 = vpop.f32.mrf.mxu1 }
 0x110   :  { %v705_v41 = vmax.f32 %v555_v37, 0.0 }
 0x111   :  { %v557_v43 = vpop.f32.mrf.mxu1 }
 0x112   :  { %v558_v44 = vadd.f32 %v5732_v34, %v557_v43  ;;  %v1188_v45 = vmul.f32 %v5740_v40, %v705_v41 }
 0x113   :  { %v5078_v48 = vpop.f32.mrf.mxu1 }
 0x114   :  { %v706_v49 = vmax.f32 %v558_v44, 0.0  ;;  %v1226_v50 = vsel %vm785_vm2, %v1188_v45, 0.0 }
 0x115   :  { %v562_v53 = vpop.f32.mrf.mxu1  ;;  %1227 = vadd.xlane.f32.xlu0 %v1226_v50 }
 0x116   :  { %v743_v55 = vpack.c.bf16 %v706_v49, %v705_v41  ;;  %v563_v56 = vadd.f32 %v5732_v34, %v562_v53  ;;  %v1189_v57 = vmul.f32 %v5740_v40, %v706_v49  ;;  %v5770_v41 = vpop.f32.mrf.mxu0 }
 0x117   :  { %v5081_v60 = vpop.f32.mrf.mxu1 }
 0x118   :  { %v707_v62 = vmax.f32 %v563_v56, 0.0  ;;  %5156 = vmatmul.mubr.msk.bf16.vlgmr.msra.gmra.mxu0 %vm785_vm2, %v743_v55  ;;  %v1229_v63 = vsel %vm785_vm2, %v1189_v57, 0.0  ;;  %v5015_v45 = vpop.f32.mrf.mxu0 }
 0x119   :  { %1230 = vadd.xlane.f32.xlu1 %v1229_v63  ;;  %v565_v3 = vpop.f32.mrf.mxu1  ;;  %5159 = vmatprep.mubr.msk.bf16.mxu0 %vm5267_vm0, %v5266_v1 }
 0x11a   :  { %v566_v4 = vadd.f32 %v5732_v34, %v565_v3  ;;  %v1190_v6 = vmul.f32 %v5740_v40, %v707_v62  ;;  %v5775_v53 = vpop.f32.mrf.mxu0 }
 0x11b   :  { %v5082_v10 = vpop.f32.mrf.mxu1 }
 0x11c   :  { %v708_v12 = vmax.f32 %v566_v4, 0.0  ;;  %v1232_v14 = vsel %vm785_vm2, %v1190_v6, 0.0  ;;  %v5016_v60 = vpop.f32.mrf.mxu0 }
 0x11d   :  { %v570_v18 = vpop.f32.mrf.mxu1  ;;  %1233 = vadd.xlane.f32.xlu0 %v1232_v14 }
 0x11e   :  { %v744_v20 = vpack.c.bf16 %v708_v12, %v707_v62  ;;  %v571_v22 = vadd.f32 %v5732_v34, %v570_v18  ;;  %v1191_v25 = vmul.f32 %v5740_v40, %v708_v12  ;;  %v5783_v3 = vpop.f32.mrf.mxu0 }
 0x11f   :  { %v5085_v29 = vpop.f32.mrf.mxu1 }
 0x120   :  { %v709_v30 = vmax.f32 %v571_v22, 0.0  ;;  %5160 = vmatmul.mubr.msk.bf16.gmra.mxu0 %vm785_vm2, %v744_v20  ;;  %v1235_v33 = vsel %vm785_vm2, %v1191_v25, 0.0  ;;  %v5019_v12 = vpop.f32.mrf.mxu0 }
 0x121   :  { %1236 = vadd.xlane.f32.xlu1 %v1235_v33  ;;  %v573_v36 = vpop.f32.mrf.mxu1  ;;  %5163 = vmatprep.mubr.msk.bf16.mxu0 %vm5267_vm0, %v5266_v1 }
 0x122   :  { %v574_v37 = vadd.f32 %v5732_v34, %v573_v36  ;;  %v1192_v39 = vmul.f32 %v5740_v40, %v709_v30  ;;  %v5788_v22 = vpop.f32.mrf.mxu0 }
 0x123   :  { %v5086_v42 = vpop.f32.mrf.mxu1 }
 0x124   :  { %v710_v43 = vmax.f32 %v574_v37, 0.0  ;;  %v1238_v44 = vsel %vm785_vm2, %v1192_v39, 0.0  ;;  %v5020_v33 = vpop.f32.mrf.mxu0 }
 0x125   :  { %v578_v48 = vpop.f32.mrf.mxu1  ;;  %1239 = vadd.xlane.f32.xlu0 %v1238_v44 }
 0x126   :  { %v745_v49 = vpack.c.bf16 %v710_v43, %v709_v30  ;;  %v579_v50 = vadd.f32 %v5732_v34, %v578_v48  ;;  %v1193_v52 = vmul.f32 %v5740_v40, %v710_v43  ;;  %v5796_v39 = vpop.f32.mrf.mxu0 }
 0x127   :  { %v5089_v55 = vpop.f32.mrf.mxu1 }
 0x128   :  { %v711_v56 = vmax.f32 %v579_v50, 0.0  ;;  %5164 = vmatmul.mubr.msk.bf16.gmra.mxu0 %vm785_vm2, %v745_v49  ;;  %v1241_v57 = vsel %vm785_vm2, %v1193_v52, 0.0  ;;  %v5023_v45 = vpop.f32.mrf.mxu0 }
 0x129   :  { %1242 = vadd.xlane.f32.xlu1 %v1241_v57  ;;  %v581_v62 = vpop.f32.mrf.mxu1  ;;  %5167 = vmatprep.mubr.msk.bf16.mxu0 %vm5267_vm0, %v5266_v1 }
 0x12a   :  { %v582_v63 = vadd.f32 %v5732_v34, %v581_v62  ;;  %v1194_v0 = vmul.f32 %v5740_v40, %v711_v56  ;;  %v5801_v55 = vpop.f32.mrf.mxu0 }
 0x12b   :  { %v5090_v4 = vpop.f32.mrf.mxu1 }
 0x12c   :  { %v712_v6 = vmax.f32 %v582_v63, 0.0  ;;  %v1244_v10 = vsel %vm785_vm2, %v1194_v0, 0.0  ;;  %v5024_v62 = vpop.f32.mrf.mxu0 }
 0x12d   :  { %v586_v14 = vpop.f32.mrf.mxu1  ;;  %1245 = vadd.xlane.f32.xlu0 %v1244_v10 }
 0x12e   :  { %v746_v16 = vpack.c.bf16 %v712_v6, %v711_v56  ;;  %v587_v18 = vadd.f32 %v5732_v34, %v586_v14  ;;  %v1195_v20 = vmul.f32 %v5740_v40, %v712_v6  ;;  %v5809_v6 = vpop.f32.mrf.mxu0 }
 0x12f   :  { %v5093_v25 = vpop.f32.mrf.mxu1 }
 0x130   :  { %v713_v29 = vmax.f32 %v587_v18, 0.0  ;;  %5168 = vmatmul.mubr.msk.bf16.gmra.mxu0 %vm785_vm2, %v746_v16  ;;  %v1247_v30 = vsel %vm785_vm2, %v1195_v20, 0.0  ;;  %v5027_v16 = vpop.f32.mrf.mxu0 }
 0x131   :  { %1248 = vadd.xlane.f32.xlu1 %v1247_v30  ;;  %v589_v35 = vpop.f32.mrf.mxu1  ;;  %5171 = vmatprep.mubr.msk.bf16.mxu0 %vm5267_vm0, %v5266_v1 }
 0x132   :  { %v590_v36 = vadd.f32 %v5732_v34, %v589_v35  ;;  %v1196_v37 = vmul.f32 %v5740_v40, %v713_v29  ;;  %v5814_v30 = vpop.f32.mrf.mxu0 }
 0x133   :  { %v5094_v42 = vpop.f32.mrf.mxu1 }
 0x134   :  { %v714_v43 = vmax.f32 %v590_v36, 0.0  ;;  %v1250_v44 = vsel %vm785_vm2, %v1196_v37, 0.0  ;;  %v5028_v37 = vpop.f32.mrf.mxu0 }
 0x135   :  { %v594_v48 = vpop.f32.mrf.mxu1  ;;  %1251 = vadd.xlane.f32.xlu0 %v1250_v44 }
 0x136   :  { %v747_v49 = vpack.c.bf16 %v714_v43, %v713_v29  ;;  %v595_v50 = vadd.f32 %v5732_v34, %v594_v48  ;;  %v1197_v52 = vmul.f32 %v5740_v40, %v714_v43  ;;  %v5822_v45 = vpop.f32.mrf.mxu0 }
 0x137   :  { %v5097_v56 = vpop.f32.mrf.mxu1 }
 0x138   :  { %v715_v57 = vmax.f32 %v595_v50, 0.0  ;;  %5172 = vmatmul.mubr.msk.bf16.gmra.mxu0 %vm785_vm2, %v747_v49  ;;  %v1253_v60 = vsel %vm785_vm2, %v1197_v52, 0.0  ;;  %v5031_v52 = vpop.f32.mrf.mxu0 }
 0x139   :  { %1254 = vadd.xlane.f32.xlu1 %v1253_v60  ;;  %v597_v63 = vpop.f32.mrf.mxu1  ;;  %5175 = vmatprep.mubr.msk.bf16.mxu0 %vm5267_vm0, %v5266_v1 }
 0x13a   :  { %v598_v0 = vadd.f32 %v5732_v34, %v597_v63  ;;  %v1198_v4 = vmul.f32 %v5740_v40, %v715_v57  ;;  %v5827_v63 = vpop.f32.mrf.mxu0 }
 0x13b   :  { %v5098_v10 = vpop.f32.mrf.mxu1 }
 0x13c   :  { %v716_v12 = vmax.f32 %v598_v0, 0.0  ;;  %v1256_v14 = vsel %vm785_vm2, %v1198_v4, 0.0 }
 0x13d   :  { %v602_v18 = vpop.f32.mrf.mxu1  ;;  %1257 = vadd.xlane.f32.xlu0 %v1256_v14 }
 0x13e   :  { %v748_v20 = vpack.c.bf16 %v716_v12, %v715_v57  ;;  %v603_v25 = vadd.f32 %v5732_v34, %v602_v18  ;;  %v1199_v29 = vmul.f32 %v5740_v40, %v716_v12  ;;  %v5032_v12 = vpop.f32.mrf.mxu0 }
 0x13f   :  { %v5101_v33 = vpop.f32.mrf.mxu1 }
 0x140   :  { %v717_v35 = vmax.f32 %v603_v25, 0.0  ;;  %5176 = vmatmul.mubr.msk.bf16.gmra.mxu0 %vm785_vm2, %v748_v20  ;;  %v1259_v36 = vsel %vm785_vm2, %v1199_v29, 0.0  ;;  %v5835_v20 = vpop.f32.mrf.mxu0 }
 0x141   :  { %1260 = vadd.xlane.f32.xlu1 %v1259_v36  ;;  %v605_v42 = vpop.f32.mrf.mxu1  ;;  %5179 = vmatprep.mubr.msk.bf16.mxu0 %vm5267_vm0, %v5266_v1 }
 0x142   :  { %v606_v43 = vadd.f32 %v5732_v34, %v605_v42  ;;  %v1200_v44 = vmul.f32 %v5740_v40, %v717_v35 }
 0x143   :  { %v5102_v48 = vpop.f32.mrf.mxu1 }
 0x144   :  { %v718_v49 = vmax.f32 %v606_v43, 0.0  ;;  %v1262_v50 = vsel %vm785_vm2, %v1200_v44, 0.0 }
 0x145   :  { %v610_v56 = vpop.f32.mrf.mxu1  ;;  %1263 = vadd.xlane.f32.xlu0 %v1262_v50 }
 0x146   :  { %v749_v57 = vpack.c.bf16 %v718_v49, %v717_v35  ;;  %v611_v60 = vadd.f32 %v5732_v34, %v610_v56  ;;  %v1201_v62 = vmul.f32 %v5740_v40, %v718_v49  ;;  %v5035_v35 = vpop.f32.mrf.mxu0 }
 0x147   :  { %v5105_v0 = vpop.f32.mrf.mxu1 }
 0x148   :  { %v719_v4 = vmax.f32 %v611_v60, 0.0  ;;  %5180 = vmatmul.mubr.msk.bf16.gmra.mxu0 %vm785_vm2, %v749_v57  ;;  %v1265_v10 = vsel %vm785_vm2, %v1201_v62, 0.0  ;;  %v5840_v44 = vpop.f32.mrf.mxu0 }
 0x149   :  { %1266 = vadd.xlane.f32.xlu1 %v1265_v10  ;;  %v613_v14 = vpop.f32.mrf.mxu1  ;;  %5183 = vmatprep.mubr.msk.bf16.mxu0 %vm5267_vm0, %v5266_v1 }
 0x14a   :  { %v614_v16 = vadd.f32 %v5732_v34, %v613_v14  ;;  %v1202_v18 = vmul.f32 %v5740_v40, %v719_v4  ;;  %v5036_v52 = vpop.f32.mrf.mxu0 }
 0x14b   :  { %v5106_v25 = vpop.f32.mrf.mxu1 }
 0x14c   :  { %v720_v29 = vmax.f32 %v614_v16, 0.0  ;;  %v1268_v33 = vsel %vm785_vm2, %v1202_v18, 0.0 }
 0x14d   :  { %v618_v36 = vpop.f32.mrf.mxu1  ;;  %1269 = vadd.xlane.f32.xlu0 %v1268_v33 }
 0x14e   :  { %v750_v37 = vpack.c.bf16 %v720_v29, %v719_v4  ;;  %v619_v42 = vadd.f32 %v5732_v34, %v618_v36  ;;  %v1203_v43 = vmul.f32 %v5740_v40, %v720_v29 }
 0x14f   :  { %v5109_v48 = vpop.f32.mrf.mxu1 }
 0x150   :  { %v721_v49 = vmax.f32 %v619_v42, 0.0  ;;  %5184 = vmatmul.mubr.msk.bf16.gmra.mxu0 %vm785_vm2, %v750_v37  ;;  %v1271_v50 = vsel %vm785_vm2, %v1203_v43, 0.0 }
 0x151   :  { %1272 = vadd.xlane.f32.xlu1 %v1271_v50  ;;  %v621_v56 = vpop.f32.mrf.mxu1  ;;  %5187 = vmatprep.mubr.msk.bf16.mxu0 %vm5267_vm0, %v5266_v1 }
 0x152   :  { %v622_v57 = vadd.f32 %v5732_v34, %v621_v56  ;;  %v1204_v60 = vmul.f32 %v5740_v40, %v721_v49 }
 0x153   :  { %v5110_v62 = vpop.f32.mrf.mxu1 }
 0x154   :  { %v722_v0 = vmax.f32 %v622_v57, 0.0  ;;  %v1274_v4 = vsel %vm785_vm2, %v1204_v60, 0.0 }
 0x155   :  { %v626_v10 = vpop.f32.mrf.mxu1  ;;  %1275 = vadd.xlane.f32.xlu0 %v1274_v4 }
 0x156   :  { %v751_v12 = vpack.c.bf16 %v722_v0, %v721_v49  ;;  %v627_v14 = vadd.f32 %v5732_v34, %v626_v10  ;;  %v1205_v16 = vmul.f32 %v5740_v40, %v722_v0 }
 0x157   :  { %v5113_v18 = vpop.f32.mrf.mxu1 }
 0x158   :  { %v723_v25 = vmax.f32 %v627_v14, 0.0  ;;  %5188 = vmatmul.mubr.msk.bf16.gmra.mxu0 %vm785_vm2, %v751_v12  ;;  %v1277_v29 = vsel %vm785_vm2, %v1205_v16, 0.0 }
 0x159   :  { %1278 = vadd.xlane.f32.xlu1 %v1277_v29  ;;  %v629_v33 = vpop.f32.mrf.mxu1  ;;  %5191 = vmatprep.mubr.msk.bf16.mxu0 %vm5267_vm0, %v5266_v1 }
 0x15a   :  { %v630_v35 = vadd.f32 %v5732_v34, %v629_v33  ;;  %v1206_v36 = vmul.f32 %v5740_v40, %v723_v25 }
 0x15b   :  { %v5114_v37 = vpop.f32.mrf.mxu1 }
 0x15c   :  { %v724_v42 = vmax.f32 %v630_v35, 0.0  ;;  %v1280_v43 = vsel %vm785_vm2, %v1206_v36, 0.0 }
 0x15d   :  { %v634_v48 = vpop.f32.mrf.mxu1  ;;  %1281 = vadd.xlane.f32.xlu0 %v1280_v43 }
 0x15e   :  { %v752_v49 = vpack.c.bf16 %v724_v42, %v723_v25  ;;  %v635_v50 = vadd.f32 %v5732_v34, %v634_v48  ;;  %v1207_v52 = vmul.f32 %v5740_v40, %v724_v42 }
 0x15f   :  { %v5117_v56 = vpop.f32.mrf.mxu1 }
 0x160   :  { %v725_v57 = vmax.f32 %v635_v50, 0.0  ;;  %5192 = vmatmul.mubr.msk.bf16.gmra.mxu0 %vm785_vm2, %v752_v49  ;;  %v1283_v60 = vsel %vm785_vm2, %v1207_v52, 0.0 }
 0x161   :  { %1284 = vadd.xlane.f32.xlu1 %v1283_v60  ;;  %v637_v62 = vpop.f32.mrf.mxu1  ;;  %5195 = vmatprep.mubr.msk.bf16.mxu0 %vm5267_vm0, %v5266_v1 }
 0x162   :  { %v638_v0 = vadd.f32 %v5732_v34, %v637_v62  ;;  %v1208_v4 = vmul.f32 %v5740_v40, %v725_v57 }
 0x163   :  { %v5118_v10 = vpop.f32.mrf.mxu1 }
 0x164   :  { %v726_v12 = vmax.f32 %v638_v0, 0.0  ;;  %v1286_v14 = vsel %vm785_vm2, %v1208_v4, 0.0 }
 0x165   :  { %v642_v16 = vpop.f32.mrf.mxu1  ;;  %1287 = vadd.xlane.f32.xlu0 %v1286_v14 }
 0x166   :  { %v753_v18 = vpack.c.bf16 %v726_v12, %v725_v57  ;;  %v643_v25 = vadd.f32 %v5732_v34, %v642_v16  ;;  %v1209_v29 = vmul.f32 %v5740_v40, %v726_v12 }
 0x167   :  { %v5121_v33 = vpop.f32.mrf.mxu1 }
 0x168   :  { %v727_v35 = vmax.f32 %v643_v25, 0.0  ;;  %5196 = vmatmul.mubr.msk.bf16.gmra.mxu0 %vm785_vm2, %v753_v18  ;;  %v1289_v36 = vsel %vm785_vm2, %v1209_v29, 0.0 }
 0x169   :  { %1290 = vadd.xlane.f32.xlu1 %v1289_v36  ;;  %v645_v37 = vpop.f32.mrf.mxu1  ;;  %5199 = vmatprep.mubr.msk.bf16.mxu0 %vm5267_vm0, %v5266_v1 }
 0x16a   :  { %v646_v42 = vadd.f32 %v5732_v34, %v645_v37  ;;  %v1210_v43 = vmul.f32 %v5740_v40, %v727_v35 }
 0x16b   :  { %v5122_v48 = vpop.f32.mrf.mxu1 }
 0x16c   :  { %v728_v49 = vmax.f32 %v646_v42, 0.0  ;;  %v1292_v50 = vsel %vm785_vm2, %v1210_v43, 0.0 }
 0x16d   :  { %v650_v52 = vpop.f32.mrf.mxu1  ;;  %1293 = vadd.xlane.f32.xlu0 %v1292_v50 }
 0x16e   :  { %v754_v56 = vpack.c.bf16 %v728_v49, %v727_v35  ;;  %v651_v57 = vadd.f32 %v5732_v34, %v650_v52  ;;  %v1211_v60 = vmul.f32 %v5740_v40, %v728_v49 }
 0x16f   :  { %v5125_v62 = vpop.f32.mrf.mxu1 }
 0x170   :  { %v729_v0 = vmax.f32 %v651_v57, 0.0  ;;  %5200 = vmatmul.mubr.msk.bf16.gmra.mxu0 %vm785_vm2, %v754_v56  ;;  %v1295_v4 = vsel %vm785_vm2, %v1211_v60, 0.0 }
 0x171   :  { %1296 = vadd.xlane.f32.xlu1 %v1295_v4  ;;  %v653_v10 = vpop.f32.mrf.mxu1  ;;  %5203 = vmatprep.mubr.msk.bf16.mxu0 %vm5267_vm0, %v5266_v1 }
 0x172   :  { %v654_v12 = vadd.f32 %v5732_v34, %v653_v10  ;;  %v1212_v14 = vmul.f32 %v5740_v40, %v729_v0 }
 0x173   :  { %v5126_v16 = vpop.f32.mrf.mxu1 }
 0x174   :  { %v730_v18 = vmax.f32 %v654_v12, 0.0  ;;  %v1298_v25 = vsel %vm785_vm2, %v1212_v14, 0.0 }
 0x175   :  { %v658_v29 = vpop.f32.mrf.mxu1  ;;  %1299 = vadd.xlane.f32.xlu0 %v1298_v25 }
 0x176   :  { %v755_v33 = vpack.c.bf16 %v730_v18, %v729_v0  ;;  %v659_v35 = vadd.f32 %v5732_v34, %v658_v29  ;;  %v1213_v36 = vmul.f32 %v5740_v40, %v730_v18 }
 0x177   :  { %v5129_v37 = vpop.f32.mrf.mxu1 }
 0x178   :  { %v731_v42 = vmax.f32 %v659_v35, 0.0  ;;  %5204 = vmatmul.mubr.msk.bf16.gmra.mxu0 %vm785_vm2, %v755_v33  ;;  %v1301_v43 = vsel %vm785_vm2, %v1213_v36, 0.0 }
 0x179   :  { %1302 = vadd.xlane.f32.xlu1 %v1301_v43  ;;  %v661_v48 = vpop.f32.mrf.mxu1  ;;  %5207 = vmatprep.mubr.msk.bf16.mxu0 %vm5267_vm0, %v5266_v1 }
 0x17a   :  { %v662_v49 = vadd.f32 %v5732_v34, %v661_v48  ;;  %v1214_v50 = vmul.f32 %v5740_v40, %v731_v42 }
 0x17b   :  { %v5130_v52 = vpop.f32.mrf.mxu1 }
 0x17c   :  { %v732_v56 = vmax.f32 %v662_v49, 0.0  ;;  %v1304_v57 = vsel %vm785_vm2, %v1214_v50, 0.0 }
 0x17d   :  { %v666_v60 = vpop.f32.mrf.mxu1  ;;  %1305 = vadd.xlane.f32.xlu0 %v1304_v57 }
 0x17e   :  { %v756_v62 = vpack.c.bf16 %v732_v56, %v731_v42  ;;  %v667_v0 = vadd.f32 %v5732_v34, %v666_v60  ;;  %v1215_v4 = vmul.f32 %v5740_v40, %v732_v56 }
 0x17f   :  { %v5133_v10 = vpop.f32.mrf.mxu1 }
 0x180   :  { %v733_v12 = vmax.f32 %v667_v0, 0.0  ;;  %5208 = vmatmul.mubr.msk.bf16.gmra.mxu0 %vm785_vm2, %v756_v62  ;;  %v1307_v14 = vsel %vm785_vm2, %v1215_v4, 0.0 }
 0x181   :  { %1308 = vadd.xlane.f32.xlu1 %v1307_v14  ;;  %v669_v16 = vpop.f32.mrf.mxu1  ;;  %5211 = vmatprep.mubr.msk.bf16.mxu0 %vm5267_vm0, %v5266_v1 }
 0x182   :  { %v670_v18 = vadd.f32 %v5732_v34, %v669_v16  ;;  %v1216_v25 = vmul.f32 %v5740_v40, %v733_v12 }
 0x183   :  { %v5134_v29 = vpop.f32.mrf.mxu1 }
 0x184   :  { %v734_v33 = vmax.f32 %v670_v18, 0.0  ;;  %v1310_v35 = vsel %vm785_vm2, %v1216_v25, 0.0 }
 0x185   :  { %v674_v36 = vpop.f32.mrf.mxu1  ;;  %1311 = vadd.xlane.f32.xlu0 %v1310_v35 }
 0x186   :  { %v757_v37 = vpack.c.bf16 %v734_v33, %v733_v12  ;;  %v675_v42 = vadd.f32 %v5732_v34, %v674_v36  ;;  %v1217_v43 = vmul.f32 %v5740_v40, %v734_v33 }
 0x187   :  { %v5137_v48 = vpop.f32.mrf.mxu1 }
 0x188   :  { %v735_v49 = vmax.f32 %v675_v42, 0.0  ;;  %5212 = vmatmul.mubr.msk.bf16.gmra.mxu0 %vm785_vm2, %v757_v37  ;;  %v1313_v50 = vsel %vm785_vm2, %v1217_v43, 0.0 }
 0x189   :  { %1314 = vadd.xlane.f32.xlu1 %v1313_v50  ;;  %v677_v52 = vpop.f32.mrf.mxu1  ;;  %5215 = vmatprep.mubr.msk.bf16.mxu0 %vm5267_vm0, %v5266_v1 }
 0x18a   :  { %v678_v56 = vadd.f32 %v5732_v34, %v677_v52  ;;  %v1218_v57 = vmul.f32 %v5740_v40, %v735_v49 }
 0x18b   :  { %v5138_v60 = vpop.f32.mrf.mxu1 }
 0x18c   :  { %v736_v62 = vmax.f32 %v678_v56, 0.0  ;;  %v1316_v0 = vsel %vm785_vm2, %v1218_v57, 0.0 }
 0x18d   :  { %v682_v4 = vpop.f32.mrf.mxu1  ;;  %1317 = vadd.xlane.f32.xlu0 %v1316_v0 }
 0x18e   :  { %v758_v10 = vpack.c.bf16 %v736_v62, %v735_v49  ;;  %v683_v12 = vadd.f32 %v5732_v34, %v682_v4  ;;  %v1219_v14 = vmul.f32 %v5740_v40, %v736_v62 }
 0x18f   :  { %v5141_v16 = vpop.f32.mrf.mxu1 }
 0x190   :  { %v737_v18 = vmax.f32 %v683_v12, 0.0  ;;  %5216 = vmatmul.mubr.msk.bf16.gmra.mxu0 %vm785_vm2, %v758_v10  ;;  %v1319_v25 = vsel %vm785_vm2, %v1219_v14, 0.0 }
 0x191   :  { %1320 = vadd.xlane.f32.xlu1 %v1319_v25  ;;  %v685_v29 = vpop.f32.mrf.mxu1  ;;  %5219 = vmatprep.mubr.msk.bf16.mxu0 %vm5267_vm0, %v5266_v1 }
 0x192   :  { %v686_v33 = vadd.f32 %v5732_v34, %v685_v29  ;;  %v1220_v35 = vmul.f32 %v5740_v40, %v737_v18 }
 0x193   :  { %v5142_v36 = vpop.f32.mrf.mxu1 }
 0x194   :  { %v738_v37 = vmax.f32 %v686_v33, 0.0  ;;  %v1322_v42 = vsel %vm785_vm2, %v1220_v35, 0.0 }
 0x195   :  { %v690_v43 = vpop.f32.mrf.mxu1  ;;  %1323 = vadd.xlane.f32.xlu0 %v1322_v42 }
 0x196   :  { %v759_v48 = vpack.c.bf16 %v738_v37, %v737_v18  ;;  %v691_v49 = vadd.f32 %v5732_v34, %v690_v43  ;;  %v1221_v50 = vmul.f32 %v5740_v40, %v738_v37 }
 0x197   :  { %v5145_v52 = vpop.f32.mrf.mxu1 }
 0x198   :  { %v739_v56 = vmax.f32 %v691_v49, 0.0  ;;  %5220 = vmatmul.mubr.msk.bf16.gmra.mxu0 %vm785_vm2, %v759_v48  ;;  %v1325_v57 = vsel %vm785_vm2, %v1221_v50, 0.0 }
 0x199   :  { %1326 = vadd.xlane.f32.xlu1 %v1325_v57  ;;  %v693_v60 = vpop.f32.mrf.mxu1  ;;  %5223 = vmatprep.mubr.msk.bf16.mxu0 %vm5267_vm0, %v5266_v1  ;;  %v5952_v57 = vld [vmem:[%s7312_s7] ss:$0 sm:$0xff] }
 0x19a   :  { %v694_v62 = vadd.f32 %v5732_v34, %v693_v60  ;;  %v1222_v0 = vmul.f32 %v5740_v40, %v739_v56 }
 0x19b   :  { %v5146_v4 = vpop.f32.mrf.mxu1 }
 0x19c   :  { %v740_v10 = vmax.f32 %v694_v62, 0.0  ;;  %v1328_v12 = vsel %vm785_vm2, %v1222_v0, 0.0 }
 0x19d   :  { %v698_v14 = vpop.f32.mrf.mxu1  ;;  %1329 = vadd.xlane.f32.xlu0 %v1328_v12 }
 0x19e   :  { %v760_v16 = vpack.c.bf16 %v740_v10, %v739_v56  ;;  %v699_v18 = vadd.f32 %v5732_v34, %v698_v14  ;;  %v1223_v25 = vmul.f32 %v5740_v40, %v740_v10 }
 0x19f   :  { %v5149_v29 = vpop.f32.mrf.mxu1 }
 0x1a0   :  { %v741_v33 = vmax.f32 %v699_v18, 0.0  ;;  %5224 = vmatmul.mubr.msk.bf16.gmra.mxu0 %vm785_vm2, %v760_v16  ;;  %v1331_v35 = vsel %vm785_vm2, %v1223_v25, 0.0 }
 0x1a1   :  { %1332 = vadd.xlane.f32.xlu1 %v1331_v35  ;;  %v701_v36 = vpop.f32.mrf.mxu1  ;;  %5227 = vmatprep.mubr.msk.bf16.mxu0 %vm5267_vm0, %v5266_v1  ;;  %v5945_v1 = vld [vmem:[%s7308_s3] ss:$0 sm:$0xff]  ;;  %vm4702_vm0 = vcmask 917312  }
 0x1a2   :  { %v702_v37 = vadd.f32 %v5732_v34, %v701_v36  ;;  %v1224_v42 = vmul.f32 %v5740_v40, %v741_v33  ;;  %v203_v34 = vadd.f32 %v5945_v1, %v5719_v24  ;;  %v206_v62 = vadd.f32 %v5945_v1, %v5723_v28 }
 0x1a3   :  { %v5150_v43 = vpop.f32.mrf.mxu1  ;;  %v211_v16 = vadd.f32 %v5945_v1, %v5727_v32  ;;  %v214_v28 = vadd.f32 %v5945_v1, %v5735_v38 }
 0x1a4   :  { %v742_v48 = vmax.f32 %v702_v37, 0.0  ;;  %v1334_v49 = vsel %vm785_vm2, %v1224_v42, 0.0  ;;  %v354_v14 = vmax.f32 %v206_v62, 0.0 }
 0x1a5   :  { %1335 = vadd.xlane.f32.xlu0 %v1334_v49  ;;  %v355_v35 = vmax.f32 %v211_v16, 0.0  ;;  %v219_v49 = vadd.f32 %v5945_v1, %v5744_v46 }
 0x1a6   :  { %v761_v50 = vpack.c.bf16 %v742_v48, %v741_v33  ;;  %v1225_v52 = vmul.f32 %v5740_v40, %v742_v48  ;;  %v353_v40 = vmax.f32 %v203_v34, 0.0  ;;  %v356_v48 = vmax.f32 %v214_v28, 0.0 }
 0x1a8   :  { %5228 = vmatmul.mubr.msk.bf16.gmra.mxu0 %vm785_vm2, %v761_v50  ;;  %v1337_v56 = vsel %vm1177_vm3, %v1225_v52, 0.0 }
 0x1a9   :  { %1338 = vadd.xlane.f32.xlu1 %v1337_v56 }
 0x1d8   :  { %v877_v60 = vpop.f32.mrf.mxu0 }
 0x1d9   :  { %v878_v0 = vadd.f32 %v5952_v57, %v877_v60  ;;  %v357_v60 = vmax.f32 %v219_v49, 0.0 }
 0x1da   :  { %v5157_v4 = vpop.f32.mrf.mxu0 }
 0x1db   :  { %v1028_v10 = vmul.f32 %v878_v0, %v353_v40  ;;  %v222_v40 = vadd.f32 %v5945_v1, %v5749_v59 }
 0x1dc   :  { %v880_v12 = vpop.f32.mrf.mxu0 }
 0x1dd   :  { %v881_v24 = vadd.f32 %v5952_v57, %v880_v12  ;;  %v1066_v18 = vsel %vm785_vm2, %v1028_v10, 0.0  ;;  %v358_v12 = vmax.f32 %v222_v40, 0.0 }
 0x1de   :  { %1067 = vadd.xlane.f32.xlu0 %v1066_v18  ;;  %v5158_v25 = vpop.f32.mrf.mxu0 }
 0x1df   :  { %v1029_v29 = vmul.f32 %v881_v24, %v354_v14  ;;  %v227_v14 = vadd.f32 %v5945_v1, %v5757_v8 }
 0x1e0   :  { %v885_v33 = vpop.f32.mrf.mxu0 }
 0x1e1   :  { %v886_v36 = vadd.f32 %v5952_v57, %v885_v33  ;;  %v1069_v37 = vsel %vm785_vm2, %v1029_v29, 0.0  ;;  %v359_v29 = vmax.f32 %v227_v14, 0.0  ;;  %v230_v33 = vadd.f32 %v5945_v1, %v5762_v26 }
 0x1e2   :  { %1070 = vadd.xlane.f32.xlu0 %v1069_v37  ;;  %v5161_v42 = vpop.f32.mrf.mxu0 }
 0x1e3   :  { %v1030_v43 = vmul.f32 %v886_v36, %v355_v35  ;;  %v360_v42 = vmax.f32 %v230_v33, 0.0 }
 0x1e4   :  { %v888_v32 = vpop.f32.mrf.mxu0 }
 0x1e5   :  { %v889_v50 = vadd.f32 %v5952_v57, %v888_v32  ;;  %v1072_v52 = vsel %vm785_vm2, %v1030_v43, 0.0  ;;  %v235_v43 = vadd.f32 %v5945_v1, %v5770_v41  ;;  %v243_v41 = vadd.f32 %v5945_v1, %v5783_v3 }
 0x1e6   :  { %1073 = vadd.xlane.f32.xlu1 %v1072_v52  ;;  %v5162_v56 = vpop.f32.mrf.mxu0 }
 0x1e7   :  { %v1031_v34 = vmul.f32 %v889_v50, %v356_v48  ;;  %v361_v52 = vmax.f32 %v235_v43, 0.0  ;;  %v238_v56 = vadd.f32 %v5945_v1, %v5775_v53  ;;  %v363_v53 = vmax.f32 %v243_v41, 0.0 }
 0x1e8   :  { %v893_v38 = vpop.f32.mrf.mxu0  ;;  %v254_v43 = vadd.f32 %v5945_v1, %v5801_v55  ;;  %v262_v41 = vadd.f32 %v5945_v1, %v5814_v30 }
 0x1e9   :  { %v894_v62 = vadd.f32 %v5952_v57, %v893_v38  ;;  %v1075_v0 = vsel %vm785_vm2, %v1031_v34, 0.0 }
 0x1ea   :  { %1076 = vadd.xlane.f32.xlu1 %v1075_v0  ;;  %v5165_v4 = vpop.f32.mrf.mxu0  ;;  %v362_v0 = vmax.f32 %v238_v56, 0.0 }
 0x1eb   :  { %v1032_v10 = vmul.f32 %v894_v62, %v357_v60 }
 0x1ec   :  { %v896_v46 = vpop.f32.mrf.mxu0 }
 0x1ed   :  { %v897_v16 = vadd.f32 %v5952_v57, %v896_v46  ;;  %v1078_v24 = vsel %vm785_vm2, %v1032_v10, 0.0 }
 0x1ee   :  { %1079 = vadd.xlane.f32.xlu0 %v1078_v24  ;;  %v5166_v18 = vpop.f32.mrf.mxu0 }
 0x1ef   :  { %v1033_v25 = vmul.f32 %v897_v16, %v358_v12  ;;  %v246_v16 = vadd.f32 %v5945_v1, %v5788_v22 }
 0x1f0   :  { %v901_v59 = vpop.f32.mrf.mxu0 }
 0x1f1   :  { %v902_v35 = vadd.f32 %v5952_v57, %v901_v59  ;;  %v1081_v28 = vsel %vm785_vm2, %v1033_v25, 0.0  ;;  %v5268_v25 = vmov 0   ;;  %v364_v33 = vmax.f32 %v246_v16, 0.0 }
 0x1f2   :  { %1082 = vadd.xlane.f32.xlu1 %v1081_v28  ;;  %v5169_v36 = vpop.f32.mrf.mxu0  ;;  %5238 = vset.pattern.permute.xlu0 %v5268_v25 }
 0x1f3   :  { %v1034_v37 = vmul.f32 %v902_v35, %v359_v29  ;;  %5239 = vset.pattern.permute.xlu1 %v5268_v25  ;;  %v251_v35 = vadd.f32 %v5945_v1, %v5796_v39 }
 0x1f4   :  { %v904_v8 = vpop.f32.mrf.mxu0 }
 0x1f5   :  { %v905_v32 = vadd.f32 %v5952_v57, %v904_v8  ;;  %v1084_v48 = vsel %vm785_vm2, %v1034_v37, 0.0 }
 0x1f6   :  { %1085 = vadd.xlane.f32.xlu0 %v1084_v48  ;;  %v5170_v49 = vpop.f32.mrf.mxu0 }
 0x1f7   :  { %v1035_v50 = vmul.f32 %v905_v32, %v360_v42  ;;  %v365_v42 = vmax.f32 %v251_v35, 0.0 }
 0x1f8   :  { %v909_v26 = vpop.f32.mrf.mxu0 }
 0x1f9   :  { %v910_v34 = vadd.f32 %v5952_v57, %v909_v26  ;;  %v1087_v38 = vsel %vm785_vm2, %v1035_v50, 0.0  ;;  %v366_v26 = vmax.f32 %v254_v43, 0.0 }
 0x1fa   :  { %1088 = vadd.xlane.f32.xlu1 %v1087_v38  ;;  %v5173_v60 = vpop.f32.mrf.mxu0 }
 0x1fb   :  { %v1036_v40 = vmul.f32 %v910_v34, %v361_v52  ;;  %v259_v52 = vadd.f32 %v5945_v1, %v5809_v6 }
 0x1fc   :  { %v912_v62 = vpop.f32.mrf.mxu0 }
 0x1fd   :  { %v913_v4 = vadd.f32 %v5952_v57, %v912_v62  ;;  %v1090_v10 = vsel %vm785_vm2, %v1036_v40, 0.0  ;;  %v367_v40 = vmax.f32 %v259_v52, 0.0 }
 0x1fe   :  { %1091 = vadd.xlane.f32.xlu0 %v1090_v10  ;;  %v5174_v46 = vpop.f32.mrf.mxu0 }
 0x1ff   :  { %v1037_v12 = vmul.f32 %v913_v4, %v362_v0  ;;  %v368_v46 = vmax.f32 %v262_v41, 0.0 }
 0x200   :  { %v917_v14 = vpop.f32.mrf.mxu0 }
 0x201   :  { %v918_v24 = vadd.f32 %v5952_v57, %v917_v14  ;;  %v1093_v18 = vsel %vm785_vm2, %v1037_v12, 0.0  ;;  %v267_v12 = vadd.f32 %v5945_v1, %v5822_v45 }
 0x202   :  { %1094 = vadd.xlane.f32.xlu1 %v1093_v18  ;;  %v5177_v3 = vpop.f32.mrf.mxu0 }
 0x203   :  { %v1038_v59 = vmul.f32 %v918_v24, %v363_v53  ;;  %v369_v18 = vmax.f32 %v267_v12, 0.0  ;;  %v270_v3 = vadd.f32 %v5945_v1, %v5827_v63 }
 0x204   :  { %v920_v29 = vpop.f32.mrf.mxu0 }
 0x205   :  { %v921_v28 = vadd.f32 %v5952_v57, %v920_v29  ;;  %v1096_v36 = vsel %vm785_vm2, %v1038_v59, 0.0 }
 0x206   :  { %1097 = vadd.xlane.f32.xlu0 %v1096_v36  ;;  %v5178_v22 = vpop.f32.mrf.mxu0  ;;  %v275_v36 = vadd.f32 %v5945_v1, %v5835_v20 }
 0x207   :  { %v1039_v37 = vmul.f32 %v921_v28, %v364_v33  ;;  %v6021_v33 = vpop.xlane.xlu0 %1227  ;;  %v370_v28 = vmax.f32 %v270_v3, 0.0 }
 0x208   :  { %v925_v8 = vpop.f32.mrf.mxu0 }
 0x209   :  { %v926_v32 = vadd.f32 %v5952_v57, %v925_v8  ;;  %v1099_v48 = vsel %vm785_vm2, %v1039_v37, 0.0 }
 0x20a   :  { %1100 = vadd.xlane.f32.xlu1 %v1099_v48  ;;  %v5181_v49 = vpop.f32.mrf.mxu0  ;;  %v278_v48 = vadd.f32 %v5945_v1, %v5840_v44 }
 0x20b   :  { %v1040_v50 = vmul.f32 %v926_v32, %v365_v42  ;;  %v6027_v8 = vpop.xlane.xlu0 %1233  ;;  %v371_v32 = vmax.f32 %v275_v36, 0.0 }
 0x20c   :  { %v928_v39 = vpop.f32.mrf.mxu0 }
 0x20d   :  { %v929_v56 = vadd.f32 %v5952_v57, %v928_v39  ;;  %v1102_v34 = vsel %vm785_vm2, %v1040_v50, 0.0  ;;  %v6033_v39 = vpop.xlane.xlu1 %1230 }
 0x20e   :  { %1103 = vadd.xlane.f32.xlu0 %v1102_v34  ;;  %v5182_v38 = vpop.f32.mrf.mxu0  ;;  %v283_v34 = vadd.f32 %v5945_v1, %v5659_v47 }
 0x20f   :  { %v1041_v60 = vmul.f32 %v929_v56, %v366_v26  ;;  %v6035_v26 = vpop.xlane.xlu0 %1239  ;;  %v372_v38 = vmax.f32 %v278_v48, 0.0  ;;  %v299_v48 = vadd.f32 %v5945_v1, %v5685_v61 }
 0x210   :  { %v933_v55 = vpop.f32.mrf.mxu0 }
 0x211   :  { %v934_v62 = vadd.f32 %v5952_v57, %v933_v55  ;;  %v1105_v0 = vsel %vm785_vm2, %v1041_v60, 0.0 }
 0x212   :  { %1106 = vadd.xlane.f32.xlu1 %v1105_v0  ;;  %v5185_v4 = vpop.f32.mrf.mxu0 }
 0x213   :  { %v1042_v10 = vmul.f32 %v934_v62, %v367_v40  ;;  %v6041_v40 = vpop.xlane.xlu1 %1236  ;;  %v6043_v41 = vpop.xlane.xlu0 %1245  ;;  %v373_v4 = vmax.f32 %v283_v34, 0.0 }
 0x214   :  { %v936_v6 = vpop.f32.mrf.mxu0 }
 0x215   :  { %v937_v53 = vadd.f32 %v5952_v57, %v936_v6  ;;  %v1108_v14 = vsel %vm785_vm2, %v1042_v10, 0.0  ;;  %v286_v10 = vadd.f32 %v5945_v1, %v5670_v51 }
 0x216   :  { %1109 = vadd.xlane.f32.xlu0 %v1108_v14  ;;  %v5186_v16 = vpop.f32.mrf.mxu0 }
 0x217   :  { %v1043_v24 = vmul.f32 %v937_v53, %v368_v46  ;;  %v6049_v12 = vpop.xlane.xlu1 %1242  ;;  %v6051_v53 = vpop.xlane.xlu0 %1251 }
 0x218   :  { %v941_v30 = vpop.f32.mrf.mxu0 }
 0x219   :  { %v942_v25 = vadd.f32 %v5952_v57, %v941_v30  ;;  %v1111_v59 = vsel %vm785_vm2, %v1043_v24, 0.0  ;;  %v374_v24 = vmax.f32 %v286_v10, 0.0  ;;  %v291_v30 = vadd.f32 %v5945_v1, %v5672_v54 }
 0x21a   :  { %1112 = vadd.xlane.f32.xlu1 %v1111_v59  ;;  %v5189_v29 = vpop.f32.mrf.mxu0 }
 0x21b   :  { %v1044_v45 = vmul.f32 %v942_v25, %v369_v18  ;;  %v6057_v25 = vpop.xlane.xlu1 %1248  ;;  %v6059_v59 = vpop.xlane.xlu0 %1257 }
 0x21c   :  { %v944_v35 = vpop.f32.mrf.mxu0 }
 0x21d   :  { %v945_v22 = vadd.f32 %v5952_v57, %v944_v35  ;;  %v1114_v37 = vsel %vm785_vm2, %v1044_v45, 0.0  ;;  %v375_v35 = vmax.f32 %v291_v30, 0.0 }
 0x21e   :  { %1115 = vadd.xlane.f32.xlu0 %v1114_v37  ;;  %v5190_v63 = vpop.f32.mrf.mxu0 }
 0x21f   :  { %v1045_v42 = vmul.f32 %v945_v22, %v370_v28  ;;  %v294_v28 = vadd.f32 %v5945_v1, %v5683_v58  ;;  %v6065_v37 = vpop.xlane.xlu1 %1254  ;;  %v6067_v63 = vpop.xlane.xlu0 %1263 }
 0x220   :  { %v949_v43 = vpop.f32.mrf.mxu0 }
 0x221   :  { %v950_v49 = vadd.f32 %v5952_v57, %v949_v43  ;;  %v1117_v50 = vsel %vm785_vm2, %v1045_v42, 0.0 }
 0x222   :  { %1118 = vadd.xlane.f32.xlu1 %v1117_v50  ;;  %v5193_v20 = vpop.f32.mrf.mxu0 }
 0x223   :  { %v1046_v52 = vmul.f32 %v950_v49, %v371_v32  ;;  %v376_v32 = vmax.f32 %v294_v28, 0.0  ;;  %v6073_v20 = vpop.xlane.xlu1 %1260 }
 0x224   :  { %v952_v56 = vpop.f32.mrf.mxu0 }
 0x225   :  { %v953_v60 = vadd.f32 %v5952_v57, %v952_v56  ;;  %v1120_v44 = vsel %vm785_vm2, %v1046_v52, 0.0  ;;  %v6075_v52 = vpop.xlane.xlu0 %1269 }
 0x226   :  { %1121 = vadd.xlane.f32.xlu0 %v1120_v44  ;;  %v5194_v55 = vpop.f32.mrf.mxu0 }
 0x227   :  { %v1047_v62 = vmul.f32 %v953_v60, %v372_v38  ;;  %v377_v38 = vmax.f32 %v299_v48, 0.0  ;;  %v302_v60 = vadd.f32 %v5945_v1, %v5696_v2 }
 0x228   :  { %v957_v0 = vpop.f32.mrf.mxu0 }
 0x229   :  { %v958_v6 = vadd.f32 %v5952_v57, %v957_v0  ;;  %v1123_v47 = vsel %vm785_vm2, %v1047_v62, 0.0  ;;  %v6081_v62 = vpop.xlane.xlu1 %1266  ;;  %v6083_v0 = vpop.xlane.xlu0 %1275 }
 0x22a   :  { %1124 = vadd.xlane.f32.xlu1 %v1123_v47  ;;  %v5197_v46 = vpop.f32.mrf.mxu0  ;;  %v307_v47 = vadd.f32 %v5945_v1, %v5698_v5 }
 0x22b   :  { %v1048_v14 = vmul.f32 %v958_v6, %v373_v4  ;;  %v378_v6 = vmax.f32 %v302_v60, 0.0 }
 0x22c   :  { %v960_v16 = vpop.f32.mrf.mxu0 }
 0x22d   :  { %v961_v18 = vadd.f32 %v5952_v57, %v960_v16  ;;  %v1126_v51 = vsel %vm785_vm2, %v1048_v14, 0.0  ;;  %v6089_v16 = vpop.xlane.xlu1 %1272 }
 0x22e   :  { %1127 = vadd.xlane.f32.xlu0 %v1126_v51  ;;  %v5198_v3 = vpop.f32.mrf.mxu0  ;;  %v379_v51 = vmax.f32 %v307_v47, 0.0 }
 0x22f   :  { %v1049_v29 = vmul.f32 %v961_v18, %v374_v24  ;;  %v6091_v24 = vpop.xlane.xlu0 %1281  ;;  %v310_v3 = vadd.f32 %v5945_v1, %v5701_v7 }
 0x230   :  { %v965_v45 = vpop.f32.mrf.mxu0 }
 0x231   :  { %v966_v36 = vadd.f32 %v5952_v57, %v965_v45  ;;  %v1129_v54 = vsel %vm785_vm2, %v1049_v29, 0.0 }
 0x232   :  { %1130 = vadd.xlane.f32.xlu1 %v1129_v54  ;;  %v5201_v22 = vpop.f32.mrf.mxu0 }
 0x233   :  { %v1050_v42 = vmul.f32 %v966_v36, %v375_v35  ;;  %v6097_v35 = vpop.xlane.xlu1 %1278  ;;  %v6099_v28 = vpop.xlane.xlu0 %1287  ;;  %v380_v22 = vmax.f32 %v310_v3, 0.0  ;;  %v326_v3 = vadd.f32 %v5945_v1, %v5709_v15 }
 0x234   :  { %v968_v43 = vpop.f32.mrf.mxu0 }
 0x235   :  { %v969_v49 = vadd.f32 %v5952_v57, %v968_v43  ;;  %v1132_v58 = vsel %vm785_vm2, %v1050_v42, 0.0  ;;  %v315_v42 = vadd.f32 %v5945_v1, %v5703_v9 }
 0x236   :  { %1133 = vadd.xlane.f32.xlu0 %v1132_v58  ;;  %v5202_v50 = vpop.f32.mrf.mxu0 }
 0x237   :  { %v1051_v56 = vmul.f32 %v969_v49, %v376_v32  ;;  %v6105_v48 = vpop.xlane.xlu1 %1284  ;;  %v6107_v49 = vpop.xlane.xlu0 %1293 }
 0x238   :  { %v973_v34 = vpop.f32.mrf.mxu0 }
 0x239   :  { %v974_v44 = vadd.f32 %v5952_v57, %v973_v34  ;;  %v1135_v61 = vsel %vm785_vm2, %v1051_v56, 0.0  ;;  %v381_v56 = vmax.f32 %v315_v42, 0.0  ;;  %v318_v34 = vadd.f32 %v5945_v1, %v5705_v11 }
 0x23a   :  { %1136 = vadd.xlane.f32.xlu1 %v1135_v61  ;;  %v5205_v55 = vpop.f32.mrf.mxu0  ;;  %v384_v42 = vmax.f32 %v326_v3, 0.0 }
 0x23b   :  { %v1052_v4 = vmul.f32 %v974_v44, %v377_v38  ;;  %v6113_v44 = vpop.xlane.xlu1 %1290  ;;  %v6115_v61 = vpop.xlane.xlu0 %1299 }
 0x23c   :  { %v976_v10 = vpop.f32.mrf.mxu0 }
 0x23d   :  { %v977_v46 = vadd.f32 %v5952_v57, %v976_v10  ;;  %v1138_v2 = vsel %vm785_vm2, %v1052_v4, 0.0  ;;  %v382_v10 = vmax.f32 %v318_v34, 0.0 }
 0x23e   :  { %1139 = vadd.xlane.f32.xlu0 %v1138_v2  ;;  %v5206_v14 = vpop.f32.mrf.mxu0 }
 0x23f   :  { %v1053_v30 = vmul.f32 %v977_v46, %v378_v6  ;;  %v323_v6 = vadd.f32 %v5945_v1, %v5707_v13  ;;  %v6121_v2 = vpop.xlane.xlu1 %1296  ;;  %v6123_v14 = vpop.xlane.xlu0 %1305 }
 0x240   :  { %v981_v18 = vpop.f32.mrf.mxu0 }
 0x241   :  { %v982_v29 = vadd.f32 %v5952_v57, %v981_v18  ;;  %v1141_v5 = vsel %vm785_vm2, %v1053_v30, 0.0 }
 0x242   :  { %1142 = vadd.xlane.f32.xlu1 %v1141_v5  ;;  %v5209_v45 = vpop.f32.mrf.mxu0 }
 0x243   :  { %v1054_v36 = vmul.f32 %v982_v29, %v379_v51  ;;  %v383_v51 = vmax.f32 %v323_v6, 0.0  ;;  %v6129_v45 = vpop.xlane.xlu1 %1302 }
 0x244   :  { %v984_v54 = vpop.f32.mrf.mxu0 }
 0x245   :  { %v985_v43 = vadd.f32 %v5952_v57, %v984_v54  ;;  %v1144_v7 = vsel %vm785_vm2, %v1054_v36, 0.0  ;;  %v6131_v36 = vpop.xlane.xlu0 %1311 }
 0x246   :  { %1145 = vadd.xlane.f32.xlu0 %v1144_v7  ;;  %v5210_v32 = vpop.f32.mrf.mxu0  ;;  %7320 = vst [vmem:[#allocation6_spill] sm:$0xff] %v6131_v36 }
 0x247   :  { %v1055_v58 = vmul.f32 %v985_v43, %v380_v22  ;;  %v331_v43 = vadd.f32 %v5945_v1, %v5711_v17 }
 0x248   :  { %v989_v50 = vpop.f32.mrf.mxu0 }
 0x249   :  { %v990_v38 = vadd.f32 %v5952_v57, %v989_v50  ;;  %v1147_v9 = vsel %vm785_vm2, %v1055_v58, 0.0  ;;  %v6137_v58 = vpop.xlane.xlu1 %1308  ;;  %v6139_v50 = vpop.xlane.xlu0 %1317 }
 0x24a   :  { %1148 = vadd.xlane.f32.xlu1 %v1147_v9  ;;  %v5213_v60 = vpop.f32.mrf.mxu0  ;;  %7321 = vst [vmem:[#allocation7_spill] sm:$0xff] %v6139_v50  ;;  %v334_v9 = vadd.f32 %v5945_v1, %v5713_v19 }
 0x24b   :  { %v1056_v55 = vmul.f32 %v990_v38, %v381_v56  ;;  %v385_v38 = vmax.f32 %v331_v43, 0.0 }
 0x24c   :  { %v992_v4 = vpop.f32.mrf.mxu0 }
 0x24d   :  { %v993_v47 = vadd.f32 %v5952_v57, %v992_v4  ;;  %v1150_v11 = vsel %vm785_vm2, %v1056_v55, 0.0  ;;  %v6145_v4 = vpop.xlane.xlu1 %1314 }
 0x24e   :  { %1151 = vadd.xlane.f32.xlu0 %v1150_v11  ;;  %v5214_v46 = vpop.f32.mrf.mxu0  ;;  %7322 = vst [vmem:[#allocation8_spill] sm:$0xff] %v6145_v4  ;;  %v386_v11 = vmax.f32 %v334_v9, 0.0 }
 0x24f   :  { %v1057_v30 = vmul.f32 %v993_v47, %v382_v10  ;;  %v6147_v10 = vpop.xlane.xlu0 %1323  ;;  %v339_v46 = vadd.f32 %v5945_v1, %v5715_v21 }
 0x250   :  { %v997_v18 = vpop.f32.mrf.mxu0  ;;  %7323 = vst [vmem:[#allocation9_spill] sm:$0xff] %v6147_v10 }
 0x251   :  { %v998_v29 = vadd.f32 %v5952_v57, %v997_v18  ;;  %v1153_v13 = vsel %vm785_vm2, %v1057_v30, 0.0 }
 0x252   :  { %1154 = vadd.xlane.f32.xlu1 %v1153_v13  ;;  %v5217_v5 = vpop.f32.mrf.mxu0 }
 0x253   :  { %v1058_v54 = vmul.f32 %v998_v29, %v383_v51  ;;  %v6153_v51 = vpop.xlane.xlu1 %1320  ;;  %v6155_v3 = vpop.xlane.xlu0 %1329  ;;  %v7316_v5 = vlaneseq }
 0x254   :  { %v1000_v22 = vpop.f32.mrf.mxu0  ;;  %7324 = vst [vmem:[#allocation10_spill] sm:$0xff] %v6153_v51  ;;  %7325 = vst [vmem:[#allocation11_spill] sm:$0xff] %v6155_v3 }
 0x255   :  { %v1001_v7 = vadd.f32 %v5952_v57, %v1000_v22  ;;  %v1156_v15 = vsel %vm785_vm2, %v1058_v54, 0.0  ;;  %v387_v54 = vmax.f32 %v339_v46, 0.0  ;;  %v342_v22 = vadd.f32 %v5945_v1, %v5717_v23 }
 0x256   :  { %1157 = vadd.xlane.f32.xlu0 %v1156_v15  ;;  %v5218_v32 = vpop.f32.mrf.mxu0  ;;  %v6179_v46 = vstv %s7314_s9  ;;  %s5270_s9 = smov [#allocation3]  }
 0x257   :  { %v1059_v56 = vmul.f32 %v1001_v7, %v384_v42  ;;  %v347_v7 = vadd.f32 %v5945_v1, %v5721_v27  ;;  %v6163_v15 = vpop.xlane.xlu1 %1326  ;;  %v6165_v32 = vpop.xlane.xlu0 %1335  ;;  %v388_v9 = vmax.f32 %v342_v22, 0.0  ;;  %v350_v27 = vadd.f32 %v5945_v1, %v5725_v31  ;;  %s4861_s2 = sshll.u32 %s5270_s9, 4  ;;  %s4862_s2 = int_to_ptr.vmem [resolvable:$true] %s4861_s2 }
 0x258   :  { %v1005_v34 = vpop.f32.mrf.mxu0  ;;  %7326 = vst [vmem:[#allocation12_spill] sm:$0xff] %v6163_v15  ;;  %7327 = vst [vmem:[#allocation13_spill] sm:$0xff] %v6165_v32  ;;  %s5244_s19 = scalar_lea.vmem %s4862_s2, 48  ;;  %s5248_s20 = scalar_lea.vmem %s4862_s2, 64 }
 0x259   :  { %v1006_v60 = vadd.f32 %v5952_v57, %v1005_v34  ;;  %v1159_v17 = vsel %vm785_vm2, %v1059_v56, 0.0  ;;  %p5245_p0 = scmp.ne.s32.totalorder %s4862_s2, %s5244_s19  ;;  %p5249_p1 = scmp.lt.s32.totalorder %s4862_s2, %s4862_s2 }
 0x25a   :  { %1160 = vadd.xlane.f32.xlu1 %v1159_v17  ;;  %v5221_v55 = vpop.f32.mrf.mxu0  ;;  %v5269_v17 = vmov 1966171168   ;;  %p5250_p2 = scmp.lt.s32.totalorder %s5248_s20, %s5244_s19 }
 0x25b   :  { %v1060_v6 = vmul.f32 %v1006_v60, %v385_v38  ;;  %v6168_v38 = vshrl.u32 %v7316_v5, 7  ;;  %v2661_v55 = vunpack.c.l.s4 %v5269_v17 }
 0x25c   :  { %v1008_v47 = vpop.f32.mrf.mxu0  ;;  %p5251_p3 = por %p5250_p2, %p5249_p1 }
 0x25d   :  { %v1009_v30 = vadd.f32 %v5952_v57, %v1008_v47  ;;  %v1162_v19 = vsel %vm785_vm2, %v1060_v6, 0.0  ;;  %7328 = vst [vmem:[#allocation14_spill] sm:$0xff] %v6168_v38  ;;  %v389_v47 = vmax.f32 %v347_v7, 0.0  ;;  %v6189_v31 = vsub.s32 2, %v6168_v38 }
 0x25e   :  { %1163 = vadd.xlane.f32.xlu0 %v1162_v19  ;;  %v5222_v18 = vpop.f32.mrf.mxu0  ;;  %v6198_v7 = vsub.s32 4, %v6168_v38  ;;  %p5252_p4 = pnand %p5251_p3, %p5245_p0 }
 0x25f   :  { %v1061_v29 = vmul.f32 %v1009_v30, %v386_v11  ;;  %v6174_v11 = vpop.xlane.xlu1 %1332 }
 0x260   :  { %v1013_v13 = vpop.f32.mrf.mxu0  ;;  %7329 = vst [vmem:[#allocation15_spill] sm:$0xff] %v6174_v11 }
 0x261   :  { %v1014_v42 = vadd.f32 %v5952_v57, %v1013_v13  ;;  %v1165_v21 = vsel %vm785_vm2, %v1061_v29, 0.0  ;;  %v6183_v13 = vsub.s32 0, %v6168_v38 }
 0x262   :  { %1166 = vadd.xlane.f32.xlu1 %v1165_v21  ;;  %v5225_v43 = vpop.f32.mrf.mxu0  ;;  %v2662_v21 = vunpack.c.0.s8 %v2661_v55  ;;  %v6209_v55 = vsub.s32 7, %v6168_v38 }
 0x263   :  { %v1062_v56 = vmul.f32 %v1014_v42, %v387_v54  ;;  %v6186_v54 = vsub.s32 1, %v6168_v38  ;;  %v6194_v42 = vsub.s32 3, %v6168_v38 }
 0x264   :  { %v1016_v34 = vpop.f32.mrf.mxu0 }
 0x265   :  { %v1017_v23 = vadd.f32 %v5952_v57, %v1016_v34  ;;  %v1168_v60 = vsel %vm785_vm2, %v1062_v56, 0.0  ;;  %v6201_v56 = vsub.s32 5, %v6168_v38  ;;  %v6204_v34 = vsub.s32 6, %v6168_v38 }
 0x266   :  { %1169 = vadd.xlane.f32.xlu0 %v1168_v60  ;;  %v5226_v6 = vpop.f32.mrf.mxu0 }
 0x267   :  { %v1068_v30 = vpop.xlane.xlu0 %1067  ;;  %v1063_v19 = vmul.f32 %v1017_v23, %v388_v9  ;;  %v390_v9 = vmax.f32 %v350_v27, 0.0  ;;  %v6206_v23 = vpop.xlane.xlu1 %1338 }
 0x268   :  { %v1340_v18 = vadd.f32 %v6021_v33, %v1068_v30  ;;  %v1021_v29 = vpop.f32.mrf.mxu0  ;;  %7330 = vst [vmem:[#allocation16_spill] sm:$0xff] %v6206_v23 }
 0x269   :  { %v1022_v1 = vadd.f32 %v5952_v57, %v1021_v29  ;;  %v1171_v22 = vsel %vm785_vm2, %v1063_v19, 0.0 }
 0x26a   :  { %v1380_v33 = vadd.f32 %v6179_v46, %v1340_v18  ;;  %1172 = vadd.xlane.f32.xlu1 %v1171_v22  ;;  %v5229_v43 = vpop.f32.mrf.mxu0 }
 0x26b   :  { %v1071_v60 = vpop.xlane.xlu0 %1070  ;;  %v1064_v17 = vmul.f32 %v1022_v1, %v389_v47  ;;  %v6218_v43 = vsub.s32 %v2662_v21, %v6168_v38 }
 0x26c   :  { %v1341_v6 = vadd.f32 %v6033_v39, %v1071_v60  ;;  %v1024_v30 = vpop.f32.mrf.mxu0  ;;  %v1459_v19 = vrot.slane %v1380_v33, %v6183_v13  ;;  %v1463_v18 = vrot.slane %v1380_v33, %v6186_v54  ;;  %v1467_v29 = vrot.slane %v1380_v33, %v6189_v31 }
 0x26d   :  { %v1025_v22 = vadd.f32 %v5952_v57, %v1024_v30  ;;  %v1174_v27 = vsel %vm785_vm2, %v1064_v17, 0.0  ;;  %v1471_v47 = vrot.slane %v1380_v33, %v6194_v42  ;;  %v1475_v60 = vrot.slane %v1380_v33, %v6198_v7 }
 0x26e   :  { %v1381_v1 = vadd.f32 %v6179_v46, %v1341_v6  ;;  %1175 = vadd.xlane.f32.xlu0 %v1174_v27  ;;  %v5230_v39 = vpop.f32.mrf.mxu0  ;;  %v1479_v5 = vrot.slane %v1380_v33, %v6201_v56  ;;  %v1483_v23 = vrot.slane %v1380_v33, %v6204_v34  ;;  %v1487_v57 = vrot.slane %v1380_v33, %v6209_v55 }
 0x26f   :  { %v1074_v32 = vpop.xlane.xlu1 %1073  ;;  %v1065_v11 = vmul.f32 %v1025_v22, %v390_v9  ;;  %v2656_v17 = vcombine.low %v1459_v19, %v1463_v18  ;;  %v2657_v30 = vcombine.low %v1467_v29, %v1471_v47  ;;  %vm4716_vm2 = vcmask 1048512  }
 0x270   :  { %v1342_v21 = vadd.f32 %v6027_v8, %v1074_v32  ;;  %v1491_v38 = vrot.slane %v1381_v1, %v6183_v13  ;;  %v1495_v6 = vrot.slane %v1381_v1, %v6186_v54  ;;  %v1499_v27 = vrot.slane %v1381_v1, %v6189_v31 }
 0x271   :  { %v1178_v39 = vsel %vm1177_vm3, %v1065_v11, 0.0  ;;  %v1503_v3 = vrot.slane %v1381_v1, %v6194_v42  ;;  %v1507_v15 = vrot.slane %v1381_v1, %v6198_v7  ;;  %v1511_v9 = vrot.slane %v1381_v1, %v6201_v56 }
 0x272   :  { %v1382_v33 = vadd.f32 %v6179_v46, %v1342_v21  ;;  %1179 = vadd.xlane.f32.xlu1 %v1178_v39  ;;  %v1515_v19 = vrot.slane %v1381_v1, %v6204_v34  ;;  %v1519_v8 = vrot.slane %v1381_v1, %v6209_v55  ;;  %v2705_v32 = vcombine.low %v1491_v38, %v1495_v6 }
 0x273   :  { %v1077_v18 = vpop.xlane.xlu1 %1076  ;;  %v2706_v29 = vcombine.low %v1499_v27, %v1503_v3  ;;  %v2707_v22 = vcombine.low %v1507_v15, %v1511_v9  ;;  %v2658_v47 = vcombine.low %v1475_v60, %v1479_v5  ;;  %v2659_v10 = vcombine.low %v1483_v23, %v1487_v57 }
 0x274   :  { %v1343_v11 = vadd.f32 %v6041_v40, %v1077_v18  ;;  %v2708_v51 = vcombine.low %v1515_v19, %v1519_v8  ;;  %v2715_v50 = vrot.slane %v2705_v32, %v6218_v43  ;;  %v2666_v4 = vrot.slane %v2656_v17, %v6218_v43 }
 0x275   :  { %v2722_v21 = vrot.slane %v2706_v29, %v6218_v43  ;;  %v2729_v39 = vrot.slane %v2707_v22, %v6218_v43  ;;  %v2673_v36 = vrot.slane %v2657_v30, %v6218_v43  ;;  %v2680_v38 = vrot.slane %v2658_v47, %v6218_v43 }
 0x276   :  { %v1383_v3 = vadd.f32 %v6179_v46, %v1343_v11  ;;  %v2736_v5 = vrot.slane %v2708_v51, %v6218_v43  ;;  %v2687_v15 = vrot.slane %v2659_v10, %v6218_v43  ;;  %v1523_v40 = vrot.slane %v1382_v33, %v6183_v13 }
 0x277   :  { %v1080_v23 = vpop.xlane.xlu0 %1079  ;;  %v2737_v1 = vcombine.low %v2715_v50, %v2722_v21  ;;  %v2688_v60 = vcombine.low %v2666_v4, %v2673_v36  ;;  %v1527_v57 = vrot.slane %v1382_v33, %v6186_v54  ;;  %v1531_v17 = vrot.slane %v1382_v33, %v6189_v31 }
 0x278   :  { %v1344_v6 = vadd.f32 %v6035_v26, %v1080_v23  ;;  %v2738_v30 = vcombine.low %v2729_v39, %v2736_v5  ;;  %v2689_v27 = vcombine.low %v2680_v38, %v2687_v15  ;;  %v1535_v9 = vrot.slane %v1382_v33, %v6194_v42 }
 0x279   :  { %v1539_v19 = vrot.slane %v1382_v33, %v6198_v7  ;;  %v1543_v51 = vrot.slane %v1382_v33, %v6201_v56  ;;  %v2745_v10 = vrot.slane %v2737_v1, %v6218_v43  ;;  %v2696_v36 = vrot.slane %v2688_v60, %v6218_v43 }
 0x27a   :  { %v2752_v8 = vrot.slane %v2738_v30, %v6218_v43  ;;  %v1547_v50 = vrot.slane %v1382_v33, %v6204_v34  ;;  %v1551_v32 = vrot.slane %v1382_v33, %v6209_v55  ;;  %v2754_v26 = vcombine.low %v1523_v40, %v1527_v57 }
 0x27b   :  { %v1083_v4 = vpop.xlane.xlu1 %1082  ;;  %v2755_v18 = vcombine.low %v1531_v17, %v1535_v9  ;;  %v2756_v29 = vcombine.low %v1539_v19, %v1543_v51  ;;  %v1384_v22 = vadd.f32 %v6179_v46, %v1344_v6  ;;  %v2703_v11 = vrot.slane %v2689_v27, %v6218_v43 }
 0x27c   :  { %v1345_v47 = vadd.f32 %v6049_v12, %v1083_v4  ;;  %v1555_v21 = vrot.slane %v1383_v3, %v6183_v13  ;;  %v2757_v39 = vcombine.low %v1547_v50, %v1551_v32  ;;  %v2764_v38 = vrot.slane %v2754_v26, %v6218_v43 }
 0x27d   :  { %v2771_v5 = vrot.slane %v2755_v18, %v6218_v43  ;;  %v2778_v15 = vrot.slane %v2756_v29, %v6218_v43  ;;  %v2753_v23 = vcombine.low %v2745_v10, %v2752_v8  ;;  %v1559_v33 = vrot.slane %v1383_v3, %v6186_v54 }
 0x27e   :  { %v1563_v40 = vrot.slane %v1383_v3, %v6189_v31  ;;  %v1567_v1 = vrot.slane %v1383_v3, %v6194_v42  ;;  %v2785_v12 = vrot.slane %v2757_v39, %v6218_v43  ;;  %v1571_v17 = vrot.slane %v1383_v3, %v6198_v7 }
 0x27f   :  { %v1086_v60 = vpop.xlane.xlu0 %1085  ;;  %v2786_v57 = vcombine.low %v2764_v38, %v2771_v5  ;;  %v1575_v6 = vrot.slane %v1383_v3, %v6201_v56  ;;  %v2704_v30 = vcombine.low %v2696_v36, %v2703_v11  ;;  %v1579_v27 = vrot.slane %v1383_v3, %v6204_v34 }
 0x280   :  { %v1583_v9 = vrot.slane %v1383_v3, %v6209_v55  ;;  %v2803_v19 = vcombine.low %v1555_v21, %v1559_v33  ;;  %v2787_v51 = vcombine.low %v2778_v15, %v2785_v12  ;;  %v2804_v8 = vcombine.low %v1563_v40, %v1567_v1 }
 0x281   :  { %v2794_v10 = vrot.slane %v2786_v57, %v6218_v43  ;;  %v2805_v50 = vcombine.low %v1571_v17, %v1575_v6  ;;  %v1346_v4 = vadd.f32 %v6043_v41, %v1086_v60  ;;  %v1587_v18 = vrot.slane %v1384_v22, %v6183_v13 }
 0x282   :  { %v2806_v32 = vcombine.low %v1579_v27, %v1583_v9  ;;  %v2813_v26 = vrot.slane %v2803_v19, %v6218_v43  ;;  %v2801_v36 = vrot.slane %v2787_v51, %v6218_v43  ;;  %v2820_v29 = vrot.slane %v2804_v8, %v6218_v43 }
 0x283   :  { %4497 = vperm.xlu1 %5239, %v2753_v23   ;;  %v2827_v3 = vrot.slane %v2805_v50, %v6218_v43  ;;  %v1591_v11 = vrot.slane %v1384_v22, %v6186_v54  ;;  %v1385_v21 = vadd.f32 %v6179_v46, %v1345_v47  ;;  %v1595_v41 = vrot.slane %v1384_v22, %v6189_v31  ;;  %v1089_v5 = vpop.xlane.xlu1 %1088 }
 0x284   :  { %4494 = vperm.xlu0 %5238, %v2704_v30   ;;  %v2834_v39 = vrot.slane %v2806_v32, %v6218_v43  ;;  %v1599_v38 = vrot.slane %v1384_v22, %v6194_v42  ;;  %v2802_v15 = vcombine.low %v2794_v10, %v2801_v36  ;;  %v2835_v23 = vcombine.low %v2813_v26, %v2820_v29 }
 0x285   :  { %v1603_v33 = vrot.slane %v1384_v22, %v6198_v7  ;;  %v1607_v40 = vrot.slane %v1384_v22, %v6201_v56  ;;  %v6289_v1 = vadd.f32 %v6179_v46, %v1346_v4  ;;  %v1611_v47 = vrot.slane %v1384_v22, %v6204_v34 }
 0x286   :  { %v2836_v60 = vcombine.low %v2827_v3, %v2834_v39  ;;  %v1615_v12 = vrot.slane %v1384_v22, %v6209_v55  ;;  %v2843_v17 = vrot.slane %v2835_v23, %v6218_v43  ;;  %v2852_v6 = vcombine.low %v1587_v18, %v1591_v11 }
 0x287   :  { %v1092_v57 = vpop.xlane.xlu0 %1091  ;;  %4500 = vperm.xlu1 %5239, %v2802_v15   ;;  %v2853_v30 = vcombine.low %v1595_v41, %v1599_v38  ;;  %v2854_v27 = vcombine.low %v1603_v33, %v1607_v40  ;;  %v1347_v9 = vadd.f32 %v6057_v25, %v1089_v5  ;;  %v1619_v10 = vrot.slane %v1385_v21, %v6183_v13 }
 0x288   :  { %v2850_v19 = vrot.slane %v2836_v60, %v6218_v43  ;;  %v2855_v51 = vcombine.low %v1611_v47, %v1615_v12  ;;  %v2862_v8 = vrot.slane %v2852_v6, %v6218_v43  ;;  %v1623_v4 = vrot.slane %v1385_v21, %v6186_v54 }
 0x289   :  { %v2869_v50 = vrot.slane %v2853_v30, %v6218_v43  ;;  %v2876_v22 = vrot.slane %v2854_v27, %v6218_v43  ;;  %v1348_v32 = vadd.f32 %v6051_v53, %v1092_v57  ;;  %v1627_v25 = vrot.slane %v1385_v21, %v6189_v31 }
 0x28a   :  { %v2851_v26 = vcombine.low %v2843_v17, %v2850_v19  ;;  %v2883_v18 = vrot.slane %v2855_v51, %v6218_v43  ;;  %v1631_v29 = vrot.slane %v1385_v21, %v6194_v42  ;;  %v1635_v3 = vrot.slane %v1385_v21, %v6198_v7 }
 0x28b   :  { %v2884_v36 = vcombine.low %v2862_v8, %v2869_v50  ;;  %v1639_v11 = vrot.slane %v1385_v21, %v6201_v56  ;;  %v6308_v39 = vadd.f32 %v6179_v46, %v1347_v9  ;;  %v1643_v38 = vrot.slane %v1385_v21, %v6204_v34  ;;  %v1095_v5 = vpop.xlane.xlu1 %1094 }
 0x28c   :  { %4503 = vperm.xlu1 %5239, %v2851_v26   ;;  %v2885_v41 = vcombine.low %v2876_v22, %v2883_v18  ;;  %v1647_v53 = vrot.slane %v1385_v21, %v6209_v55  ;;  %v2901_v23 = vcombine.low %v1619_v10, %v1623_v4  ;;  %v2902_v33 = vcombine.low %v1627_v25, %v1631_v29 }
 0x28d   :  { %v2892_v15 = vrot.slane %v2884_v36, %v6218_v43  ;;  %v2903_v40 = vcombine.low %v1635_v3, %v1639_v11  ;;  %v6314_v60 = vadd.f32 %v6179_v46, %v1348_v32  ;;  %v1651_v57 = vrot.slane %v6289_v1, %v6183_v13 }
 0x28e   :  { %v2899_v47 = vrot.slane %v2885_v41, %v6218_v43  ;;  %v2904_v12 = vcombine.low %v1643_v38, %v1647_v53  ;;  %v2911_v6 = vrot.slane %v2901_v23, %v6218_v43  ;;  %v2918_v21 = vrot.slane %v2902_v33, %v6218_v43 }
 0x28f   :  { %v1098_v17 = vpop.xlane.xlu0 %1097  ;;  %v2925_v30 = vrot.slane %v2903_v40, %v6218_v43  ;;  %v1655_v27 = vrot.slane %v6289_v1, %v6186_v54  ;;  %v1349_v9 = vadd.f32 %v6065_v37, %v1095_v5  ;;  %v1659_v10 = vrot.slane %v6289_v1, %v6189_v31 }
 0x290   :  { %v2900_v19 = vcombine.low %v2892_v15, %v2899_v47  ;;  %v2932_v51 = vrot.slane %v2904_v12, %v6218_v43  ;;  %v2933_v8 = vcombine.low %v2911_v6, %v2918_v21  ;;  %v1663_v50 = vrot.slane %v6289_v1, %v6194_v42 }
 0x291   :  { %v1667_v22 = vrot.slane %v6289_v1, %v6198_v7  ;;  %v1671_v4 = vrot.slane %v6289_v1, %v6201_v56  ;;  %v1350_v32 = vadd.f32 %v6059_v59, %v1098_v17  ;;  %v1675_v26 = vrot.slane %v6289_v1, %v6204_v34 }
 0x292   :  { %4506 = vperm.xlu1 %5239, %v2900_v19   ;;  %v2934_v37 = vcombine.low %v2925_v30, %v2932_v51  ;;  %v1679_v18 = vrot.slane %v6289_v1, %v6209_v55  ;;  %v2941_v25 = vrot.slane %v2933_v8, %v6218_v43  ;;  %v2950_v36 = vcombine.low %v1651_v57, %v1655_v27 }
 0x293   :  { %v2951_v29 = vcombine.low %v1659_v10, %v1663_v50  ;;  %v2952_v3 = vcombine.low %v1667_v22, %v1671_v4  ;;  %v1389_v11 = vadd.f32 %v6179_v46, %v1349_v9  ;;  %v1683_v59 = vrot.slane %v6308_v39, %v6183_v13  ;;  %v1101_v53 = vpop.xlane.xlu1 %1100 }
 0x294   :  { %v2948_v41 = vrot.slane %v2934_v37, %v6218_v43  ;;  %v2953_v38 = vcombine.low %v1675_v26, %v1679_v18  ;;  %v2960_v5 = vrot.slane %v2950_v36, %v6218_v43  ;;  %v1687_v23 = vrot.slane %v6308_v39, %v6186_v54 }
 0x295   :  { %v2967_v15 = vrot.slane %v2951_v29, %v6218_v43  ;;  %v2974_v1 = vrot.slane %v2952_v3, %v6218_v43  ;;  %v6350_v33 = vadd.f32 %v6179_v46, %v1350_v32  ;;  %v1691_v12 = vrot.slane %v6308_v39, %v6189_v31 }
 0x296   :  { %v2949_v40 = vcombine.low %v2941_v25, %v2948_v41  ;;  %v2981_v47 = vrot.slane %v2953_v38, %v6218_v43  ;;  %v1695_v6 = vrot.slane %v6308_v39, %v6194_v42  ;;  %v1699_v21 = vrot.slane %v6308_v39, %v6198_v7 }
 0x297   :  { %v1104_v57 = vpop.xlane.xlu0 %1103  ;;  %v2982_v17 = vcombine.low %v2960_v5, %v2967_v15  ;;  %v1703_v30 = vrot.slane %v6308_v39, %v6201_v56  ;;  %v1351_v27 = vadd.f32 %v6073_v20, %v1101_v53  ;;  %v1707_v19 = vrot.slane %v6308_v39, %v6204_v34 }
 0x298   :  { %4509 = vperm.xlu1 %5239, %v2949_v40   ;;  %v2983_v9 = vcombine.low %v2974_v1, %v2981_v47  ;;  %v1711_v51 = vrot.slane %v6308_v39, %v6209_v55  ;;  %v2999_v8 = vcombine.low %v1683_v59, %v1687_v23  ;;  %v3000_v50 = vcombine.low %v1691_v12, %v1695_v6 }
 0x299   :  { %v2990_v10 = vrot.slane %v2982_v17, %v6218_v43  ;;  %v3001_v22 = vcombine.low %v1699_v21, %v1703_v30  ;;  %v1352_v4 = vadd.f32 %v6067_v63, %v1104_v57  ;;  %v1747_v20 = vrot.slane %v1389_v11, %v6183_v13 }
 0x29a   :  { %v2997_v32 = vrot.slane %v2983_v9, %v6218_v43  ;;  %v3002_v37 = vcombine.low %v1707_v19, %v1711_v51  ;;  %v3009_v26 = vrot.slane %v2999_v8, %v6218_v43  ;;  %v3016_v18 = vrot.slane %v3000_v50, %v6218_v43 }
 0x29b   :  { %v3023_v25 = vrot.slane %v3001_v22, %v6218_v43  ;;  %v1751_v39 = vrot.slane %v1389_v11, %v6186_v54  ;;  %v6375_v36 = vadd.f32 %v6179_v46, %v1351_v27  ;;  %v1755_v63 = vrot.slane %v1389_v11, %v6189_v31  ;;  %v1107_v41 = vpop.xlane.xlu1 %1106 }
 0x29c   :  { %v2998_v29 = vcombine.low %v2990_v10, %v2997_v32  ;;  %v3030_v3 = vrot.slane %v3002_v37, %v6218_v43  ;;  %v3031_v38 = vcombine.low %v3009_v26, %v3016_v18  ;;  %v1759_v59 = vrot.slane %v1389_v11, %v6194_v42 }
 0x29d   :  { %v1763_v53 = vrot.slane %v1389_v11, %v6198_v7  ;;  %v1767_v5 = vrot.slane %v1389_v11, %v6201_v56  ;;  %v6383_v15 = vadd.f32 %v6179_v46, %v1352_v4  ;;  %v1771_v23 = vrot.slane %v1389_v11, %v6204_v34 }
 0x29e   :  { %4512 = vperm.xlu1 %5239, %v2998_v29   ;;  %v3032_v1 = vcombine.low %v3023_v25, %v3030_v3  ;;  %v1775_v40 = vrot.slane %v1389_v11, %v6209_v55  ;;  %v3039_v47 = vrot.slane %v3031_v38, %v6218_v43  ;;  %v3097_v12 = vcombine.low %v1747_v20, %v1751_v39 }
 0x29f   :  { %v3098_v57 = vcombine.low %v1755_v63, %v1759_v59  ;;  %v3099_v17 = vcombine.low %v1763_v53, %v1767_v5  ;;  %v1110_v6 = vpop.xlane.xlu0 %1109  ;;  %v1353_v21 = vadd.f32 %v6081_v62, %v1107_v41  ;;  %v1715_v9 = vrot.slane %v6314_v60, %v6183_v13 }
 0x2a0   :  { %v3046_v30 = vrot.slane %v3032_v1, %v6218_v43  ;;  %v3100_v27 = vcombine.low %v1771_v23, %v1775_v40  ;;  %v3107_v19 = vrot.slane %v3097_v12, %v6218_v43  ;;  %v1719_v10 = vrot.slane %v6314_v60, %v6186_v54 }
 0x2a1   :  { %v3114_v51 = vrot.slane %v3098_v57, %v6218_v43  ;;  %v3121_v11 = vrot.slane %v3099_v17, %v6218_v43  ;;  %v1354_v62 = vadd.f32 %v6075_v52, %v1110_v6  ;;  %v1723_v22 = vrot.slane %v6314_v60, %v6189_v31 }
 0x2a2   :  { %v3047_v8 = vcombine.low %v3039_v47, %v3046_v30  ;;  %v3128_v50 = vrot.slane %v3100_v27, %v6218_v43  ;;  %v1727_v32 = vrot.slane %v6314_v60, %v6194_v42  ;;  %v1731_v37 = vrot.slane %v6314_v60, %v6198_v7 }
 0x2a3   :  { %v3129_v4 = vcombine.low %v3107_v19, %v3114_v51  ;;  %v1735_v20 = vrot.slane %v6314_v60, %v6201_v56  ;;  %v1739_v18 = vrot.slane %v6314_v60, %v6204_v34  ;;  %v1743_v52 = vrot.slane %v6314_v60, %v6209_v55 }
 0x2a4   :  { %4515 = vperm.xlu1 %5239, %v3047_v8   ;;  %v3130_v26 = vcombine.low %v3121_v11, %v3128_v50  ;;  %v3048_v25 = vcombine.low %v1715_v9, %v1719_v10  ;;  %v6412_v39 = vadd.f32 %v6179_v46, %v1353_v21  ;;  %v3049_v3 = vcombine.low %v1723_v22, %v1727_v32 }
 0x2a5   :  { %v3137_v29 = vrot.slane %v3129_v4, %v6218_v43  ;;  %v3050_v63 = vcombine.low %v1731_v37, %v1735_v20  ;;  %v3051_v38 = vcombine.low %v1739_v18, %v1743_v52  ;;  %v1779_v53 = vrot.slane %v6350_v33, %v6183_v13  ;;  %v1113_v37 = vpop.xlane.xlu1 %1112 }
 0x2a6   :  { %v3144_v41 = vrot.slane %v3130_v26, %v6218_v43  ;;  %v3058_v59 = vrot.slane %v3048_v25, %v6218_v43  ;;  %v6420_v5 = vadd.f32 %v6179_v46, %v1354_v62  ;;  %v3065_v60 = vrot.slane %v3049_v3, %v6218_v43 }
 0x2a7   :  { %v3072_v1 = vrot.slane %v3050_v63, %v6218_v43  ;;  %v1783_v23 = vrot.slane %v6350_v33, %v6186_v54  ;;  %v3079_v47 = vrot.slane %v3051_v38, %v6218_v43  ;;  %v1787_v12 = vrot.slane %v6350_v33, %v6189_v31 }
 0x2a8   :  { %v3145_v40 = vcombine.low %v3137_v29, %v3144_v41  ;;  %v1791_v57 = vrot.slane %v6350_v33, %v6194_v42  ;;  %v3080_v17 = vcombine.low %v3058_v59, %v3065_v60  ;;  %v1795_v6 = vrot.slane %v6350_v33, %v6198_v7 }
 0x2a9   :  { %v1799_v21 = vrot.slane %v6350_v33, %v6201_v56  ;;  %v1803_v30 = vrot.slane %v6350_v33, %v6204_v34  ;;  %v3081_v27 = vcombine.low %v3072_v1, %v3079_v47  ;;  %v1807_v9 = vrot.slane %v6350_v33, %v6209_v55 }
 0x2aa   :  { %4521 = vperm.xlu0 %5238, %v3145_v40   ;;  %v3146_v19 = vcombine.low %v1779_v53, %v1783_v23  ;;  %v3147_v51 = vcombine.low %v1787_v12, %v1791_v57  ;;  %v3088_v11 = vrot.slane %v3080_v17, %v6218_v43  ;;  %v1811_v8 = vrot.slane %v6375_v36, %v6183_v13  ;;  %v1116_v53 = vpop.xlane.xlu0 %1115 }
 0x2ab   :  { %v3148_v10 = vcombine.low %v1795_v6, %v1799_v21  ;;  %v1815_v50 = vrot.slane %v6375_v36, %v6186_v54  ;;  %v3095_v62 = vrot.slane %v3081_v27, %v6218_v43  ;;  %v3149_v22 = vcombine.low %v1803_v30, %v1807_v9 }
 0x2ac   :  { %v3156_v4 = vrot.slane %v3146_v19, %v6218_v43  ;;  %v3163_v32 = vrot.slane %v3147_v51, %v6218_v43  ;;  %v1819_v20 = vrot.slane %v6375_v36, %v6189_v31  ;;  %v1823_v26 = vrot.slane %v6375_v36, %v6194_v42 }
 0x2ad   :  { %v3170_v33 = vrot.slane %v3148_v10, %v6218_v43  ;;  %v1827_v18 = vrot.slane %v6375_v36, %v6198_v7  ;;  %v3096_v52 = vcombine.low %v3088_v11, %v3095_v62  ;;  %v3177_v25 = vrot.slane %v3149_v22, %v6218_v43 }
 0x2ae   :  { %v3178_v29 = vcombine.low %v3156_v4, %v3163_v32  ;;  %v1831_v3 = vrot.slane %v6375_v36, %v6201_v56  ;;  %v1835_v63 = vrot.slane %v6375_v36, %v6204_v34  ;;  %v1839_v41 = vrot.slane %v6375_v36, %v6209_v55 }
 0x2af   :  { %v3195_v38 = vcombine.low %v1811_v8, %v1815_v50  ;;  %v3196_v59 = vcombine.low %v1819_v20, %v1823_v26  ;;  %4518 = vperm.xlu1 %5239, %v3096_v52   ;;  %v1355_v60 = vadd.f32 %v6089_v16, %v1113_v37  ;;  %v3179_v1 = vcombine.low %v3170_v33, %v3177_v25 }
 0x2b0   :  { %v3186_v23 = vrot.slane %v3178_v29, %v6218_v43  ;;  %v3197_v40 = vcombine.low %v1827_v18, %v1831_v3  ;;  %v3198_v47 = vcombine.low %v1835_v63, %v1839_v41  ;;  %v1843_v17 = vrot.slane %v6383_v15, %v6183_v13  ;;  %v1119_v3 = vpop.xlane.xlu1 %1118 }
 0x2b1   :  { %v3205_v12 = vrot.slane %v3195_v38, %v6218_v43  ;;  %v3212_v57 = vrot.slane %v3196_v59, %v6218_v43  ;;  %v3193_v36 = vrot.slane %v3179_v1, %v6218_v43  ;;  %v1356_v21 = vadd.f32 %v6083_v0, %v1116_v53 }
 0x2b2   :  { %v3219_v6 = vrot.slane %v3197_v40, %v6218_v43  ;;  %v1847_v16 = vrot.slane %v6383_v15, %v6186_v54  ;;  %v3226_v30 = vrot.slane %v3198_v47, %v6218_v43  ;;  %v1851_v9 = vrot.slane %v6383_v15, %v6189_v31 }
 0x2b3   :  { %v3227_v27 = vcombine.low %v3205_v12, %v3212_v57  ;;  %v1855_v19 = vrot.slane %v6383_v15, %v6194_v42  ;;  %v3194_v51 = vcombine.low %v3186_v23, %v3193_v36  ;;  %v1859_v11 = vrot.slane %v6383_v15, %v6198_v7 }
 0x2b4   :  { %v1863_v10 = vrot.slane %v6383_v15, %v6201_v56  ;;  %v1867_v0 = vrot.slane %v6383_v15, %v6204_v34  ;;  %v3228_v8 = vcombine.low %v3219_v6, %v3226_v30  ;;  %v1871_v62 = vrot.slane %v6383_v15, %v6209_v55 }
 0x2b5   :  { %v3235_v50 = vrot.slane %v3227_v27, %v6218_v43  ;;  %v3244_v22 = vcombine.low %v1843_v17, %v1847_v16  ;;  %v6487_v4 = vadd.f32 %v6179_v46, %v1355_v60  ;;  %4524 = vperm.xlu1 %5239, %v3194_v51   ;;  %v3245_v32 = vcombine.low %v1851_v9, %v1855_v19  ;;  %v1122_v60 = vpop.xlane.xlu0 %1121 }
 0x2b6   :  { %v3246_v37 = vcombine.low %v1859_v11, %v1863_v10  ;;  %v1875_v33 = vrot.slane %v6412_v39, %v6183_v13  ;;  %v3242_v20 = vrot.slane %v3228_v8, %v6218_v43  ;;  %v3247_v26 = vcombine.low %v1867_v0, %v1871_v62 }
 0x2b7   :  { %v3254_v18 = vrot.slane %v3244_v22, %v6218_v43  ;;  %v1879_v52 = vrot.slane %v6412_v39, %v6186_v54  ;;  %v6496_v15 = vadd.f32 %v6179_v46, %v1356_v21  ;;  %v3261_v25 = vrot.slane %v3245_v32, %v6218_v43 }
 0x2b8   :  { %v3268_v29 = vrot.slane %v3246_v37, %v6218_v43  ;;  %v1883_v63 = vrot.slane %v6412_v39, %v6189_v31  ;;  %v3243_v41 = vcombine.low %v3235_v50, %v3242_v20  ;;  %v3275_v38 = vrot.slane %v3247_v26, %v6218_v43 }
 0x2b9   :  { %v1887_v59 = vrot.slane %v6412_v39, %v6194_v42  ;;  %v1891_v53 = vrot.slane %v6412_v39, %v6198_v7  ;;  %v3276_v1 = vcombine.low %v3254_v18, %v3261_v25  ;;  %v1895_v23 = vrot.slane %v6412_v39, %v6201_v56 }
 0x2ba   :  { %v1899_v40 = vrot.slane %v6412_v39, %v6204_v34  ;;  %v1903_v47 = vrot.slane %v6412_v39, %v6209_v55  ;;  %4527 = vperm.xlu0 %5238, %v3243_v41   ;;  %v3277_v12 = vcombine.low %v3268_v29, %v3275_v38  ;;  %v1357_v57 = vadd.f32 %v6097_v35, %v1119_v3 }
 0x2bb   :  { %v3293_v17 = vcombine.low %v1875_v33, %v1879_v52  ;;  %v3294_v36 = vcombine.low %v1883_v63, %v1887_v59  ;;  %v3284_v6 = vrot.slane %v3276_v1, %v6218_v43  ;;  %v3295_v21 = vcombine.low %v1891_v53, %v1895_v23  ;;  %v1125_v1 = vpop.xlane.xlu1 %1124 }
 0x2bc   :  { %v3296_v16 = vcombine.low %v1899_v40, %v1903_v47  ;;  %v1358_v30 = vadd.f32 %v6091_v24, %v1122_v60  ;;  %v3291_v27 = vrot.slane %v3277_v12, %v6218_v43  ;;  %v1907_v39 = vrot.slane %v6420_v5, %v6183_v13 }
 0x2bd   :  { %v3303_v9 = vrot.slane %v3293_v17, %v6218_v43  ;;  %v3310_v19 = vrot.slane %v3294_v36, %v6218_v43  ;;  %v3317_v51 = vrot.slane %v3295_v21, %v6218_v43  ;;  %v1911_v11 = vrot.slane %v6420_v5, %v6186_v54 }
 0x2be   :  { %v3324_v35 = vrot.slane %v3296_v16, %v6218_v43  ;;  %v1915_v10 = vrot.slane %v6420_v5, %v6189_v31  ;;  %v3292_v24 = vcombine.low %v3284_v6, %v3291_v27  ;;  %v1919_v8 = vrot.slane %v6420_v5, %v6194_v42  ;;  %v1128_v16 = vpop.xlane.xlu0 %1127 }
 0x2bf   :  { %v3325_v0 = vcombine.low %v3303_v9, %v3310_v19  ;;  %v1923_v50 = vrot.slane %v6420_v5, %v6198_v7  ;;  %v1927_v22 = vrot.slane %v6420_v5, %v6201_v56  ;;  %v1931_v32 = vrot.slane %v6420_v5, %v6204_v34 }
 0x2c0   :  { %v3326_v62 = vcombine.low %v3317_v51, %v3324_v35  ;;  %v1935_v37 = vrot.slane %v6420_v5, %v6209_v55  ;;  %4530 = vperm.xlu1 %5239, %v3292_v24   ;;  %v6538_v33 = vadd.f32 %v6179_v46, %v1357_v57  ;;  %v3342_v26 = vcombine.low %v1907_v39, %v1911_v11 }
 0x2c1   :  { %v3333_v20 = vrot.slane %v3325_v0, %v6218_v43  ;;  %v3343_v18 = vcombine.low %v1915_v10, %v1919_v8  ;;  %v3344_v25 = vcombine.low %v1923_v50, %v1927_v22  ;;  %v1939_v3 = vrot.slane %v6487_v4, %v6183_v13 }
 0x2c2   :  { %v3340_v52 = vrot.slane %v3326_v62, %v6218_v43  ;;  %v3345_v29 = vcombine.low %v1931_v32, %v1935_v37  ;;  %v6545_v63 = vadd.f32 %v6179_v46, %v1358_v30  ;;  %v3352_v5 = vrot.slane %v3342_v26, %v6218_v43 }
 0x2c3   :  { %v3359_v41 = vrot.slane %v3343_v18, %v6218_v43  ;;  %v1943_v38 = vrot.slane %v6487_v4, %v6186_v54  ;;  %v3366_v53 = vrot.slane %v3344_v25, %v6218_v43  ;;  %v1947_v23 = vrot.slane %v6487_v4, %v6189_v31 }
 0x2c4   :  { %v3341_v59 = vcombine.low %v3333_v20, %v3340_v52  ;;  %v3373_v60 = vrot.slane %v3345_v29, %v6218_v43  ;;  %v1951_v47 = vrot.slane %v6487_v4, %v6194_v42  ;;  %v1955_v12 = vrot.slane %v6487_v4, %v6198_v7 }
 0x2c5   :  { %v3374_v40 = vcombine.low %v3352_v5, %v3359_v41  ;;  %v1959_v57 = vrot.slane %v6487_v4, %v6201_v56  ;;  %v1963_v36 = vrot.slane %v6487_v4, %v6204_v34  ;;  %v1967_v6 = vrot.slane %v6487_v4, %v6209_v55 }
 0x2c6   :  { %4533 = vperm.xlu0 %5238, %v3341_v59   ;;  %v3375_v17 = vcombine.low %v3366_v53, %v3373_v60  ;;  %v3391_v21 = vcombine.low %v1939_v3, %v1943_v38  ;;  %v1359_v27 = vadd.f32 %v6105_v48, %v1125_v1  ;;  %v3392_v9 = vcombine.low %v1947_v23, %v1951_v47 }
 0x2c7   :  { %v3382_v30 = vrot.slane %v3374_v40, %v6218_v43  ;;  %v3393_v19 = vcombine.low %v1955_v12, %v1959_v57  ;;  %v3394_v51 = vcombine.low %v1963_v36, %v1967_v6  ;;  %v1971_v11 = vrot.slane %v6496_v15, %v6183_v13  ;;  %v1131_v57 = vpop.xlane.xlu1 %1130 }
 0x2c8   :  { %v3389_v39 = vrot.slane %v3375_v17, %v6218_v43  ;;  %v3401_v35 = vrot.slane %v3391_v21, %v6218_v43  ;;  %v3408_v10 = vrot.slane %v3392_v9, %v6218_v43  ;;  %v1360_v24 = vadd.f32 %v6099_v28, %v1128_v16 }
 0x2c9   :  { %v3415_v4 = vrot.slane %v3393_v19, %v6218_v43  ;;  %v1975_v0 = vrot.slane %v6496_v15, %v6186_v54  ;;  %v3422_v8 = vrot.slane %v3394_v51, %v6218_v43  ;;  %v1979_v50 = vrot.slane %v6496_v15, %v6189_v31 }
 0x2ca   :  { %v3390_v48 = vcombine.low %v3382_v30, %v3389_v39  ;;  %v1983_v62 = vrot.slane %v6496_v15, %v6194_v42  ;;  %v3423_v22 = vcombine.low %v3401_v35, %v3408_v10  ;;  %v1987_v32 = vrot.slane %v6496_v15, %v6198_v7  ;;  %v1134_v39 = vpop.xlane.xlu0 %1133 }
 0x2cb   :  { %v1991_v37 = vrot.slane %v6496_v15, %v6201_v56  ;;  %v1995_v28 = vrot.slane %v6496_v15, %v6204_v34  ;;  %v3424_v20 = vcombine.low %v3415_v4, %v3422_v8  ;;  %v1999_v26 = vrot.slane %v6496_v15, %v6209_v55 }
 0x2cc   :  { %4536 = vperm.xlu1 %5239, %v3390_v48   ;;  %v3440_v18 = vcombine.low %v1971_v11, %v1975_v0  ;;  %v3441_v52 = vcombine.low %v1979_v50, %v1983_v62  ;;  %v6590_v25 = vadd.f32 %v6179_v46, %v1359_v27  ;;  %v3431_v29 = vrot.slane %v3423_v22, %v6218_v43 }
 0x2cd   :  { %v3442_v3 = vcombine.low %v1987_v32, %v1991_v37  ;;  %v2003_v5 = vrot.slane %v6538_v33, %v6183_v13  ;;  %v3438_v41 = vrot.slane %v3424_v20, %v6218_v43  ;;  %v3443_v38 = vcombine.low %v1995_v28, %v1999_v26 }
 0x2ce   :  { %v3450_v59 = vrot.slane %v3440_v18, %v6218_v43  ;;  %v3457_v53 = vrot.slane %v3441_v52, %v6218_v43  ;;  %v6599_v15 = vadd.f32 %v6179_v46, %v1360_v24  ;;  %v2007_v1 = vrot.slane %v6538_v33, %v6186_v54 }
 0x2cf   :  { %v3464_v60 = vrot.slane %v3442_v3, %v6218_v43  ;;  %v2011_v23 = vrot.slane %v6538_v33, %v6189_v31  ;;  %v3439_v40 = vcombine.low %v3431_v29, %v3438_v41  ;;  %v3471_v47 = vrot.slane %v3443_v38, %v6218_v43 }
 0x2d0   :  { %v3472_v12 = vcombine.low %v3450_v59, %v3457_v53  ;;  %v2015_v17 = vrot.slane %v6538_v33, %v6194_v42  ;;  %v2019_v36 = vrot.slane %v6538_v33, %v6198_v7  ;;  %v2023_v6 = vrot.slane %v6538_v33, %v6201_v56 }
 0x2d1   :  { %v2027_v21 = vrot.slane %v6538_v33, %v6204_v34  ;;  %v2031_v16 = vrot.slane %v6538_v33, %v6209_v55  ;;  %4539 = vperm.xlu0 %5238, %v3439_v40   ;;  %v3473_v30 = vcombine.low %v3464_v60, %v3471_v47  ;;  %v3489_v9 = vcombine.low %v2003_v5, %v2007_v1 }
 0x2d2   :  { %v3480_v27 = vrot.slane %v3472_v12, %v6218_v43  ;;  %v3490_v19 = vcombine.low %v2011_v23, %v2015_v17  ;;  %v1361_v51 = vadd.f32 %v6113_v44, %v1131_v57  ;;  %v3491_v35 = vcombine.low %v2019_v36, %v2023_v6  ;;  %v1137_v12 = vpop.xlane.xlu1 %1136 }
 0x2d3   :  { %v3492_v11 = vcombine.low %v2027_v21, %v2031_v16  ;;  %v2035_v10 = vrot.slane %v6545_v63, %v6183_v13  ;;  %v3487_v4 = vrot.slane %v3473_v30, %v6218_v43  ;;  %v3499_v24 = vrot.slane %v3489_v9, %v6218_v43 }
 0x2d4   :  { %v3506_v33 = vrot.slane %v3490_v19, %v6218_v43  ;;  %v2039_v0 = vrot.slane %v6545_v63, %v6186_v54  ;;  %v3513_v48 = vrot.slane %v3491_v35, %v6218_v43  ;;  %v1362_v44 = vadd.f32 %v6107_v49, %v1134_v39  ;;  %v1140_v19 = vpop.xlane.xlu0 %1139 }
 0x2d5   :  { %v3520_v8 = vrot.slane %v3492_v11, %v6218_v43  ;;  %v2043_v50 = vrot.slane %v6545_v63, %v6189_v31  ;;  %v3488_v62 = vcombine.low %v3480_v27, %v3487_v4  ;;  %v2047_v32 = vrot.slane %v6545_v63, %v6194_v42 }
 0x2d6   :  { %v3521_v22 = vcombine.low %v3499_v24, %v3506_v33  ;;  %v2051_v37 = vrot.slane %v6545_v63, %v6198_v7  ;;  %v2055_v20 = vrot.slane %v6545_v63, %v6201_v56  ;;  %v2059_v26 = vrot.slane %v6545_v63, %v6204_v34 }
 0x2d7   :  { %v3522_v28 = vcombine.low %v3513_v48, %v3520_v8  ;;  %v2063_v49 = vrot.slane %v6545_v63, %v6209_v55  ;;  %4542 = vperm.xlu1 %5239, %v3488_v62   ;;  %v6642_v18 = vadd.f32 %v6179_v46, %v1361_v51  ;;  %v3538_v29 = vcombine.low %v2035_v10, %v2039_v0 }
 0x2d8   :  { %v3529_v52 = vrot.slane %v3521_v22, %v6218_v43  ;;  %v3539_v3 = vcombine.low %v2043_v50, %v2047_v32  ;;  %v3540_v41 = vcombine.low %v2051_v37, %v2055_v20  ;;  %v2067_v59 = vrot.slane %v6590_v25, %v6183_v13 }
 0x2d9   :  { %v3536_v5 = vrot.slane %v3522_v28, %v6218_v43  ;;  %v3541_v38 = vcombine.low %v2059_v26, %v2063_v49  ;;  %v6649_v53 = vadd.f32 %v6179_v46, %v1362_v44  ;;  %v3548_v63 = vrot.slane %v3538_v29, %v6218_v43 }
 0x2da   :  { %v3555_v60 = vrot.slane %v3539_v3, %v6218_v43  ;;  %v2071_v1 = vrot.slane %v6590_v25, %v6186_v54  ;;  %v3562_v40 = vrot.slane %v3540_v41, %v6218_v43  ;;  %v2075_v57 = vrot.slane %v6590_v25, %v6189_v31 }
 0x2db   :  { %v3537_v23 = vcombine.low %v3529_v52, %v3536_v5  ;;  %v3569_v47 = vrot.slane %v3541_v38, %v6218_v43  ;;  %v2079_v36 = vrot.slane %v6590_v25, %v6194_v42  ;;  %v2083_v6 = vrot.slane %v6590_v25, %v6198_v7 }
 0x2dc   :  { %v3570_v17 = vcombine.low %v3548_v63, %v3555_v60  ;;  %v2087_v21 = vrot.slane %v6590_v25, %v6201_v56  ;;  %v2091_v30 = vrot.slane %v6590_v25, %v6204_v34  ;;  %v2095_v27 = vrot.slane %v6590_v25, %v6209_v55 }
 0x2dd   :  { %4545 = vperm.xlu0 %5238, %v3537_v23   ;;  %v3571_v16 = vcombine.low %v3562_v40, %v3569_v47  ;;  %v3587_v9 = vcombine.low %v2067_v59, %v2071_v1  ;;  %v1363_v51 = vadd.f32 %v6121_v2, %v1137_v12  ;;  %v3588_v35 = vcombine.low %v2075_v57, %v2079_v36  ;;  %v1143_v57 = vpop.xlane.xlu1 %1142 }
 0x2de   :  { %v3578_v39 = vrot.slane %v3570_v17, %v6218_v43  ;;  %v3589_v11 = vcombine.low %v2083_v6, %v2087_v21  ;;  %v3590_v4 = vcombine.low %v2091_v30, %v2095_v27  ;;  %v2099_v33 = vrot.slane %v6599_v15, %v6183_v13 }
 0x2df   :  { %v3585_v10 = vrot.slane %v3571_v16, %v6218_v43  ;;  %v3597_v24 = vrot.slane %v3587_v9, %v6218_v43  ;;  %v3604_v0 = vrot.slane %v3588_v35, %v6218_v43  ;;  %v1364_v48 = vadd.f32 %v6115_v61, %v1140_v19 }
 0x2e0   :  { %v3611_v25 = vrot.slane %v3589_v11, %v6218_v43  ;;  %v2103_v8 = vrot.slane %v6599_v15, %v6186_v54  ;;  %v3618_v44 = vrot.slane %v3590_v4, %v6218_v43  ;;  %v2107_v50 = vrot.slane %v6599_v15, %v6189_v31 }
 0x2e1   :  { %v3586_v2 = vcombine.low %v3578_v39, %v3585_v10  ;;  %v2111_v62 = vrot.slane %v6599_v15, %v6194_v42  ;;  %v3619_v22 = vcombine.low %v3597_v24, %v3604_v0  ;;  %v2115_v32 = vrot.slane %v6599_v15, %v6198_v7  ;;  %v1146_v39 = vpop.xlane.xlu0 %1145 }
 0x2e2   :  { %v2119_v37 = vrot.slane %v6599_v15, %v6201_v56  ;;  %v2123_v61 = vrot.slane %v6599_v15, %v6204_v34  ;;  %v3620_v28 = vcombine.low %v3611_v25, %v3618_v44  ;;  %v2127_v20 = vrot.slane %v6599_v15, %v6209_v55 }
 0x2e3   :  { %4548 = vperm.xlu1 %5239, %v3586_v2   ;;  %v3636_v26 = vcombine.low %v2099_v33, %v2103_v8  ;;  %v3637_v49 = vcombine.low %v2107_v50, %v2111_v62  ;;  %v6694_v52 = vadd.f32 %v6179_v46, %v1363_v51  ;;  %v3627_v29 = vrot.slane %v3619_v22, %v6218_v43 }
 0x2e4   :  { %v3638_v3 = vcombine.low %v2115_v32, %v2119_v37  ;;  %v2131_v5 = vrot.slane %v6642_v18, %v6183_v13  ;;  %v3634_v41 = vrot.slane %v3620_v28, %v6218_v43  ;;  %v3639_v38 = vcombine.low %v2123_v61, %v2127_v20 }
 0x2e5   :  { %v3646_v59 = vrot.slane %v3636_v26, %v6218_v43  ;;  %v3653_v63 = vrot.slane %v3637_v49, %v6218_v43  ;;  %v6703_v15 = vadd.f32 %v6179_v46, %v1364_v48  ;;  %v2135_v1 = vrot.slane %v6642_v18, %v6186_v54 }
 0x2e6   :  { %v3660_v60 = vrot.slane %v3638_v3, %v6218_v43  ;;  %v2139_v23 = vrot.slane %v6642_v18, %v6189_v31  ;;  %v3635_v40 = vcombine.low %v3627_v29, %v3634_v41  ;;  %v3667_v47 = vrot.slane %v3639_v38, %v6218_v43 }
 0x2e7   :  { %v3668_v12 = vcombine.low %v3646_v59, %v3653_v63  ;;  %v2143_v17 = vrot.slane %v6642_v18, %v6194_v42  ;;  %v2147_v36 = vrot.slane %v6642_v18, %v6198_v7  ;;  %v2151_v6 = vrot.slane %v6642_v18, %v6201_v56 }
 0x2e8   :  { %v2155_v21 = vrot.slane %v6642_v18, %v6204_v34  ;;  %v2159_v16 = vrot.slane %v6642_v18, %v6209_v55  ;;  %4551 = vperm.xlu0 %5238, %v3635_v40   ;;  %v3669_v30 = vcombine.low %v3660_v60, %v3667_v47  ;;  %v3685_v9 = vcombine.low %v2131_v5, %v2135_v1  ;;  %v1149_v1 = vpop.xlane.xlu1 %1148 }
 0x2e9   :  { %v3676_v27 = vrot.slane %v3668_v12, %v6218_v43  ;;  %v3686_v19 = vcombine.low %v2139_v23, %v2143_v17  ;;  %v1365_v51 = vadd.f32 %v6129_v45, %v1143_v57  ;;  %v3687_v35 = vcombine.low %v2147_v36, %v2151_v6 }
 0x2ea   :  { %v3688_v11 = vcombine.low %v2155_v21, %v2159_v16  ;;  %v2163_v10 = vrot.slane %v6649_v53, %v6183_v13  ;;  %v3683_v4 = vrot.slane %v3669_v30, %v6218_v43  ;;  %v3695_v24 = vrot.slane %v3685_v9, %v6218_v43  ;;  %v1152_v16 = vpop.xlane.xlu0 %1151 }
 0x2eb   :  { %v3702_v18 = vrot.slane %v3686_v19, %v6218_v43  ;;  %v2167_v33 = vrot.slane %v6649_v53, %v6186_v54  ;;  %v3709_v0 = vrot.slane %v3687_v35, %v6218_v43  ;;  %v1366_v45 = vadd.f32 %v6123_v14, %v1146_v39 }
 0x2ec   :  { %v3716_v25 = vrot.slane %v3688_v11, %v6218_v43  ;;  %v2171_v48 = vrot.slane %v6649_v53, %v6189_v31  ;;  %v3684_v8 = vcombine.low %v3676_v27, %v3683_v4  ;;  %v2175_v44 = vrot.slane %v6649_v53, %v6194_v42  ;;  %v7331_v4 = vld [vmem:[#allocation6_spill] sm:$0xff] }
 0x2ed   :  { %v3717_v2 = vcombine.low %v3695_v24, %v3702_v18  ;;  %v2179_v50 = vrot.slane %v6649_v53, %v6198_v7  ;;  %v2183_v22 = vrot.slane %v6649_v53, %v6201_v56  ;;  %v2187_v32 = vrot.slane %v6649_v53, %v6204_v34 }
 0x2ee   :  { %v3718_v62 = vcombine.low %v3709_v0, %v3716_v25  ;;  %v2191_v14 = vrot.slane %v6649_v53, %v6209_v55  ;;  %4554 = vperm.xlu1 %5239, %v3684_v8   ;;  %v6746_v37 = vadd.f32 %v6179_v46, %v1365_v51  ;;  %v3734_v28 = vcombine.low %v2163_v10, %v2167_v33 }
 0x2ef   :  { %v3725_v61 = vrot.slane %v3717_v2, %v6218_v43  ;;  %v3735_v20 = vcombine.low %v2171_v48, %v2175_v44  ;;  %v3736_v49 = vcombine.low %v2179_v50, %v2183_v22  ;;  %v2195_v3 = vrot.slane %v6694_v52, %v6183_v13 }
 0x2f0   :  { %v3732_v26 = vrot.slane %v3718_v62, %v6218_v43  ;;  %v3737_v29 = vcombine.low %v2187_v32, %v2191_v14  ;;  %v6753_v5 = vadd.f32 %v6179_v46, %v1366_v45  ;;  %v3744_v53 = vrot.slane %v3734_v28, %v6218_v43 }
 0x2f1   :  { %v3751_v41 = vrot.slane %v3735_v20, %v6218_v43  ;;  %v2199_v38 = vrot.slane %v6694_v52, %v6186_v54  ;;  %v3758_v63 = vrot.slane %v3736_v49, %v6218_v43  ;;  %v2203_v23 = vrot.slane %v6694_v52, %v6189_v31 }
 0x2f2   :  { %v3733_v59 = vcombine.low %v3725_v61, %v3732_v26  ;;  %v3765_v60 = vrot.slane %v3737_v29, %v6218_v43  ;;  %v2207_v47 = vrot.slane %v6694_v52, %v6194_v42  ;;  %v2211_v12 = vrot.slane %v6694_v52, %v6198_v7 }
 0x2f3   :  { %v3766_v40 = vcombine.low %v3744_v53, %v3751_v41  ;;  %v2215_v57 = vrot.slane %v6694_v52, %v6201_v56  ;;  %v2219_v36 = vrot.slane %v6694_v52, %v6204_v34  ;;  %v2223_v6 = vrot.slane %v6694_v52, %v6209_v55 }
 0x2f4   :  { %4557 = vperm.xlu0 %5238, %v3733_v59   ;;  %v3767_v17 = vcombine.low %v3758_v63, %v3765_v60  ;;  %v3783_v21 = vcombine.low %v2195_v3, %v2199_v38  ;;  %v1367_v27 = vadd.f32 %v6137_v58, %v1149_v1  ;;  %v3784_v9 = vcombine.low %v2203_v23, %v2207_v47  ;;  %v1155_v60 = vpop.xlane.xlu1 %1154 }
 0x2f5   :  { %v3774_v30 = vrot.slane %v3766_v40, %v6218_v43  ;;  %v3785_v19 = vcombine.low %v2211_v12, %v2215_v57  ;;  %v3786_v51 = vcombine.low %v2219_v36, %v2223_v6  ;;  %v2227_v11 = vrot.slane %v6703_v15, %v6183_v13 }
 0x2f6   :  { %v3781_v39 = vrot.slane %v3767_v17, %v6218_v43  ;;  %v3793_v35 = vrot.slane %v3783_v21, %v6218_v43  ;;  %v3800_v10 = vrot.slane %v3784_v9, %v6218_v43  ;;  %v1368_v24 = vadd.f32 %v7331_v4, %v1152_v16  ;;  %v1158_v21 = vpop.xlane.xlu0 %1157  ;;  %v7332_v16 = vld [vmem:[#allocation8_spill] sm:$0xff] }
 0x2f7   :  { %v3807_v52 = vrot.slane %v3785_v19, %v6218_v43  ;;  %v2231_v18 = vrot.slane %v6703_v15, %v6186_v54  ;;  %v3814_v33 = vrot.slane %v3786_v51, %v6218_v43  ;;  %v2235_v0 = vrot.slane %v6703_v15, %v6189_v31 }
 0x2f8   :  { %v3782_v58 = vcombine.low %v3774_v30, %v3781_v39  ;;  %v2239_v25 = vrot.slane %v6703_v15, %v6194_v42  ;;  %v3815_v45 = vcombine.low %v3793_v35, %v3800_v10  ;;  %v2243_v48 = vrot.slane %v6703_v15, %v6198_v7 }
 0x2f9   :  { %v2247_v8 = vrot.slane %v6703_v15, %v6201_v56  ;;  %v2251_v2 = vrot.slane %v6703_v15, %v6204_v34  ;;  %v3816_v44 = vcombine.low %v3807_v52, %v3814_v33  ;;  %v2255_v50 = vrot.slane %v6703_v15, %v6209_v55  ;;  %v7333_v52 = vld [vmem:[#allocation7_spill] sm:$0xff] }
 0x2fa   :  { %4560 = vperm.xlu1 %5239, %v3782_v58   ;;  %v3832_v62 = vcombine.low %v2227_v11, %v2231_v18  ;;  %v3833_v22 = vcombine.low %v2235_v0, %v2239_v25  ;;  %v6798_v32 = vadd.f32 %v6179_v46, %v1367_v27  ;;  %v3823_v14 = vrot.slane %v3815_v45, %v6218_v43 }
 0x2fb   :  { %v3834_v61 = vcombine.low %v2243_v48, %v2247_v8  ;;  %v2259_v28 = vrot.slane %v6746_v37, %v6183_v13  ;;  %v3830_v20 = vrot.slane %v3816_v44, %v6218_v43  ;;  %v3835_v26 = vcombine.low %v2251_v2, %v2255_v50 }
 0x2fc   :  { %v3842_v49 = vrot.slane %v3832_v62, %v6218_v43  ;;  %v3849_v29 = vrot.slane %v3833_v22, %v6218_v43  ;;  %v6807_v15 = vadd.f32 %v6179_v46, %v1368_v24  ;;  %v2263_v53 = vrot.slane %v6746_v37, %v6186_v54 }
 0x2fd   :  { %v3856_v3 = vrot.slane %v3834_v61, %v6218_v43  ;;  %v2267_v41 = vrot.slane %v6746_v37, %v6189_v31  ;;  %v3831_v38 = vcombine.low %v3823_v14, %v3830_v20  ;;  %v3863_v59 = vrot.slane %v3835_v26, %v6218_v43 }
 0x2fe   :  { %v3864_v63 = vcombine.low %v3842_v49, %v3849_v29  ;;  %v2271_v1 = vrot.slane %v6746_v37, %v6194_v42  ;;  %v2275_v23 = vrot.slane %v6746_v37, %v6198_v7  ;;  %v2279_v40 = vrot.slane %v6746_v37, %v6201_v56 }
 0x2ff   :  { %v2283_v47 = vrot.slane %v6746_v37, %v6204_v34  ;;  %v2287_v12 = vrot.slane %v6746_v37, %v6209_v55  ;;  %4563 = vperm.xlu0 %5238, %v3831_v38   ;;  %v3865_v57 = vcombine.low %v3856_v3, %v3863_v59  ;;  %v3881_v36 = vcombine.low %v2259_v28, %v2263_v53 }
 0x300   :  { %v3872_v17 = vrot.slane %v3864_v63, %v6218_v43  ;;  %v3882_v6 = vcombine.low %v2267_v41, %v2271_v1  ;;  %v1369_v30 = vadd.f32 %v7332_v16, %v1155_v60  ;;  %v3883_v27 = vcombine.low %v2275_v23, %v2279_v40  ;;  %v1161_v41 = vpop.xlane.xlu1 %1160 }
 0x301   :  { %v3884_v9 = vcombine.low %v2283_v47, %v2287_v12  ;;  %v2291_v19 = vrot.slane %v6753_v5, %v6183_v13  ;;  %v3879_v39 = vrot.slane %v3865_v57, %v6218_v43  ;;  %v3891_v51 = vrot.slane %v3881_v36, %v6218_v43  ;;  %v1164_v57 = vpop.xlane.xlu0 %1163  ;;  %v7334_v36 = vld [vmem:[#allocation10_spill] sm:$0xff] }
 0x302   :  { %v3898_v37 = vrot.slane %v3882_v6, %v6218_v43  ;;  %v2295_v35 = vrot.slane %v6753_v5, %v6186_v54  ;;  %v3905_v11 = vrot.slane %v3883_v27, %v6218_v43  ;;  %v1370_v4 = vadd.f32 %v7333_v52, %v1158_v21 }
 0x303   :  { %v3912_v10 = vrot.slane %v3884_v9, %v6218_v43  ;;  %v2299_v24 = vrot.slane %v6753_v5, %v6189_v31  ;;  %v3880_v18 = vcombine.low %v3872_v17, %v3879_v39  ;;  %v2303_v33 = vrot.slane %v6753_v5, %v6194_v42 }
 0x304   :  { %v3913_v58 = vcombine.low %v3891_v51, %v3898_v37  ;;  %v2307_v0 = vrot.slane %v6753_v5, %v6198_v7  ;;  %v2311_v45 = vrot.slane %v6753_v5, %v6201_v56  ;;  %v2315_v48 = vrot.slane %v6753_v5, %v6204_v34  ;;  %v7335_v51 = vld [vmem:[#allocation9_spill] sm:$0xff] }
 0x305   :  { %v3914_v25 = vcombine.low %v3905_v11, %v3912_v10  ;;  %v2319_v8 = vrot.slane %v6753_v5, %v6209_v55  ;;  %4566 = vperm.xlu1 %5239, %v3880_v18   ;;  %v6850_v2 = vadd.f32 %v6179_v46, %v1369_v30  ;;  %v3930_v50 = vcombine.low %v2291_v19, %v2295_v35 }
 0x306   :  { %v3921_v44 = vrot.slane %v3913_v58, %v6218_v43  ;;  %v3931_v62 = vcombine.low %v2299_v24, %v2303_v33  ;;  %v3932_v14 = vcombine.low %v2307_v0, %v2311_v45  ;;  %v2323_v28 = vrot.slane %v6798_v32, %v6183_v13 }
 0x307   :  { %v3928_v22 = vrot.slane %v3914_v25, %v6218_v43  ;;  %v3933_v61 = vcombine.low %v2315_v48, %v2319_v8  ;;  %v6857_v20 = vadd.f32 %v6179_v46, %v1370_v4  ;;  %v3940_v5 = vrot.slane %v3930_v50, %v6218_v43 }
 0x308   :  { %v3947_v26 = vrot.slane %v3931_v62, %v6218_v43  ;;  %v2327_v49 = vrot.slane %v6798_v32, %v6186_v54  ;;  %v3954_v3 = vrot.slane %v3932_v14, %v6218_v43  ;;  %v2331_v38 = vrot.slane %v6798_v32, %v6189_v31 }
 0x309   :  { %v3929_v29 = vcombine.low %v3921_v44, %v3928_v22  ;;  %v3961_v53 = vrot.slane %v3933_v61, %v6218_v43  ;;  %v2335_v63 = vrot.slane %v6798_v32, %v6194_v42  ;;  %v2339_v60 = vrot.slane %v6798_v32, %v6198_v7 }
 0x30a   :  { %v3962_v59 = vcombine.low %v3940_v5, %v3947_v26  ;;  %v2343_v1 = vrot.slane %v6798_v32, %v6201_v56  ;;  %v2347_v40 = vrot.slane %v6798_v32, %v6204_v34  ;;  %v2351_v47 = vrot.slane %v6798_v32, %v6209_v55 }
 0x30b   :  { %4569 = vperm.xlu0 %5238, %v3929_v29   ;;  %v3963_v23 = vcombine.low %v3954_v3, %v3961_v53  ;;  %v3979_v12 = vcombine.low %v2323_v28, %v2327_v49  ;;  %v1371_v6 = vadd.f32 %v7334_v36, %v1161_v41  ;;  %v3980_v21 = vcombine.low %v2331_v38, %v2335_v63  ;;  %v1167_v41 = vpop.xlane.xlu1 %1166 }
 0x30c   :  { %v3970_v17 = vrot.slane %v3962_v59, %v6218_v43  ;;  %v3981_v16 = vcombine.low %v2339_v60, %v2343_v1  ;;  %v3982_v27 = vcombine.low %v2347_v40, %v2351_v47  ;;  %v2355_v19 = vrot.slane %v6807_v15, %v6183_v13 }
 0x30d   :  { %v3977_v30 = vrot.slane %v3963_v23, %v6218_v43  ;;  %v3989_v9 = vrot.slane %v3979_v12, %v6218_v43  ;;  %v3996_v39 = vrot.slane %v3980_v21, %v6218_v43  ;;  %v1372_v37 = vadd.f32 %v7335_v51, %v1164_v57  ;;  %v1170_v57 = vpop.xlane.xlu0 %1169 }
 0x30e   :  { %v4003_v32 = vrot.slane %v3981_v16, %v6218_v43  ;;  %v2359_v35 = vrot.slane %v6807_v15, %v6186_v54  ;;  %v4010_v10 = vrot.slane %v3982_v27, %v6218_v43  ;;  %v2363_v52 = vrot.slane %v6807_v15, %v6189_v31 }
 0x30f   :  { %v3978_v11 = vcombine.low %v3970_v17, %v3977_v30  ;;  %v2367_v4 = vrot.slane %v6807_v15, %v6194_v42  ;;  %v4011_v24 = vcombine.low %v3989_v9, %v3996_v39  ;;  %v2371_v18 = vrot.slane %v6807_v15, %v6198_v7  ;;  %v7336_v17 = vld [vmem:[#allocation12_spill] sm:$0xff] }
 0x310   :  { %v2375_v58 = vrot.slane %v6807_v15, %v6201_v56  ;;  %v2379_v33 = vrot.slane %v6807_v15, %v6204_v34  ;;  %v4012_v0 = vcombine.low %v4003_v32, %v4010_v10  ;;  %v2383_v25 = vrot.slane %v6807_v15, %v6209_v55  ;;  %v7337_v32 = vld [vmem:[#allocation11_spill] sm:$0xff] }
 0x311   :  { %4572 = vperm.xlu1 %5239, %v3978_v11   ;;  %v4028_v45 = vcombine.low %v2355_v19, %v2359_v35  ;;  %v4029_v48 = vcombine.low %v2363_v52, %v2367_v4  ;;  %v6902_v8 = vadd.f32 %v6179_v46, %v1371_v6  ;;  %v4019_v44 = vrot.slane %v4011_v24, %v6218_v43 }
 0x312   :  { %v4030_v50 = vcombine.low %v2371_v18, %v2375_v58  ;;  %v2387_v62 = vrot.slane %v6850_v2, %v6183_v13  ;;  %v4026_v22 = vrot.slane %v4012_v0, %v6218_v43  ;;  %v4031_v14 = vcombine.low %v2379_v33, %v2383_v25 }
 0x313   :  { %v4038_v61 = vrot.slane %v4028_v45, %v6218_v43  ;;  %v4045_v28 = vrot.slane %v4029_v48, %v6218_v43  ;;  %v6911_v15 = vadd.f32 %v6179_v46, %v1372_v37  ;;  %v2391_v26 = vrot.slane %v6850_v2, %v6186_v54 }
 0x314   :  { %v4052_v5 = vrot.slane %v4030_v50, %v6218_v43  ;;  %v2395_v49 = vrot.slane %v6850_v2, %v6189_v31  ;;  %v4027_v29 = vcombine.low %v4019_v44, %v4026_v22  ;;  %v4059_v3 = vrot.slane %v4031_v14, %v6218_v43 }
 0x315   :  { %v4060_v53 = vcombine.low %v4038_v61, %v4045_v28  ;;  %v2399_v38 = vrot.slane %v6850_v2, %v6194_v42  ;;  %v2403_v59 = vrot.slane %v6850_v2, %v6198_v7  ;;  %v2407_v63 = vrot.slane %v6850_v2, %v6201_v56 }
 0x316   :  { %v2411_v60 = vrot.slane %v6850_v2, %v6204_v34  ;;  %v2415_v1 = vrot.slane %v6850_v2, %v6209_v55  ;;  %4575 = vperm.xlu0 %5238, %v4027_v29   ;;  %v4061_v23 = vcombine.low %v4052_v5, %v4059_v3  ;;  %v4077_v47 = vcombine.low %v2387_v62, %v2391_v26 }
 0x317   :  { %v4068_v40 = vrot.slane %v4060_v53, %v6218_v43  ;;  %v4078_v12 = vcombine.low %v2395_v49, %v2399_v38  ;;  %v1373_v36 = vadd.f32 %v7336_v17, %v1167_v41  ;;  %v4079_v6 = vcombine.low %v2403_v59, %v2407_v63  ;;  %v1173_v49 = vpop.xlane.xlu1 %1172 }
 0x318   :  { %v4080_v21 = vcombine.low %v2411_v60, %v2415_v1  ;;  %v2419_v16 = vrot.slane %v6857_v20, %v6183_v13  ;;  %v4075_v30 = vrot.slane %v4061_v23, %v6218_v43  ;;  %v4087_v27 = vrot.slane %v4077_v47, %v6218_v43  ;;  %v1176_v23 = vpop.xlane.xlu0 %1175  ;;  %v7338_v47 = vld [vmem:[#allocation15_spill] sm:$0xff] }
 0x319   :  { %v4094_v2 = vrot.slane %v4078_v12, %v6218_v43  ;;  %v2423_v9 = vrot.slane %v6857_v20, %v6186_v54  ;;  %v4101_v19 = vrot.slane %v4079_v6, %v6218_v43  ;;  %v1374_v51 = vadd.f32 %v7337_v32, %v1170_v57 }
 0x31a   :  { %v4108_v39 = vrot.slane %v4080_v21, %v6218_v43  ;;  %v2427_v37 = vrot.slane %v6857_v20, %v6189_v31  ;;  %v4076_v35 = vcombine.low %v4068_v40, %v4075_v30  ;;  %v2431_v10 = vrot.slane %v6857_v20, %v6194_v42 }
 0x31b   :  { %v4109_v11 = vcombine.low %v4087_v27, %v4094_v2  ;;  %v2435_v52 = vrot.slane %v6857_v20, %v6198_v7  ;;  %v2439_v24 = vrot.slane %v6857_v20, %v6201_v56  ;;  %v2443_v18 = vrot.slane %v6857_v20, %v6204_v34  ;;  %v7339_v27 = vld [vmem:[#allocation13_spill] sm:$0xff] }
 0x31c   :  { %v4110_v4 = vcombine.low %v4101_v19, %v4108_v39  ;;  %v2447_v58 = vrot.slane %v6857_v20, %v6209_v55  ;;  %4578 = vperm.xlu1 %5239, %v4076_v35   ;;  %v6954_v33 = vadd.f32 %v6179_v46, %v1373_v36  ;;  %v4126_v25 = vcombine.low %v2419_v16, %v2423_v9 }
 0x31d   :  { %v4117_v0 = vrot.slane %v4109_v11, %v6218_v43  ;;  %v4127_v45 = vcombine.low %v2427_v37, %v2431_v10  ;;  %v4128_v44 = vcombine.low %v2435_v52, %v2439_v24  ;;  %v2451_v62 = vrot.slane %v6902_v8, %v6183_v13  ;;  %v1180_v37 = vpop.xlane.xlu1 %1179 }
 0x31e   :  { %v4124_v48 = vrot.slane %v4110_v4, %v6218_v43  ;;  %v4129_v50 = vcombine.low %v2443_v18, %v2447_v58  ;;  %v6961_v22 = vadd.f32 %v6179_v46, %v1374_v51  ;;  %v4136_v20 = vrot.slane %v4126_v25, %v6218_v43 }
 0x31f   :  { %v4143_v14 = vrot.slane %v4127_v45, %v6218_v43  ;;  %v2455_v61 = vrot.slane %v6902_v8, %v6186_v54  ;;  %v4150_v5 = vrot.slane %v4128_v44, %v6218_v43  ;;  %v2459_v29 = vrot.slane %v6902_v8, %v6189_v31  ;;  %v7340_v45 = vld [vmem:[#allocation16_spill] sm:$0xff] }
 0x320   :  { %v4125_v28 = vcombine.low %v4117_v0, %v4124_v48  ;;  %v4157_v26 = vrot.slane %v4129_v50, %v6218_v43  ;;  %v2463_v53 = vrot.slane %v6902_v8, %v6194_v42  ;;  %v2467_v41 = vrot.slane %v6902_v8, %v6198_v7 }
 0x321   :  { %v4158_v3 = vcombine.low %v4136_v20, %v4143_v14  ;;  %v2471_v38 = vrot.slane %v6902_v8, %v6201_v56  ;;  %v2475_v63 = vrot.slane %v6902_v8, %v6204_v34  ;;  %v2479_v60 = vrot.slane %v6902_v8, %v6209_v55 }
 0x322   :  { %4581 = vperm.xlu0 %5238, %v4125_v28   ;;  %v4159_v59 = vcombine.low %v4150_v5, %v4157_v26  ;;  %v4175_v1 = vcombine.low %v2451_v62, %v2455_v61  ;;  %v1375_v12 = vadd.f32 %v7338_v47, %v1173_v49  ;;  %v4176_v57 = vcombine.low %v2459_v29, %v2463_v53 }
 0x323   :  { %v4166_v40 = vrot.slane %v4158_v3, %v6218_v43  ;;  %v4177_v17 = vcombine.low %v2467_v41, %v2471_v38  ;;  %v4178_v6 = vcombine.low %v2475_v63, %v2479_v60  ;;  %v2483_v16 = vrot.slane %v6911_v15, %v6183_v13 }
 0x324   :  { %v4173_v36 = vrot.slane %v4159_v59, %v6218_v43  ;;  %v4185_v21 = vrot.slane %v4175_v1, %v6218_v43  ;;  %v4192_v30 = vrot.slane %v4176_v57, %v6218_v43  ;;  %v1376_v2 = vadd.f32 %v7339_v27, %v1176_v23 }
 0x325   :  { %v4199_v8 = vrot.slane %v4177_v17, %v6218_v43  ;;  %v2487_v9 = vrot.slane %v6911_v15, %v6186_v54  ;;  %v4206_v39 = vrot.slane %v4178_v6, %v6218_v43  ;;  %v2491_v32 = vrot.slane %v6911_v15, %v6189_v31 }
 0x326   :  { %v4174_v19 = vcombine.low %v4166_v40, %v4173_v36  ;;  %v2495_v51 = vrot.slane %v6911_v15, %v6194_v42  ;;  %v4207_v35 = vcombine.low %v4185_v21, %v4192_v30  ;;  %v2499_v11 = vrot.slane %v6911_v15, %v6198_v7 }
 0x327   :  { %v2503_v10 = vrot.slane %v6911_v15, %v6201_v56  ;;  %v2507_v52 = vrot.slane %v6911_v15, %v6204_v34  ;;  %v4208_v4 = vcombine.low %v4199_v8, %v4206_v39  ;;  %v2511_v24 = vrot.slane %v6911_v15, %v6209_v55 }
 0x328   :  { %4584 = vperm.xlu1 %5239, %v4174_v19   ;;  %v4224_v18 = vcombine.low %v2483_v16, %v2487_v9  ;;  %v4225_v58 = vcombine.low %v2491_v32, %v2495_v51  ;;  %v4215_v0 = vrot.slane %v4207_v35, %v6218_v43  ;;  %v1377_v48 = vadd.f32 %v7340_v45, %v1180_v37  ;;  %v4495_v19 = vpop.permute.xlu0 %4494  ;;  %v7342_v32 = vld [vmem:[#allocation14_spill] sm:$0xff]  ;;  %v4498_v35 = vpop.permute.xlu1 %4497 }
 0x329   :  { %v4226_v25 = vcombine.low %v2499_v11, %v2503_v10  ;;  %v2515_v44 = vrot.slane %v6954_v33, %v6183_v13  ;;  %v4222_v50 = vrot.slane %v4208_v4, %v6218_v43  ;;  %v4227_v62 = vcombine.low %v2507_v52, %v2511_v24 }
 0x32a   :  { %v4234_v20 = vrot.slane %v4224_v18, %v6218_v43  ;;  %v4241_v14 = vrot.slane %v4225_v58, %v6218_v43  ;;  %v7014_v15 = vadd.f32 %v6179_v46, %v1377_v48  ;;  %v2519_v28 = vrot.slane %v6954_v33, %v6186_v54 }
 0x32b   :  { %v4248_v61 = vrot.slane %v4226_v25, %v6218_v43  ;;  %v2523_v5 = vrot.slane %v6954_v33, %v6189_v31  ;;  %v4223_v26 = vcombine.low %v4215_v0, %v4222_v50  ;;  %v4255_v49 = vrot.slane %v4227_v62, %v6218_v43 }
 0x32c   :  { %v4256_v29 = vcombine.low %v4234_v20, %v4241_v14  ;;  %v2527_v3 = vrot.slane %v6954_v33, %v6194_v42  ;;  %v7024_v53 = vadd.f32 %v6179_v46, %v1375_v12  ;;  %v7027_v41 = vadd.f32 %v6179_v46, %v1376_v2 }
 0x32d   :  { %v2643_v38 = vrot.slane %v7014_v15, %v6183_v13  ;;  %v2647_v59 = vrot.slane %v7014_v15, %v6186_v54  ;;  %4587 = vperm.xlu1 %5239, %v4223_v26   ;;  %v4257_v63 = vcombine.low %v4248_v61, %v4255_v49  ;;  %v2531_v1 = vrot.slane %v6954_v33, %v6198_v7 }
 0x32e   :  { %v4264_v60 = vrot.slane %v4256_v29, %v6218_v43  ;;  %v2535_v23 = vrot.slane %v6954_v33, %v6201_v56  ;;  %v2651_v46 = vrot.slane %v7014_v15, %v6189_v31  ;;  %v2655_v40 = vrot.slane %v7014_v15, %v6194_v42 }
 0x32f   :  { %v2539_v47 = vrot.slane %v6954_v33, %v6204_v34  ;;  %v2543_v12 = vrot.slane %v6954_v33, %v6209_v55  ;;  %v4271_v57 = vrot.slane %v4257_v63, %v6218_v43  ;;  %v4273_v17 = vcombine.low %v2515_v44, %v2519_v28  ;;  %v4501_v63 = vpop.permute.xlu1 %4500 }
 0x330   :  { %v4274_v36 = vcombine.low %v2523_v5, %v2527_v3  ;;  %v4275_v6 = vcombine.low %v2531_v1, %v2535_v23  ;;  %v7341_v16 = vlaneseq  ;;  %v2547_v8 = vrot.slane %v6961_v22, %v6183_v13 }
 0x331   :  { %v4276_v21 = vcombine.low %v2539_v47, %v2543_v12  ;;  %v4272_v27 = vcombine.low %v4264_v60, %v4271_v57  ;;  %v4283_v2 = vrot.slane %v4273_v17, %v6218_v43  ;;  %v2551_v11 = vrot.slane %v6961_v22, %v6186_v54 }
 0x332   :  { %v7048_v30 = vand.u32 127, %v7341_v16  ;;  %v4290_v9 = vrot.slane %v4274_v36, %v6218_v43  ;;  %v4297_v33 = vrot.slane %v4275_v6, %v6218_v43  ;;  %v2555_v52 = vrot.slane %v6961_v22, %v6189_v31 }
 0x333   :  { %v4304_v39 = vrot.slane %v4276_v21, %v6218_v43  ;;  %4590 = vperm.xlu1 %5239, %v4272_v27   ;;  %v2559_v4 = vrot.slane %v6961_v22, %v6194_v42  ;;  %v2563_v24 = vrot.slane %v6961_v22, %v6198_v7  ;;  %v2567_v25 = vrot.slane %v6961_v22, %v6201_v56 }
 0x334   :  { %v7058_v51 = vsub.s32 %v7048_v30, %v7342_v32  ;;  %v4613_v37 = vadd.s32 4294967288, %v7048_v30  ;;  %v4305_v10 = vcombine.low %v4283_v2, %v4290_v9  ;;  %v2571_v48 = vrot.slane %v6961_v22, %v6204_v34 }
 0x335   :  { %v4306_v18 = vcombine.low %v4297_v33, %v4304_v39  ;;  %v2575_v44 = vrot.slane %v6961_v22, %v6209_v55  ;;  %v4322_v50 = vcombine.low %v2547_v8, %v2551_v11  ;;  %v4323_v14 = vcombine.low %v2555_v52, %v2559_v4 }
 0x336   :  { %v4612_v58 = vrot.slane %v4495_v19, %v7058_v51  ;;  %v7071_v0 = vsub.s32 %v4613_v37, %v7342_v32  ;;  %v4313_v45 = vrot.slane %v4305_v10, %v6218_v43  ;;  %v4324_v61 = vcombine.low %v2563_v24, %v2567_v25 }
 0x337   :  { %v4320_v62 = vrot.slane %v4306_v18, %v6218_v43  ;;  %v4325_v28 = vcombine.low %v2571_v48, %v2575_v44  ;;  %v4332_v5 = vrot.slane %v4322_v50, %v6218_v43  ;;  %v4620_v26 = vadd.s32 4294967280, %v7048_v30 }
 0x338   :  { %v4617_v20 = vrot.slane %v4498_v35, %v7071_v0  ;;  %v4339_v3 = vrot.slane %v4323_v14, %v6218_v43  ;;  %v4346_v22 = vrot.slane %v4324_v61, %v6218_v43  ;;  %v2579_v23 = vrot.slane %v7024_v53, %v6183_v13 }
 0x339   :  { %v4321_v49 = vcombine.low %v4313_v45, %v4320_v62  ;;  %v4353_v60 = vrot.slane %v4325_v28, %v6218_v43  ;;  %v7089_v1 = vsub.s32 %v4620_v26, %v7342_v32  ;;  %v2583_v47 = vrot.slane %v7024_v53, %v6186_v54 }
 0x33a   :  { %v4619_v29 = vsel %vm4618_vm4, %v4617_v20, %v4612_v58  ;;  %v4354_v12 = vcombine.low %v4332_v5, %v4339_v3  ;;  %v2587_v57 = vrot.slane %v7024_v53, %v6189_v31  ;;  %v2591_v17 = vrot.slane %v7024_v53, %v6194_v42 }
 0x33b   :  { %4593 = vperm.xlu0 %5238, %v4321_v49   ;;  %v2595_v36 = vrot.slane %v7024_v53, %v6198_v7  ;;  %v4355_v6 = vcombine.low %v4346_v22, %v4353_v60  ;;  %v4624_v21 = vrot.slane %v4501_v63, %v7089_v1  ;;  %v2599_v8 = vrot.slane %v7024_v53, %v6201_v56  ;;  %v4504_v63 = vpop.permute.xlu1 %4503 }
 0x33c   :  { %v2603_v27 = vrot.slane %v7024_v53, %v6204_v34  ;;  %v4362_v2 = vrot.slane %v4354_v12, %v6218_v43  ;;  %v2607_v9 = vrot.slane %v7024_v53, %v6209_v55  ;;  %v4371_v33 = vcombine.low %v2579_v23, %v2583_v47 }
 0x33d   :  { %v4372_v19 = vcombine.low %v2587_v57, %v2591_v17  ;;  %v4369_v39 = vrot.slane %v4355_v6, %v6218_v43  ;;  %v7111_v37 = vsel %vm4625_vm5, %v4624_v21, %v4619_v29  ;;  %v4373_v35 = vcombine.low %v2595_v36, %v2599_v8  ;;  %v7160_v17 = vpop.permute.xlu0 %4521 }
 0x33e   :  { %v4469_v11 = vcombine.low %v2643_v38, %v2647_v59  ;;  %v4374_v10 = vcombine.low %v2603_v27, %v2607_v9  ;;  %v4381_v52 = vrot.slane %v4371_v33, %v6218_v43  ;;  %v4470_v4 = vcombine.low %v2651_v46, %v2655_v40 }
 0x33f   :  { %v4388_v53 = vrot.slane %v4372_v19, %v6218_v43  ;;  %v4370_v24 = vcombine.low %v4362_v2, %v4369_v39  ;;  %v4395_v18 = vrot.slane %v4373_v35, %v6218_v43  ;;  %v2611_v58 = vrot.slane %v7027_v41, %v6183_v13  ;;  %v4507_v60 = vpop.permute.xlu1 %4506 }
 0x340   :  { %v4402_v38 = vrot.slane %v4374_v10, %v6218_v43  ;;  %v2615_v25 = vrot.slane %v7027_v41, %v6186_v54  ;;  %v2619_v45 = vrot.slane %v7027_v41, %v6189_v31  ;;  %v2623_v15 = vrot.slane %v7027_v41, %v6194_v42 }
 0x341   :  { %v4403_v59 = vcombine.low %v4381_v52, %v4388_v53  ;;  %4596 = vperm.xlu0 %5238, %v4370_v24   ;;  %v2627_v46 = vrot.slane %v7027_v41, %v6198_v7  ;;  %v2631_v40 = vrot.slane %v7027_v41, %v6201_v56  ;;  %v2635_v44 = vrot.slane %v7027_v41, %v6204_v34  ;;  %v7164_v6 = vpop.permute.xlu0 %4527 }
 0x342   :  { %v4404_v13 = vcombine.low %v4395_v18, %v4402_v38  ;;  %v2639_v54 = vrot.slane %v7027_v41, %v6209_v55  ;;  %v4420_v31 = vcombine.low %v2611_v58, %v2615_v25  ;;  %v4421_v50 = vcombine.low %v2619_v45, %v2623_v15 }
 0x343   :  { %v4411_v48 = vrot.slane %v4403_v59, %v6218_v43  ;;  %v4422_v62 = vcombine.low %v2627_v46, %v2631_v40  ;;  %v4477_v7 = vrot.slane %v4469_v11, %v6218_v43  ;;  %v4484_v14 = vrot.slane %v4470_v4, %v6218_v43  ;;  %v4510_v23 = vpop.permute.xlu1 %4509 }
 0x344   :  { %v4418_v42 = vrot.slane %v4404_v13, %v6218_v43  ;;  %v4423_v20 = vcombine.low %v2635_v44, %v2639_v54  ;;  %v4430_v56 = vrot.slane %v4420_v31, %v6218_v43  ;;  %v4437_v61 = vrot.slane %v4421_v50, %v6218_v43 }
 0x345   :  { %v4444_v28 = vrot.slane %v4422_v62, %v6218_v43  ;;  %v4485_v55 = vcombine.low %v4477_v7, %v4484_v14  ;;  %v7166_v21 = vpop.permute.xlu0 %4533  ;;  %v4627_v10 = vadd.s32 4294967272, %v7048_v30  ;;  %v4634_v4 = vadd.s32 4294967264, %v7048_v30 }
 0x346   :  { %v4419_v34 = vcombine.low %v4411_v48, %v4418_v42  ;;  %v4451_v5 = vrot.slane %v4423_v20, %v6218_v43  ;;  %v4452_v41 = vcombine.low %v4430_v56, %v4437_v61  ;;  %v4641_v18 = vadd.s32 4294967256, %v7048_v30 }
 0x347   :  { %v4492_v49 = vrot.slane %v4485_v55, %v6218_v43  ;;  %v4513_v47 = vpop.permute.xlu1 %4512  ;;  %v7187_v24 = vsub.s32 %v4627_v10, %v7342_v32  ;;  %v4648_v38 = vadd.s32 4294967248, %v7048_v30  ;;  %v7196_v25 = vsub.s32 %v4634_v4, %v7342_v32 }
 0x348   :  { %4599 = vperm.xlu0 %5238, %v4419_v34   ;;  %v4453_v26 = vcombine.low %v4444_v28, %v4451_v5  ;;  %v4460_v29 = vrot.slane %v4452_v41, %v6218_v43  ;;  %v7200_v15 = vsub.s32 %v4641_v18, %v7342_v32  ;;  %v4669_v46 = vadd.s32 4294967224, %v7048_v30 }
 0x349   :  { %v4631_v45 = vrot.slane %v4504_v63, %v7187_v24  ;;  %v4651_v13 = vsub.s32 %v4648_v38, %v7342_v32  ;;  %v4655_v48 = vadd.s32 4294967240, %v7048_v30  ;;  %v4662_v54 = vadd.s32 4294967232, %v7048_v30 }
 0x34a   :  { %v4467_v3 = vrot.slane %v4453_v26, %v6218_v43  ;;  %v4638_v31 = vrot.slane %v4507_v60, %v7196_v25  ;;  %v4645_v62 = vrot.slane %v4510_v23, %v7200_v15  ;;  %v7215_v42 = vsub.s32 %v4669_v46, %v7342_v32 }
 0x34b   :  { %v7156_v12 = vpop.permute.xlu1 %4515  ;;  %v4633_v50 = vsel %vm4632_vm6, %v4631_v45, %v7111_v37  ;;  %v4652_v7 = vrot.slane %v4513_v47, %v4651_v13  ;;  %v4658_v14 = vsub.s32 %v4655_v48, %v7342_v32  ;;  %v4665_v61 = vsub.s32 %v4662_v54, %v7342_v32 }
 0x34c   :  { %v4468_v22 = vcombine.low %v4460_v29, %v4467_v3  ;;  %4605 = vperm.xlu0 %5238, %v4492_v49   ;;  %v7170_v27 = vpop.permute.xlu0 %4539  ;;  %v4683_v37 = vadd.s32 4294967208, %v7048_v30  ;;  %v4640_v34 = vsel %vm4639_vm7, %v4638_v31, %v4633_v50  ;;  %v4676_v5 = vadd.s32 4294967216, %v7048_v30 }
 0x34d   :  { %v4647_v41 = vsel %vm4646_vm8, %v4645_v62, %v4640_v34  ;;  %v4673_v26 = vrot.slane %v7160_v17, %v7215_v42  ;;  %v4659_v63 = vrot.slane %v7156_v12, %v4658_v14  ;;  %v4704_v38 = vadd.s32 4294967184, %v7048_v30 }
 0x34e   :  { %4602 = vperm.xlu1 %5239, %v4468_v22   ;;  %v4654_v22 = vsel %vm4653_vm9, %v4652_v7, %v4647_v41  ;;  %v4686_v17 = vsub.s32 %v4683_v37, %v7342_v32  ;;  %v4711_v48 = vadd.s32 4294967176, %v7048_v30  ;;  %vm4852_vm3 = vcmp.lt.s32.totalorder %v7341_v16, 300 }
 0x34f   :  { %v7158_v57 = vpop.permute.xlu1 %4518  ;;  %v4661_v18 = vsel %vm4660_vm10, %v4659_v63, %v4654_v22 }
 0x350   :  { %v4666_v47 = vrot.slane %v7158_v57, %v4665_v61 }
 0x352   :  { %v4668_v46 = vsel %vm4667_vm11, %v4666_v47, %v4661_v18 }
 0x353   :  { %v7162_v36 = vpop.permute.xlu1 %4524  ;;  %v4675_v37 = vsel %vm4674_vm12, %v4673_v26, %v4668_v46 }
 0x357   :  { %v7168_v8 = vpop.permute.xlu1 %4530 }
 0x358   :  { %v4546_v9 = vpop.permute.xlu0 %4545 }
 0x359   :  { %v4725_v28 = vrot.slane %v4546_v9, %v7071_v0 }
 0x35b   :  { %v7172_v2 = vpop.permute.xlu1 %4536 }
 0x35f   :  { %v4543_v33 = vpop.permute.xlu1 %4542 }
 0x360   :  { %v4721_v49 = vrot.slane %v4543_v33, %v7058_v51 }
 0x362   :  { %v4726_v9 = vsel %vm4618_vm4, %v4725_v28, %v4721_v49 }
 0x363   :  { %v7174_v19 = vpop.permute.xlu0 %4551  ;;  %v4549_v39 = vpop.permute.xlu1 %4548 }
 0x364   :  { %v4730_v55 = vrot.slane %v4549_v39, %v7089_v1  ;;  %v4735_v29 = vrot.slane %v7174_v19, %v7187_v24  ;;  %v4679_v19 = vsub.s32 %v4676_v5, %v7342_v32  ;;  %v4690_v39 = vadd.s32 4294967200, %v7048_v30 }
 0x366   :  { %v4731_v12 = vsel %vm4625_vm5, %v4730_v55, %v4726_v9  ;;  %v4693_v31 = vsub.s32 %v4690_v39, %v7342_v32 }
 0x367   :  { %v4736_v57 = vsel %vm4632_vm6, %v4735_v29, %v4731_v12 }
 0x369   :  { %v7178_v11 = vpop.permute.xlu1 %4554 }
 0x36a   :  { %v4740_v60 = vrot.slane %v7178_v11, %v7196_v25  ;;  %v4697_v11 = vadd.s32 4294967192, %v7048_v30 }
 0x36f   :  { %v7176_v35 = vpop.permute.xlu0 %4557 }
 0x370   :  { %v4745_v33 = vrot.slane %v7176_v35, %v7200_v15  ;;  %v4741_v35 = vsel %vm4639_vm7, %v4740_v60, %v4736_v57 }
 0x375   :  { %v7183_v53 = vpop.permute.xlu1 %4560 }
 0x376   :  { %v4750_v10 = vrot.slane %v7183_v53, %v4651_v13  ;;  %v4746_v53 = vsel %vm4646_vm8, %v4745_v33, %v4741_v35 }
 0x378   :  { %v4751_v50 = vsel %vm4653_vm9, %v4750_v10, %v4746_v53 }
 0x37a   :  { %v7181_v52 = vpop.permute.xlu0 %4563 }
 0x37b   :  { %v4755_v4 = vrot.slane %v7181_v52, %v4658_v14  ;;  %v4680_v52 = vrot.slane %v7162_v36, %v4679_v19 }
 0x37d   :  { %v4756_v30 = vsel %vm4660_vm10, %v4755_v4, %v4751_v50  ;;  %v4682_v5 = vsel %vm4681_vm13, %v4680_v52, %v4675_v37 }
 0x380   :  { %v7193_v59 = vpop.permute.xlu1 %4566 }
 0x381   :  { %v4760_v45 = vrot.slane %v7193_v59, %v4665_v61  ;;  %v4700_v59 = vsub.s32 %v4697_v11, %v7342_v32  ;;  %v4687_v61 = vrot.slane %v7164_v6, %v4686_v17 }
 0x383   :  { %v4761_v36 = vsel %vm4667_vm11, %v4760_v45, %v4756_v30  ;;  %v4701_v41 = vrot.slane %v7166_v21, %v4700_v59  ;;  %v4689_v22 = vsel %vm4688_vm14, %v4687_v61, %v4682_v5 }
 0x386   :  { %v7190_v58 = vpop.permute.xlu0 %4569 }
 0x387   :  { %v4765_v13 = vrot.slane %v7190_v58, %v7215_v42  ;;  %v4707_v58 = vsub.s32 %v4704_v38, %v7342_v32 }
 0x389   :  { %v4766_v28 = vsel %vm4674_vm12, %v4765_v13, %v4761_v36 }
 0x38c   :  { %v7207_v44 = vpop.permute.xlu1 %4572 }
 0x38d   :  { %v4770_v62 = vrot.slane %v7207_v44, %v4679_v19  ;;  %v4714_v44 = vsub.s32 %v4711_v48, %v7342_v32  ;;  %v4708_v32 = vrot.slane %v7172_v2, %v4707_v58 }
 0x38f   :  { %v4771_v6 = vsel %vm4681_vm13, %v4770_v62, %v4766_v28 }
 0x391   :  { %v7203_v40 = vpop.permute.xlu0 %4575 }
 0x392   :  { %v4775_v14 = vrot.slane %v7203_v40, %v4686_v17  ;;  %v4694_v40 = vrot.slane %v7168_v8, %v4693_v31  ;;  %v4715_v8 = vrot.slane %v7170_v27, %v4714_v44 }
 0x397   :  { %v7220_v56 = vpop.permute.xlu1 %4578 }
 0x398   :  { %v4780_v42 = vrot.slane %v7220_v56, %v4693_v31  ;;  %v4776_v56 = vsel %vm4688_vm14, %v4775_v14, %v4771_v6 }
 0x39a   :  { %v4781_v29 = vsel %vm4695_vm15, %v4780_v42, %v4776_v56 }
 0x39d   :  { %v7217_v20 = vpop.permute.xlu0 %4581 }
 0x39e   :  { %v4785_v34 = vrot.slane %v7217_v20, %v4700_v59 }
 0x3a0   :  { %v4786_v63 = vsel %vm4702_vm0, %v4785_v34, %v4781_v29 }
 0x3a3   :  { %v4585_v23 = vpop.permute.xlu1 %4584 }
 0x3a4   :  { %v4790_v55 = vrot.slane %v4585_v23, %v4707_v58  ;;  %v4696_v23 = vsel %vm4695_vm15, %v4694_v40, %v4689_v22 }
 0x3a5   :  { %v4703_v17 = vsel %vm4702_vm0, %v4701_v41, %v4696_v23 }
 0x3a6   :  { %v4791_v21 = vsel %vm4709_vm1, %v4790_v55, %v4786_v63  ;;  %v4710_v39 = vsel %vm4709_vm1, %v4708_v32, %v4703_v17 }
 0x3a7   :  { %v4717_v27 = vsel %vm4716_vm2, %v4715_v8, %v4710_v39 }
 0x3a8   :  { %v4588_v7 = vpop.permute.xlu1 %4587 }
 0x3a9   :  { %v4795_v49 = vrot.slane %v4588_v7, %v4714_v44 }
 0x3ab   :  { %v4796_v9 = vsel %vm4716_vm2, %v4795_v49, %v4791_v21 }
 0x3ae   :  { %v4591_v20 = vpop.permute.xlu1 %4590 }
 0x3af   :  { %v4800_v2 = vrot.slane %v4591_v20, %v7058_v51 }
 0x3b6   :  { %v7234_v3 = vpop.permute.xlu0 %4593 }
 0x3b7   :  { %v4804_v60 = vrot.slane %v7234_v3, %v7071_v0  ;;  %v4826_v3 = vcombine.low %v4717_v27, %v4796_v9 }
 0x3b9   :  { %v4805_v12 = vsel %vm4618_vm4, %v4804_v60, %v4800_v2  ;;  %v4833_v18 = vrot.slane %v4826_v3, %v6218_v43 }
 0x3bc   :  { %v4597_v54 = vpop.permute.xlu0 %4596 }
 0x3bd   :  { %v4809_v47 = vrot.slane %v4597_v54, %v7089_v1 }
 0x3bf   :  { %v4810_v11 = vsel %vm4625_vm5, %v4809_v47, %v4805_v12 }
 0x3c3   :  { %v4600_v26 = vpop.permute.xlu0 %4599 }
 0x3c4   :  { %v4814_v33 = vrot.slane %v4600_v26, %v7187_v24 }
 0x3c6   :  { %v4815_v57 = vsel %vm4632_vm6, %v4814_v33, %v4810_v11 }
 0x3c7   :  { %v4606_v19 = vpop.permute.xlu0 %4605 }
 0x3c8   :  { %v4824_v0 = vrot.slane %v4606_v19, %v7200_v15 }
 0x3c9   :  { %v4603_v10 = vpop.permute.xlu1 %4602 }
 0x3ca   :  { %v4819_v1 = vrot.slane %v4603_v10, %v7196_v25 }
 0x3cc   :  { %v4820_v51 = vsel %vm4639_vm7, %v4819_v1, %v4815_v57 }
 0x3cd   :  { %v4825_v24 = vsel %vm4646_vm8, %v4824_v0, %v4820_v51 }
 0x3ce   :  { %v4840_v4 = vrot.slane %v4825_v24, %v6218_v43 }
 0x3d0   :  { %v4841_v38 = vcombine.low %v4833_v18, %v4840_v4 }
 0x3d2   :  { %v4848_v15 = vrot.slane %v4841_v38, %v6218_v43 }
 0x3d4   :  { %4854 = vst.msk [vmem:[#allocation3] sm:$0x7] %vm4852_vm3, %v4848_v15 }
 0x3d5   :  { %5255 = shalt.err (!%p5252_p4)
}
 0x3d6   :  { %4864 = dma.vmem_to_hbm [thread:$0]  %s4862_s2, 48, %s7315_s10, [#allocation4]  }
 0x3d7   :  { %5264 = dma.done.wait [#allocation4], 48  }
 0x3d8   :  { %5265 = vsyncadd [#allocation4], 4294967248 }
 0x3d9   :  { %4868 = vsyncpa [#allocation4], 1 }

</bundles_post_ra>
